<compile_context>
chip_gen: v5e
topology: v5e:2x2
jax: 0.10.0
libtpu: 0.0.40
codegen_flags: <defaults>
</compile_context>

<pallas_src>
import functools

import jax
import jax.numpy as jnp
from jax import lax
from jax.experimental import pallas as pl
from jax.experimental.pallas import tpu as pltpu

EPS = 1e-5


# ----------------------------------------------------------------------------
# In-kernel helpers (all values are (C, M); M = N*H*W lives on the lane axis)
# ----------------------------------------------------------------------------
def _bn_relu(y, gamma, beta):
    """Training-mode BatchNorm (biased batch stats) + ReLU.

    y: (C, M) -> per-channel stats are single-pass lane reductions.
    gamma/beta: (C, 1).
    """
    mean = jnp.mean(y, axis=-1, keepdims=True)
    mean_sq = jnp.mean(y * y, axis=-1, keepdims=True)
    inv_std = lax.rsqrt(mean_sq - mean * mean + EPS)
    return jnp.maximum((y - mean) * inv_std * gamma + beta, 0.0)


def _tap_masks(h_idx, w_idx, H, W):
    """Nine (1, M) f32 border masks (1 = tap inside the image), (kh, kw) order."""
    masks = []
    for kh in range(3):
        dh = kh - 1
        h_ok = jnp.logical_and(h_idx + dh >= 0.0, h_idx + dh <= float(H - 1))
        for kw in range(3):
            dw = kw - 1
            w_ok = jnp.logical_and(w_idx + dw >= 0.0, w_idx + dw <= float(W - 1))
            masks.append(jnp.where(jnp.logical_and(h_ok, w_ok), 1.0, 0.0))
    return masks


def _shifted_taps(val, W, M):
    """Nine lane-rotated copies of val (C, M).

    Tap (kh, kw) carries the value at spatial offset (kh-1, kw-1), i.e. a
    rotation by (kh-1)*W + (kw-1) along the flattened (n, h, w) lane axis;
    wrap-around entries are removed by the border masks.
    """
    taps = []
    for kh in range(3):
        for kw in range(3):
            d = (kh - 1) * W + (kw - 1)
            taps.append(val if d == 0 else pltpu.roll(val, (-d) % M, axis=1))
    return taps


def _conv3x3_same(val, w9t, masks, W, M):
    """3x3 'same' conv in (C, M) layout: masked im2col slab + one MXU matmul.

    val: (Cin, M); w9t: (Cout, 9*Cin) with columns ordered (kh, kw, cin).
    """
    taps = _shifted_taps(val, W, M)
    slab = jnp.concatenate([t * m for t, m in zip(taps, masks)], axis=0)
    return jnp.dot(w9t, slab, preferred_element_type=jnp.float32)


def _maxpool3x3_same(val, masks, W, M):
    """3x3 / stride 1 / pad 1 max pool in (C, M) layout."""
    taps = _shifted_taps(val, W, M)
    out = None
    for t, m in zip(taps, masks):
        cand = t * m + (m - 1.0) * 1e30   # out-of-image taps -> very negative
        out = cand if out is None else jnp.maximum(out, cand)
    return out


# ----------------------------------------------------------------------------
# Fused Inception_A kernel
# ----------------------------------------------------------------------------
def _make_inception_kernel(H, W, M, n1x1, n3x3red, n5x5red, pool_planes):
    def kernel(x_ref, hidx_ref, widx_ref,
               wh_ref, wp_ref, gh_ref, bh_ref,
               w2_ref, g2_ref, b2_ref,
               w3a_ref, g3a_ref, b3a_ref,
               w3b_ref, g3b_ref, b3b_ref,
               o_ref):
        x = x_ref[...]                                      # (Cin, M)
        masks = _tap_masks(hidx_ref[...], widx_ref[...], H, W)

        # --- branch heads: 3 merged 1x1 convs on x + (maxpool -> 1x1);
        #     all four heads share a single BN+ReLU pass -----------------
        pooled = _maxpool3x3_same(x, masks, W, M)
        heads_x = jnp.dot(wh_ref[...], x, preferred_element_type=jnp.float32)
        head_p = jnp.dot(wp_ref[...], pooled, preferred_element_type=jnp.float32)
        z = _bn_relu(jnp.concatenate([heads_x, head_p], axis=0),
                     gh_ref[...], bh_ref[...])

        c0 = 0
        y1 = z[c0:c0 + n1x1]                                # branch-1 output
        c0 += n1x1
        t2 = z[c0:c0 + n3x3red]
        c0 += n3x3red
        t3 = z[c0:c0 + n5x5red]
        c0 += n5x5red
        y4 = z[c0:c0 + pool_planes]                         # branch-4 output

        # --- branch 2: 1x1 -> 3x3 ---------------------------------------
        y2 = _bn_relu(_conv3x3_same(t2, w2_ref[...], masks, W, M),
                      g2_ref[...], b2_ref[...])

        # --- branch 3: 1x1 -> 3x3 -> 3x3 ---------------------------------
        u = _bn_relu(_conv3x3_same(t3, w3a_ref[...], masks, W, M),
                     g3a_ref[...], b3a_ref[...])
        y3 = _bn_relu(_conv3x3_same(u, w3b_ref[...], masks, W, M),
                      g3b_ref[...], b3b_ref[...])

        # Channel concat in torch.cat order; single lane-dense store (C_tot, M).
        o_ref[...] = jnp.concatenate([y1, y2, y3, y4], axis=0)

    return kernel


def inception_a_forward(params, x_nchw):
    """x_nchw: (N, Cin, H, W) f32  ->  (N, n1x1+n3x3+n5x5+pool, H, W) f32."""
    N, Cin, H, W = x_nchw.shape
    n1x1 = params["b1"]["w"].shape[1]
    n3x3red = params["b2_red"]["w"].shape[1]
    n3x3 = params["b2_conv"]["w"].shape[-1]
    n5x5red = params["b3_red"]["w"].shape[1]
    n5x5 = params["b3_conv1"]["w"].shape[-1]
    pool_planes = params["b4"]["w"].shape[1]
    M = N * H * W
    c_out = n1x1 + n3x3 + n5x5 + pool_planes

    # Activations in (C, M): channels on sublanes, flattened N*H*W on lanes.
    x_cm = jnp.transpose(x_nchw, (1, 0, 2, 3)).reshape(Cin, M)

    # Per-position spatial coordinates (f32) for the in-kernel border masks.
    m = jnp.arange(M, dtype=jnp.int32)
    w_idx = (m % W).astype(jnp.float32).reshape(1, M)
    h_idx = ((m // W) % H).astype(jnp.float32).reshape(1, M)

    # ---- static parameter packing ------------------------------------------
    # Conv bias is dropped: it is exactly cancelled by train-mode BN.
    def t1x1(p):                       # (Cin, Cout) -> (Cout, Cin)
        return jnp.transpose(p["w"], (1, 0))

    def t3x3(p):                       # (3,3,Cin,Cout) -> (Cout, 9*Cin)
        w = p["w"]
        return jnp.transpose(w, (3, 0, 1, 2)).reshape(w.shape[-1], -1)

    def gb(*ps):
        g = jnp.concatenate([p["gamma"] for p in ps]).reshape(-1, 1)
        b = jnp.concatenate([p["beta"] for p in ps]).reshape(-1, 1)
        return g, b

    wh = jnp.concatenate(
        [t1x1(params["b1"]), t1x1(params["b2_red"]), t1x1(params["b3_red"])],
        axis=0)                                             # (n1x1+2*red, Cin)
    wp = t1x1(params["b4"])                                 # (pool, Cin)
    gh, bh = gb(params["b1"], params["b2_red"], params["b3_red"], params["b4"])
    w2 = t3x3(params["b2_conv"])
    g2, b2 = gb(params["b2_conv"])
    w3a = t3x3(params["b3_conv1"])
    g3a, b3a = gb(params["b3_conv1"])
    w3b = t3x3(params["b3_conv2"])
    g3b, b3b = gb(params["b3_conv2"])

    kernel = _make_inception_kernel(H, W, M, n1x1, n3x3red, n5x5red, pool_planes)

    out_cm = pl.pallas_call(
        kernel,
        out_shape=jax.ShapeDtypeStruct((c_out, M), jnp.float32),
        in_specs=[pl.BlockSpec(memory_space=pltpu.MemorySpace.VMEM)
                  for _ in range(16)],
        out_specs=pl.BlockSpec(memory_space=pltpu.MemorySpace.VMEM),
        compiler_params=pltpu.CompilerParams(
            vmem_limit_bytes=32 * 1024 * 1024),
    )(x_cm, h_idx, w_idx, wh, wp, gh, bh,
      w2, g2, b2, w3a, g3a, b3a, w3b, g3b, b3b)

    # (C_total, N*H*W) -> NCHW
    return jnp.transpose(out_cm.reshape(c_out, N, H, W), (1, 0, 2, 3))


# ----------------------------------------------------------------------------
# Parameters (deterministic) and a pure-JAX reference for the sanity check
# ----------------------------------------------------------------------------
def init_inception_a_params(key, in_planes, n1x1, n3x3red, n3x3, n5x5red, n5x5,
                            pool_planes):
    keys = iter(jax.random.split(key, 32))

    def conv1x1_p(cin, cout):
        return dict(w=0.1 * jax.random.normal(next(keys), (cin, cout), jnp.float32),
                    b=0.1 * jax.random.normal(next(keys), (cout,), jnp.float32),
                    gamma=jnp.ones((cout,), jnp.float32) +
                          0.05 * jax.random.normal(next(keys), (cout,), jnp.float32),
                    beta=0.05 * jax.random.normal(next(keys), (cout,), jnp.float32))

    def conv3x3_p(cin, cout):
        return dict(w=0.1 * jax.random.normal(next(keys), (3, 3, cin, cout), jnp.float32),
                    b=0.1 * jax.random.normal(next(keys), (cout,), jnp.float32),
                    gamma=jnp.ones((cout,), jnp.float32) +
                          0.05 * jax.random.normal(next(keys), (cout,), jnp.float32),
                    beta=0.05 * jax.random.normal(next(keys), (cout,), jnp.float32))

    return dict(
        b1=conv1x1_p(in_planes, n1x1),
        b2_red=conv1x1_p(in_planes, n3x3red),
        b2_conv=conv3x3_p(n3x3red, n3x3),
        b3_red=conv1x1_p(in_planes, n5x5red),
        b3_conv1=conv3x3_p(n5x5red, n5x5),
        b3_conv2=conv3x3_p(n5x5, n5x5),
        b4=conv1x1_p(in_planes, pool_planes),
    )


def _bn_relu_ref(y, g, b):
    mean = jnp.mean(y, axis=(0, 1, 2), keepdims=True)
    var = jnp.mean((y - mean) ** 2, axis=(0, 1, 2), keepdims=True)
    return jnp.maximum((y - mean) * lax.rsqrt(var + EPS) * g + b, 0.0)


def _conv_ref(x, w_hwio, b, pad):
    y = lax.conv_general_dilated(x, w_hwio, (1, 1), pad,
                                 dimension_numbers=("NHWC", "HWIO", "NHWC"))
    return y + b


def inception_a_reference(params, x_nchw):
    x = jnp.transpose(x_nchw, (0, 2, 3, 1))

    def c1(x, p):
        return _bn_relu_ref(_conv_ref(x, p["w"][None, None], p["b"], "VALID"),
                            p["gamma"], p["beta"])

    def c3(x, p):
        return _bn_relu_ref(_conv_ref(x, p["w"], p["b"], "SAME"),
                            p["gamma"], p["beta"])

    y1 = c1(x, params["b1"])
    y2 = c3(c1(x, params["b2_red"]), params["b2_conv"])
    y3 = c3(c3(c1(x, params["b3_red"]), params["b3_conv1"]), params["b3_conv2"])
    pooled = lax.reduce_window(x, -jnp.inf, lax.max, (1, 3, 3, 1), (1, 1, 1, 1),
                               ((0, 0), (1, 1), (1, 1), (0, 0)))
    y4 = c1(pooled, params["b4"])
    y = jnp.concatenate([y1, y2, y3, y4], axis=-1)
    return jnp.transpose(y, (0, 3, 1, 2))


# ----------------------------------------------------------------------------
if __name__ == "__main__":
    # Module config (small): Inception_A(4, 8, 8, 16, 8, 16, 8)
    in_planes, n1x1, n3x3red, n3x3, n5x5red, n5x5, pool_planes = 4, 8, 8, 16, 8, 16, 8
    N, H, W = 2, 16, 16

    key = jax.random.PRNGKey(0)
    kx, kp = jax.random.split(key)
    x = jax.random.normal(kx, (N, in_planes, H, W), jnp.float32)  # NCHW input
    params = init_inception_a_params(kp, in_planes, n1x1, n3x3red, n3x3,
                                     n5x5red, n5x5, pool_planes)

    out = jax.jit(functools.partial(inception_a_forward, params))(x)
    out = jax.block_until_ready(out)

    assert out.shape == (N, n1x1 + n3x3 + n5x5 + pool_planes, H, W), out.shape

    ref = inception_a_reference(params, x)
    assert jnp.allclose(out, ref, rtol=5e-4, atol=5e-4), float(
        jnp.max(jnp.abs(out - ref)))

    print("KERNEL_OK")
</pallas_src>

<mosaic_0001>
module attributes {stable_mosaic.version = 11 : i64} {
  func.func @kernel(%arg0: memref<4x512xf32, #tpu.memory_space<vmem>>, %arg1: memref<1x512xf32, #tpu.memory_space<vmem>>, %arg2: memref<1x512xf32, #tpu.memory_space<vmem>>, %arg3: memref<24x4xf32, #tpu.memory_space<vmem>>, %arg4: memref<8x4xf32, #tpu.memory_space<vmem>>, %arg5: memref<32x1xf32, #tpu.memory_space<vmem>>, %arg6: memref<32x1xf32, #tpu.memory_space<vmem>>, %arg7: memref<16x72xf32, #tpu.memory_space<vmem>>, %arg8: memref<16x1xf32, #tpu.memory_space<vmem>>, %arg9: memref<16x1xf32, #tpu.memory_space<vmem>>, %arg10: memref<16x72xf32, #tpu.memory_space<vmem>>, %arg11: memref<16x1xf32, #tpu.memory_space<vmem>>, %arg12: memref<16x1xf32, #tpu.memory_space<vmem>>, %arg13: memref<16x144xf32, #tpu.memory_space<vmem>>, %arg14: memref<16x1xf32, #tpu.memory_space<vmem>>, %arg15: memref<16x1xf32, #tpu.memory_space<vmem>>, %arg16: memref<48x512xf32, #tpu.memory_space<vmem>>) attributes {dimension_semantics = [], scalar_prefetch = 0 : i64, scratch_operands = 0 : i64, tpu.core_type = #tpu.core_type<tc>} {
    %c0 = arith.constant 0 : index
    %c0_0 = arith.constant 0 : index
    %0 = vector.load %arg0[%c0, %c0_0] : memref<4x512xf32, #tpu.memory_space<vmem>>, vector<4x512xf32>
    %c0_1 = arith.constant 0 : index
    %c0_2 = arith.constant 0 : index
    %1 = vector.load %arg1[%c0_1, %c0_2] : memref<1x512xf32, #tpu.memory_space<vmem>>, vector<1x512xf32>
    %c0_3 = arith.constant 0 : index
    %c0_4 = arith.constant 0 : index
    %2 = vector.load %arg2[%c0_3, %c0_4] : memref<1x512xf32, #tpu.memory_space<vmem>>, vector<1x512xf32>
    %cst = arith.constant -1.000000e+00 : f32
    %3 = vector.broadcast %cst : f32 to vector<1x512xf32>
    %4 = arith.addf %1, %3 : vector<1x512xf32>
    %cst_5 = arith.constant 0.000000e+00 : f32
    %5 = vector.broadcast %cst_5 : f32 to vector<1x512xf32>
    %6 = arith.cmpf oge, %4, %5 : vector<1x512xf32>
    %cst_6 = arith.constant -1.000000e+00 : f32
    %7 = vector.broadcast %cst_6 : f32 to vector<1x512xf32>
    %8 = arith.addf %1, %7 : vector<1x512xf32>
    %cst_7 = arith.constant 1.500000e+01 : f32
    %9 = vector.broadcast %cst_7 : f32 to vector<1x512xf32>
    %10 = arith.cmpf ole, %8, %9 : vector<1x512xf32>
    %11 = arith.andi %6, %10 : vector<1x512xi1>
    %cst_8 = arith.constant -1.000000e+00 : f32
    %12 = vector.broadcast %cst_8 : f32 to vector<1x512xf32>
    %13 = arith.addf %2, %12 : vector<1x512xf32>
    %cst_9 = arith.constant 0.000000e+00 : f32
    %14 = vector.broadcast %cst_9 : f32 to vector<1x512xf32>
    %15 = arith.cmpf oge, %13, %14 : vector<1x512xf32>
    %cst_10 = arith.constant -1.000000e+00 : f32
    %16 = vector.broadcast %cst_10 : f32 to vector<1x512xf32>
    %17 = arith.addf %2, %16 : vector<1x512xf32>
    %cst_11 = arith.constant 1.500000e+01 : f32
    %18 = vector.broadcast %cst_11 : f32 to vector<1x512xf32>
    %19 = arith.cmpf ole, %17, %18 : vector<1x512xf32>
    %20 = arith.andi %15, %19 : vector<1x512xi1>
    %21 = arith.andi %11, %20 : vector<1x512xi1>
    %cst_12 = arith.constant 1.000000e+00 : f32
    %cst_13 = arith.constant 0.000000e+00 : f32
    %22 = vector.broadcast %cst_12 : f32 to vector<1x512xf32>
    %23 = vector.broadcast %cst_13 : f32 to vector<1x512xf32>
    %24 = arith.select %21, %22, %23 : vector<1x512xi1>, vector<1x512xf32>
    %cst_14 = arith.constant 0.000000e+00 : f32
    %25 = vector.broadcast %cst_14 : f32 to vector<1x512xf32>
    %26 = arith.addf %2, %25 : vector<1x512xf32>
    %cst_15 = arith.constant 0.000000e+00 : f32
    %27 = vector.broadcast %cst_15 : f32 to vector<1x512xf32>
    %28 = arith.cmpf oge, %26, %27 : vector<1x512xf32>
    %cst_16 = arith.constant 0.000000e+00 : f32
    %29 = vector.broadcast %cst_16 : f32 to vector<1x512xf32>
    %30 = arith.addf %2, %29 : vector<1x512xf32>
    %cst_17 = arith.constant 1.500000e+01 : f32
    %31 = vector.broadcast %cst_17 : f32 to vector<1x512xf32>
    %32 = arith.cmpf ole, %30, %31 : vector<1x512xf32>
    %33 = arith.andi %28, %32 : vector<1x512xi1>
    %34 = arith.andi %11, %33 : vector<1x512xi1>
    %cst_18 = arith.constant 1.000000e+00 : f32
    %cst_19 = arith.constant 0.000000e+00 : f32
    %35 = vector.broadcast %cst_18 : f32 to vector<1x512xf32>
    %36 = vector.broadcast %cst_19 : f32 to vector<1x512xf32>
    %37 = arith.select %34, %35, %36 : vector<1x512xi1>, vector<1x512xf32>
    %cst_20 = arith.constant 1.000000e+00 : f32
    %38 = vector.broadcast %cst_20 : f32 to vector<1x512xf32>
    %39 = arith.addf %2, %38 : vector<1x512xf32>
    %cst_21 = arith.constant 0.000000e+00 : f32
    %40 = vector.broadcast %cst_21 : f32 to vector<1x512xf32>
    %41 = arith.cmpf oge, %39, %40 : vector<1x512xf32>
    %cst_22 = arith.constant 1.000000e+00 : f32
    %42 = vector.broadcast %cst_22 : f32 to vector<1x512xf32>
    %43 = arith.addf %2, %42 : vector<1x512xf32>
    %cst_23 = arith.constant 1.500000e+01 : f32
    %44 = vector.broadcast %cst_23 : f32 to vector<1x512xf32>
    %45 = arith.cmpf ole, %43, %44 : vector<1x512xf32>
    %46 = arith.andi %41, %45 : vector<1x512xi1>
    %47 = arith.andi %11, %46 : vector<1x512xi1>
    %cst_24 = arith.constant 1.000000e+00 : f32
    %cst_25 = arith.constant 0.000000e+00 : f32
    %48 = vector.broadcast %cst_24 : f32 to vector<1x512xf32>
    %49 = vector.broadcast %cst_25 : f32 to vector<1x512xf32>
    %50 = arith.select %47, %48, %49 : vector<1x512xi1>, vector<1x512xf32>
    %cst_26 = arith.constant 0.000000e+00 : f32
    %51 = vector.broadcast %cst_26 : f32 to vector<1x512xf32>
    %52 = arith.addf %1, %51 : vector<1x512xf32>
    %cst_27 = arith.constant 0.000000e+00 : f32
    %53 = vector.broadcast %cst_27 : f32 to vector<1x512xf32>
    %54 = arith.cmpf oge, %52, %53 : vector<1x512xf32>
    %cst_28 = arith.constant 0.000000e+00 : f32
    %55 = vector.broadcast %cst_28 : f32 to vector<1x512xf32>
    %56 = arith.addf %1, %55 : vector<1x512xf32>
    %cst_29 = arith.constant 1.500000e+01 : f32
    %57 = vector.broadcast %cst_29 : f32 to vector<1x512xf32>
    %58 = arith.cmpf ole, %56, %57 : vector<1x512xf32>
    %59 = arith.andi %54, %58 : vector<1x512xi1>
    %cst_30 = arith.constant -1.000000e+00 : f32
    %60 = vector.broadcast %cst_30 : f32 to vector<1x512xf32>
    %61 = arith.addf %2, %60 : vector<1x512xf32>
    %cst_31 = arith.constant 0.000000e+00 : f32
    %62 = vector.broadcast %cst_31 : f32 to vector<1x512xf32>
    %63 = arith.cmpf oge, %61, %62 : vector<1x512xf32>
    %cst_32 = arith.constant -1.000000e+00 : f32
    %64 = vector.broadcast %cst_32 : f32 to vector<1x512xf32>
    %65 = arith.addf %2, %64 : vector<1x512xf32>
    %cst_33 = arith.constant 1.500000e+01 : f32
    %66 = vector.broadcast %cst_33 : f32 to vector<1x512xf32>
    %67 = arith.cmpf ole, %65, %66 : vector<1x512xf32>
    %68 = arith.andi %63, %67 : vector<1x512xi1>
    %69 = arith.andi %59, %68 : vector<1x512xi1>
    %cst_34 = arith.constant 1.000000e+00 : f32
    %cst_35 = arith.constant 0.000000e+00 : f32
    %70 = vector.broadcast %cst_34 : f32 to vector<1x512xf32>
    %71 = vector.broadcast %cst_35 : f32 to vector<1x512xf32>
    %72 = arith.select %69, %70, %71 : vector<1x512xi1>, vector<1x512xf32>
    %cst_36 = arith.constant 0.000000e+00 : f32
    %73 = vector.broadcast %cst_36 : f32 to vector<1x512xf32>
    %74 = arith.addf %2, %73 : vector<1x512xf32>
    %cst_37 = arith.constant 0.000000e+00 : f32
    %75 = vector.broadcast %cst_37 : f32 to vector<1x512xf32>
    %76 = arith.cmpf oge, %74, %75 : vector<1x512xf32>
    %cst_38 = arith.constant 0.000000e+00 : f32
    %77 = vector.broadcast %cst_38 : f32 to vector<1x512xf32>
    %78 = arith.addf %2, %77 : vector<1x512xf32>
    %cst_39 = arith.constant 1.500000e+01 : f32
    %79 = vector.broadcast %cst_39 : f32 to vector<1x512xf32>
    %80 = arith.cmpf ole, %78, %79 : vector<1x512xf32>
    %81 = arith.andi %76, %80 : vector<1x512xi1>
    %82 = arith.andi %59, %81 : vector<1x512xi1>
    %cst_40 = arith.constant 1.000000e+00 : f32
    %cst_41 = arith.constant 0.000000e+00 : f32
    %83 = vector.broadcast %cst_40 : f32 to vector<1x512xf32>
    %84 = vector.broadcast %cst_41 : f32 to vector<1x512xf32>
    %85 = arith.select %82, %83, %84 : vector<1x512xi1>, vector<1x512xf32>
    %cst_42 = arith.constant 1.000000e+00 : f32
    %86 = vector.broadcast %cst_42 : f32 to vector<1x512xf32>
    %87 = arith.addf %2, %86 : vector<1x512xf32>
    %cst_43 = arith.constant 0.000000e+00 : f32
    %88 = vector.broadcast %cst_43 : f32 to vector<1x512xf32>
    %89 = arith.cmpf oge, %87, %88 : vector<1x512xf32>
    %cst_44 = arith.constant 1.000000e+00 : f32
    %90 = vector.broadcast %cst_44 : f32 to vector<1x512xf32>
    %91 = arith.addf %2, %90 : vector<1x512xf32>
    %cst_45 = arith.constant 1.500000e+01 : f32
    %92 = vector.broadcast %cst_45 : f32 to vector<1x512xf32>
    %93 = arith.cmpf ole, %91, %92 : vector<1x512xf32>
    %94 = arith.andi %89, %93 : vector<1x512xi1>
    %95 = arith.andi %59, %94 : vector<1x512xi1>
    %cst_46 = arith.constant 1.000000e+00 : f32
    %cst_47 = arith.constant 0.000000e+00 : f32
    %96 = vector.broadcast %cst_46 : f32 to vector<1x512xf32>
    %97 = vector.broadcast %cst_47 : f32 to vector<1x512xf32>
    %98 = arith.select %95, %96, %97 : vector<1x512xi1>, vector<1x512xf32>
    %cst_48 = arith.constant 1.000000e+00 : f32
    %99 = vector.broadcast %cst_48 : f32 to vector<1x512xf32>
    %100 = arith.addf %1, %99 : vector<1x512xf32>
    %cst_49 = arith.constant 0.000000e+00 : f32
    %101 = vector.broadcast %cst_49 : f32 to vector<1x512xf32>
    %102 = arith.cmpf oge, %100, %101 : vector<1x512xf32>
    %cst_50 = arith.constant 1.000000e+00 : f32
    %103 = vector.broadcast %cst_50 : f32 to vector<1x512xf32>
    %104 = arith.addf %1, %103 : vector<1x512xf32>
    %cst_51 = arith.constant 1.500000e+01 : f32
    %105 = vector.broadcast %cst_51 : f32 to vector<1x512xf32>
    %106 = arith.cmpf ole, %104, %105 : vector<1x512xf32>
    %107 = arith.andi %102, %106 : vector<1x512xi1>
    %cst_52 = arith.constant -1.000000e+00 : f32
    %108 = vector.broadcast %cst_52 : f32 to vector<1x512xf32>
    %109 = arith.addf %2, %108 : vector<1x512xf32>
    %cst_53 = arith.constant 0.000000e+00 : f32
    %110 = vector.broadcast %cst_53 : f32 to vector<1x512xf32>
    %111 = arith.cmpf oge, %109, %110 : vector<1x512xf32>
    %cst_54 = arith.constant -1.000000e+00 : f32
    %112 = vector.broadcast %cst_54 : f32 to vector<1x512xf32>
    %113 = arith.addf %2, %112 : vector<1x512xf32>
    %cst_55 = arith.constant 1.500000e+01 : f32
    %114 = vector.broadcast %cst_55 : f32 to vector<1x512xf32>
    %115 = arith.cmpf ole, %113, %114 : vector<1x512xf32>
    %116 = arith.andi %111, %115 : vector<1x512xi1>
    %117 = arith.andi %107, %116 : vector<1x512xi1>
    %cst_56 = arith.constant 1.000000e+00 : f32
    %cst_57 = arith.constant 0.000000e+00 : f32
    %118 = vector.broadcast %cst_56 : f32 to vector<1x512xf32>
    %119 = vector.broadcast %cst_57 : f32 to vector<1x512xf32>
    %120 = arith.select %117, %118, %119 : vector<1x512xi1>, vector<1x512xf32>
    %cst_58 = arith.constant 0.000000e+00 : f32
    %121 = vector.broadcast %cst_58 : f32 to vector<1x512xf32>
    %122 = arith.addf %2, %121 : vector<1x512xf32>
    %cst_59 = arith.constant 0.000000e+00 : f32
    %123 = vector.broadcast %cst_59 : f32 to vector<1x512xf32>
    %124 = arith.cmpf oge, %122, %123 : vector<1x512xf32>
    %cst_60 = arith.constant 0.000000e+00 : f32
    %125 = vector.broadcast %cst_60 : f32 to vector<1x512xf32>
    %126 = arith.addf %2, %125 : vector<1x512xf32>
    %cst_61 = arith.constant 1.500000e+01 : f32
    %127 = vector.broadcast %cst_61 : f32 to vector<1x512xf32>
    %128 = arith.cmpf ole, %126, %127 : vector<1x512xf32>
    %129 = arith.andi %124, %128 : vector<1x512xi1>
    %130 = arith.andi %107, %129 : vector<1x512xi1>
    %cst_62 = arith.constant 1.000000e+00 : f32
    %cst_63 = arith.constant 0.000000e+00 : f32
    %131 = vector.broadcast %cst_62 : f32 to vector<1x512xf32>
    %132 = vector.broadcast %cst_63 : f32 to vector<1x512xf32>
    %133 = arith.select %130, %131, %132 : vector<1x512xi1>, vector<1x512xf32>
    %cst_64 = arith.constant 1.000000e+00 : f32
    %134 = vector.broadcast %cst_64 : f32 to vector<1x512xf32>
    %135 = arith.addf %2, %134 : vector<1x512xf32>
    %cst_65 = arith.constant 0.000000e+00 : f32
    %136 = vector.broadcast %cst_65 : f32 to vector<1x512xf32>
    %137 = arith.cmpf oge, %135, %136 : vector<1x512xf32>
    %cst_66 = arith.constant 1.000000e+00 : f32
    %138 = vector.broadcast %cst_66 : f32 to vector<1x512xf32>
    %139 = arith.addf %2, %138 : vector<1x512xf32>
    %cst_67 = arith.constant 1.500000e+01 : f32
    %140 = vector.broadcast %cst_67 : f32 to vector<1x512xf32>
    %141 = arith.cmpf ole, %139, %140 : vector<1x512xf32>
    %142 = arith.andi %137, %141 : vector<1x512xi1>
    %143 = arith.andi %107, %142 : vector<1x512xi1>
    %cst_68 = arith.constant 1.000000e+00 : f32
    %cst_69 = arith.constant 0.000000e+00 : f32
    %144 = vector.broadcast %cst_68 : f32 to vector<1x512xf32>
    %145 = vector.broadcast %cst_69 : f32 to vector<1x512xf32>
    %146 = arith.select %143, %144, %145 : vector<1x512xi1>, vector<1x512xf32>
    %c17_i32 = arith.constant 17 : i32
    %147 = tpu.dynamic_rotate %0 by %c17_i32 dim 1 : vector<4x512xf32>, i32 -> vector<4x512xf32>
    %c16_i32 = arith.constant 16 : i32
    %148 = tpu.dynamic_rotate %0 by %c16_i32 dim 1 : vector<4x512xf32>, i32 -> vector<4x512xf32>
    %c15_i32 = arith.constant 15 : i32
    %149 = tpu.dynamic_rotate %0 by %c15_i32 dim 1 : vector<4x512xf32>, i32 -> vector<4x512xf32>
    %c1_i32 = arith.constant 1 : i32
    %150 = tpu.dynamic_rotate %0 by %c1_i32 dim 1 : vector<4x512xf32>, i32 -> vector<4x512xf32>
    %c511_i32 = arith.constant 511 : i32
    %151 = tpu.dynamic_rotate %0 by %c511_i32 dim 1 : vector<4x512xf32>, i32 -> vector<4x512xf32>
    %c497_i32 = arith.constant 497 : i32
    %152 = tpu.dynamic_rotate %0 by %c497_i32 dim 1 : vector<4x512xf32>, i32 -> vector<4x512xf32>
    %c496_i32 = arith.constant 496 : i32
    %153 = tpu.dynamic_rotate %0 by %c496_i32 dim 1 : vector<4x512xf32>, i32 -> vector<4x512xf32>
    %c495_i32 = arith.constant 495 : i32
    %154 = tpu.dynamic_rotate %0 by %c495_i32 dim 1 : vector<4x512xf32>, i32 -> vector<4x512xf32>
    %155 = vector.broadcast %24 : vector<1x512xf32> to vector<4x512xf32>
    %156 = arith.mulf %147, %155 : vector<4x512xf32>
    %cst_70 = arith.constant 1.000000e+00 : f32
    %157 = vector.broadcast %cst_70 : f32 to vector<1x512xf32>
    %158 = arith.subf %24, %157 : vector<1x512xf32>
    %cst_71 = arith.constant 1.000000e+30 : f32
    %159 = vector.broadcast %cst_71 : f32 to vector<1x512xf32>
    %160 = arith.mulf %158, %159 : vector<1x512xf32>
    %161 = vector.broadcast %160 : vector<1x512xf32> to vector<4x512xf32>
    %162 = arith.addf %156, %161 : vector<4x512xf32>
    %163 = vector.broadcast %37 : vector<1x512xf32> to vector<4x512xf32>
    %164 = arith.mulf %148, %163 : vector<4x512xf32>
    %cst_72 = arith.constant 1.000000e+00 : f32
    %165 = vector.broadcast %cst_72 : f32 to vector<1x512xf32>
    %166 = arith.subf %37, %165 : vector<1x512xf32>
    %cst_73 = arith.constant 1.000000e+30 : f32
    %167 = vector.broadcast %cst_73 : f32 to vector<1x512xf32>
    %168 = arith.mulf %166, %167 : vector<1x512xf32>
    %169 = vector.broadcast %168 : vector<1x512xf32> to vector<4x512xf32>
    %170 = arith.addf %164, %169 : vector<4x512xf32>
    %171 = arith.maximumf %162, %170 : vector<4x512xf32>
    %172 = vector.broadcast %50 : vector<1x512xf32> to vector<4x512xf32>
    %173 = arith.mulf %149, %172 : vector<4x512xf32>
    %cst_74 = arith.constant 1.000000e+00 : f32
    %174 = vector.broadcast %cst_74 : f32 to vector<1x512xf32>
    %175 = arith.subf %50, %174 : vector<1x512xf32>
    %cst_75 = arith.constant 1.000000e+30 : f32
    %176 = vector.broadcast %cst_75 : f32 to vector<1x512xf32>
    %177 = arith.mulf %175, %176 : vector<1x512xf32>
    %178 = vector.broadcast %177 : vector<1x512xf32> to vector<4x512xf32>
    %179 = arith.addf %173, %178 : vector<4x512xf32>
    %180 = arith.maximumf %171, %179 : vector<4x512xf32>
    %181 = vector.broadcast %72 : vector<1x512xf32> to vector<4x512xf32>
    %182 = arith.mulf %150, %181 : vector<4x512xf32>
    %cst_76 = arith.constant 1.000000e+00 : f32
    %183 = vector.broadcast %cst_76 : f32 to vector<1x512xf32>
    %184 = arith.subf %72, %183 : vector<1x512xf32>
    %cst_77 = arith.constant 1.000000e+30 : f32
    %185 = vector.broadcast %cst_77 : f32 to vector<1x512xf32>
    %186 = arith.mulf %184, %185 : vector<1x512xf32>
    %187 = vector.broadcast %186 : vector<1x512xf32> to vector<4x512xf32>
    %188 = arith.addf %182, %187 : vector<4x512xf32>
    %189 = arith.maximumf %180, %188 : vector<4x512xf32>
    %190 = vector.broadcast %85 : vector<1x512xf32> to vector<4x512xf32>
    %191 = arith.mulf %0, %190 : vector<4x512xf32>
    %cst_78 = arith.constant 1.000000e+00 : f32
    %192 = vector.broadcast %cst_78 : f32 to vector<1x512xf32>
    %193 = arith.subf %85, %192 : vector<1x512xf32>
    %cst_79 = arith.constant 1.000000e+30 : f32
    %194 = vector.broadcast %cst_79 : f32 to vector<1x512xf32>
    %195 = arith.mulf %193, %194 : vector<1x512xf32>
    %196 = vector.broadcast %195 : vector<1x512xf32> to vector<4x512xf32>
    %197 = arith.addf %191, %196 : vector<4x512xf32>
    %198 = arith.maximumf %189, %197 : vector<4x512xf32>
    %199 = vector.broadcast %98 : vector<1x512xf32> to vector<4x512xf32>
    %200 = arith.mulf %151, %199 : vector<4x512xf32>
    %cst_80 = arith.constant 1.000000e+00 : f32
    %201 = vector.broadcast %cst_80 : f32 to vector<1x512xf32>
    %202 = arith.subf %98, %201 : vector<1x512xf32>
    %cst_81 = arith.constant 1.000000e+30 : f32
    %203 = vector.broadcast %cst_81 : f32 to vector<1x512xf32>
    %204 = arith.mulf %202, %203 : vector<1x512xf32>
    %205 = vector.broadcast %204 : vector<1x512xf32> to vector<4x512xf32>
    %206 = arith.addf %200, %205 : vector<4x512xf32>
    %207 = arith.maximumf %198, %206 : vector<4x512xf32>
    %208 = vector.broadcast %120 : vector<1x512xf32> to vector<4x512xf32>
    %209 = arith.mulf %152, %208 : vector<4x512xf32>
    %cst_82 = arith.constant 1.000000e+00 : f32
    %210 = vector.broadcast %cst_82 : f32 to vector<1x512xf32>
    %211 = arith.subf %120, %210 : vector<1x512xf32>
    %cst_83 = arith.constant 1.000000e+30 : f32
    %212 = vector.broadcast %cst_83 : f32 to vector<1x512xf32>
    %213 = arith.mulf %211, %212 : vector<1x512xf32>
    %214 = vector.broadcast %213 : vector<1x512xf32> to vector<4x512xf32>
    %215 = arith.addf %209, %214 : vector<4x512xf32>
    %216 = arith.maximumf %207, %215 : vector<4x512xf32>
    %217 = vector.broadcast %133 : vector<1x512xf32> to vector<4x512xf32>
    %218 = arith.mulf %153, %217 : vector<4x512xf32>
    %cst_84 = arith.constant 1.000000e+00 : f32
    %219 = vector.broadcast %cst_84 : f32 to vector<1x512xf32>
    %220 = arith.subf %133, %219 : vector<1x512xf32>
    %cst_85 = arith.constant 1.000000e+30 : f32
    %221 = vector.broadcast %cst_85 : f32 to vector<1x512xf32>
    %222 = arith.mulf %220, %221 : vector<1x512xf32>
    %223 = vector.broadcast %222 : vector<1x512xf32> to vector<4x512xf32>
    %224 = arith.addf %218, %223 : vector<4x512xf32>
    %225 = arith.maximumf %216, %224 : vector<4x512xf32>
    %226 = vector.broadcast %146 : vector<1x512xf32> to vector<4x512xf32>
    %227 = arith.mulf %154, %226 : vector<4x512xf32>
    %cst_86 = arith.constant 1.000000e+00 : f32
    %228 = vector.broadcast %cst_86 : f32 to vector<1x512xf32>
    %229 = arith.subf %146, %228 : vector<1x512xf32>
    %cst_87 = arith.constant 1.000000e+30 : f32
    %230 = vector.broadcast %cst_87 : f32 to vector<1x512xf32>
    %231 = arith.mulf %229, %230 : vector<1x512xf32>
    %232 = vector.broadcast %231 : vector<1x512xf32> to vector<4x512xf32>
    %233 = arith.addf %227, %232 : vector<4x512xf32>
    %234 = arith.maximumf %225, %233 : vector<4x512xf32>
    %c0_88 = arith.constant 0 : index
    %c0_89 = arith.constant 0 : index
    %235 = vector.load %arg3[%c0_88, %c0_89] : memref<24x4xf32, #tpu.memory_space<vmem>>, vector<24x4xf32>
    %cst_90 = arith.constant dense<0.000000e+00> : vector<24x512xf32>
    %236 = tpu.matmul %235, %0, %cst_90 {dimension_numbers = #tpu.dot_dimension_numbers<[1], [0], [0], [1], [0, 0, 1, 1], [], []>} : vector<24x4xf32>, vector<4x512xf32>, vector<24x512xf32> -> vector<24x512xf32>
    %c0_91 = arith.constant 0 : index
    %c0_92 = arith.constant 0 : index
    %237 = vector.load %arg4[%c0_91, %c0_92] : memref<8x4xf32, #tpu.memory_space<vmem>>, vector<8x4xf32>
    %cst_93 = arith.constant dense<0.000000e+00> : vector<8x512xf32>
    %238 = tpu.matmul %237, %234, %cst_93 {dimension_numbers = #tpu.dot_dimension_numbers<[1], [0], [0], [1], [0, 0, 1, 1], [], []>} : vector<8x4xf32>, vector<4x512xf32>, vector<8x512xf32> -> vector<8x512xf32>
    %239 = tpu.concatenate %236, %238 in 0 : vector<24x512xf32>, vector<8x512xf32> -> vector<32x512xf32>
    %c0_94 = arith.constant 0 : index
    %c0_95 = arith.constant 0 : index
    %240 = vector.load %arg5[%c0_94, %c0_95] : memref<32x1xf32, #tpu.memory_space<vmem>>, vector<32x1xf32>
    %c0_96 = arith.constant 0 : index
    %c0_97 = arith.constant 0 : index
    %241 = vector.load %arg6[%c0_96, %c0_97] : memref<32x1xf32, #tpu.memory_space<vmem>>, vector<32x1xf32>
    %cst_98 = arith.constant dense<0.000000e+00> : vector<32xf32>
    %242 = vector.multi_reduction <add>, %239, %cst_98 [1] : vector<32x512xf32> to vector<32xf32>
    %243 = vector.shape_cast %242 : vector<32xf32> to vector<32x1xf32>
    %cst_99 = arith.constant 5.120000e+02 : f32
    %244 = vector.broadcast %cst_99 : f32 to vector<32x1xf32>
    %245 = arith.divf %243, %244 : vector<32x1xf32>
    %246 = arith.mulf %239, %239 : vector<32x512xf32>
    %cst_100 = arith.constant dense<0.000000e+00> : vector<32xf32>
    %247 = vector.multi_reduction <add>, %246, %cst_100 [1] : vector<32x512xf32> to vector<32xf32>
    %248 = vector.shape_cast %247 : vector<32xf32> to vector<32x1xf32>
    %cst_101 = arith.constant 5.120000e+02 : f32
    %249 = vector.broadcast %cst_101 : f32 to vector<32x1xf32>
    %250 = arith.divf %248, %249 : vector<32x1xf32>
    %251 = arith.mulf %245, %245 : vector<32x1xf32>
    %252 = arith.subf %250, %251 : vector<32x1xf32>
    %cst_102 = arith.constant 9.99999974E-6 : f32
    %253 = vector.broadcast %cst_102 : f32 to vector<32x1xf32>
    %254 = arith.addf %252, %253 : vector<32x1xf32>
    %255 = math.rsqrt %254 : vector<32x1xf32>
    %256 = vector.broadcast %245 : vector<32x1xf32> to vector<32x512xf32>
    %257 = arith.subf %239, %256 : vector<32x512xf32>
    %258 = vector.broadcast %255 : vector<32x1xf32> to vector<32x512xf32>
    %259 = arith.mulf %257, %258 : vector<32x512xf32>
    %260 = vector.broadcast %240 : vector<32x1xf32> to vector<32x512xf32>
    %261 = arith.mulf %259, %260 : vector<32x512xf32>
    %262 = vector.broadcast %241 : vector<32x1xf32> to vector<32x512xf32>
    %263 = arith.addf %261, %262 : vector<32x512xf32>
    %cst_103 = arith.constant 0.000000e+00 : f32
    %264 = vector.broadcast %cst_103 : f32 to vector<32x512xf32>
    %265 = arith.maximumf %263, %264 : vector<32x512xf32>
    %266 = vector.extract_strided_slice %265 {offsets = [0, 0], sizes = [8, 512], strides = [1, 1]} : vector<32x512xf32> to vector<8x512xf32>
    %267 = vector.extract_strided_slice %265 {offsets = [8, 0], sizes = [8, 512], strides = [1, 1]} : vector<32x512xf32> to vector<8x512xf32>
    %268 = vector.extract_strided_slice %265 {offsets = [16, 0], sizes = [8, 512], strides = [1, 1]} : vector<32x512xf32> to vector<8x512xf32>
    %269 = vector.extract_strided_slice %265 {offsets = [24, 0], sizes = [8, 512], strides = [1, 1]} : vector<32x512xf32> to vector<8x512xf32>
    %c0_104 = arith.constant 0 : index
    %c0_105 = arith.constant 0 : index
    %270 = vector.load %arg7[%c0_104, %c0_105] : memref<16x72xf32, #tpu.memory_space<vmem>>, vector<16x72xf32>
    %c17_i32_106 = arith.constant 17 : i32
    %271 = tpu.dynamic_rotate %267 by %c17_i32_106 dim 1 : vector<8x512xf32>, i32 -> vector<8x512xf32>
    %c16_i32_107 = arith.constant 16 : i32
    %272 = tpu.dynamic_rotate %267 by %c16_i32_107 dim 1 : vector<8x512xf32>, i32 -> vector<8x512xf32>
    %c15_i32_108 = arith.constant 15 : i32
    %273 = tpu.dynamic_rotate %267 by %c15_i32_108 dim 1 : vector<8x512xf32>, i32 -> vector<8x512xf32>
    %c1_i32_109 = arith.constant 1 : i32
    %274 = tpu.dynamic_rotate %267 by %c1_i32_109 dim 1 : vector<8x512xf32>, i32 -> vector<8x512xf32>
    %c511_i32_110 = arith.constant 511 : i32
    %275 = tpu.dynamic_rotate %267 by %c511_i32_110 dim 1 : vector<8x512xf32>, i32 -> vector<8x512xf32>
    %c497_i32_111 = arith.constant 497 : i32
    %276 = tpu.dynamic_rotate %267 by %c497_i32_111 dim 1 : vector<8x512xf32>, i32 -> vector<8x512xf32>
    %c496_i32_112 = arith.constant 496 : i32
    %277 = tpu.dynamic_rotate %267 by %c496_i32_112 dim 1 : vector<8x512xf32>, i32 -> vector<8x512xf32>
    %c495_i32_113 = arith.constant 495 : i32
    %278 = tpu.dynamic_rotate %267 by %c495_i32_113 dim 1 : vector<8x512xf32>, i32 -> vector<8x512xf32>
    %279 = vector.broadcast %24 : vector<1x512xf32> to vector<8x512xf32>
    %280 = arith.mulf %271, %279 : vector<8x512xf32>
    %281 = vector.broadcast %37 : vector<1x512xf32> to vector<8x512xf32>
    %282 = arith.mulf %272, %281 : vector<8x512xf32>
    %283 = vector.broadcast %50 : vector<1x512xf32> to vector<8x512xf32>
    %284 = arith.mulf %273, %283 : vector<8x512xf32>
    %285 = vector.broadcast %72 : vector<1x512xf32> to vector<8x512xf32>
    %286 = arith.mulf %274, %285 : vector<8x512xf32>
    %287 = vector.broadcast %85 : vector<1x512xf32> to vector<8x512xf32>
    %288 = arith.mulf %267, %287 : vector<8x512xf32>
    %289 = vector.broadcast %98 : vector<1x512xf32> to vector<8x512xf32>
    %290 = arith.mulf %275, %289 : vector<8x512xf32>
    %291 = vector.broadcast %120 : vector<1x512xf32> to vector<8x512xf32>
    %292 = arith.mulf %276, %291 : vector<8x512xf32>
    %293 = vector.broadcast %133 : vector<1x512xf32> to vector<8x512xf32>
    %294 = arith.mulf %277, %293 : vector<8x512xf32>
    %295 = vector.broadcast %146 : vector<1x512xf32> to vector<8x512xf32>
    %296 = arith.mulf %278, %295 : vector<8x512xf32>
    %297 = tpu.concatenate %280, %282, %284, %286, %288, %290, %292, %294, %296 in 0 : vector<8x512xf32>, vector<8x512xf32>, vector<8x512xf32>, vector<8x512xf32>, vector<8x512xf32>, vector<8x512xf32>, vector<8x512xf32>, vector<8x512xf32>, vector<8x512xf32> -> vector<72x512xf32>
    %cst_114 = arith.constant dense<0.000000e+00> : vector<16x512xf32>
    %298 = tpu.matmul %270, %297, %cst_114 {dimension_numbers = #tpu.dot_dimension_numbers<[1], [0], [0], [1], [0, 0, 1, 1], [], []>} : vector<16x72xf32>, vector<72x512xf32>, vector<16x512xf32> -> vector<16x512xf32>
    %c0_115 = arith.constant 0 : index
    %c0_116 = arith.constant 0 : index
    %299 = vector.load %arg8[%c0_115, %c0_116] : memref<16x1xf32, #tpu.memory_space<vmem>>, vector<16x1xf32>
    %c0_117 = arith.constant 0 : index
    %c0_118 = arith.constant 0 : index
    %300 = vector.load %arg9[%c0_117, %c0_118] : memref<16x1xf32, #tpu.memory_space<vmem>>, vector<16x1xf32>
    %cst_119 = arith.constant dense<0.000000e+00> : vector<16xf32>
    %301 = vector.multi_reduction <add>, %298, %cst_119 [1] : vector<16x512xf32> to vector<16xf32>
    %302 = vector.shape_cast %301 : vector<16xf32> to vector<16x1xf32>
    %cst_120 = arith.constant 5.120000e+02 : f32
    %303 = vector.broadcast %cst_120 : f32 to vector<16x1xf32>
    %304 = arith.divf %302, %303 : vector<16x1xf32>
    %305 = arith.mulf %298, %298 : vector<16x512xf32>
    %cst_121 = arith.constant dense<0.000000e+00> : vector<16xf32>
    %306 = vector.multi_reduction <add>, %305, %cst_121 [1] : vector<16x512xf32> to vector<16xf32>
    %307 = vector.shape_cast %306 : vector<16xf32> to vector<16x1xf32>
    %cst_122 = arith.constant 5.120000e+02 : f32
    %308 = vector.broadcast %cst_122 : f32 to vector<16x1xf32>
    %309 = arith.divf %307, %308 : vector<16x1xf32>
    %310 = arith.mulf %304, %304 : vector<16x1xf32>
    %311 = arith.subf %309, %310 : vector<16x1xf32>
    %cst_123 = arith.constant 9.99999974E-6 : f32
    %312 = vector.broadcast %cst_123 : f32 to vector<16x1xf32>
    %313 = arith.addf %311, %312 : vector<16x1xf32>
    %314 = math.rsqrt %313 : vector<16x1xf32>
    %315 = vector.broadcast %304 : vector<16x1xf32> to vector<16x512xf32>
    %316 = arith.subf %298, %315 : vector<16x512xf32>
    %317 = vector.broadcast %314 : vector<16x1xf32> to vector<16x512xf32>
    %318 = arith.mulf %316, %317 : vector<16x512xf32>
    %319 = vector.broadcast %299 : vector<16x1xf32> to vector<16x512xf32>
    %320 = arith.mulf %318, %319 : vector<16x512xf32>
    %321 = vector.broadcast %300 : vector<16x1xf32> to vector<16x512xf32>
    %322 = arith.addf %320, %321 : vector<16x512xf32>
    %cst_124 = arith.constant 0.000000e+00 : f32
    %323 = vector.broadcast %cst_124 : f32 to vector<16x512xf32>
    %324 = arith.maximumf %322, %323 : vector<16x512xf32>
    %c0_125 = arith.constant 0 : index
    %c0_126 = arith.constant 0 : index
    %325 = vector.load %arg10[%c0_125, %c0_126] : memref<16x72xf32, #tpu.memory_space<vmem>>, vector<16x72xf32>
    %c17_i32_127 = arith.constant 17 : i32
    %326 = tpu.dynamic_rotate %268 by %c17_i32_127 dim 1 : vector<8x512xf32>, i32 -> vector<8x512xf32>
    %c16_i32_128 = arith.constant 16 : i32
    %327 = tpu.dynamic_rotate %268 by %c16_i32_128 dim 1 : vector<8x512xf32>, i32 -> vector<8x512xf32>
    %c15_i32_129 = arith.constant 15 : i32
    %328 = tpu.dynamic_rotate %268 by %c15_i32_129 dim 1 : vector<8x512xf32>, i32 -> vector<8x512xf32>
    %c1_i32_130 = arith.constant 1 : i32
    %329 = tpu.dynamic_rotate %268 by %c1_i32_130 dim 1 : vector<8x512xf32>, i32 -> vector<8x512xf32>
    %c511_i32_131 = arith.constant 511 : i32
    %330 = tpu.dynamic_rotate %268 by %c511_i32_131 dim 1 : vector<8x512xf32>, i32 -> vector<8x512xf32>
    %c497_i32_132 = arith.constant 497 : i32
    %331 = tpu.dynamic_rotate %268 by %c497_i32_132 dim 1 : vector<8x512xf32>, i32 -> vector<8x512xf32>
    %c496_i32_133 = arith.constant 496 : i32
    %332 = tpu.dynamic_rotate %268 by %c496_i32_133 dim 1 : vector<8x512xf32>, i32 -> vector<8x512xf32>
    %c495_i32_134 = arith.constant 495 : i32
    %333 = tpu.dynamic_rotate %268 by %c495_i32_134 dim 1 : vector<8x512xf32>, i32 -> vector<8x512xf32>
    %334 = vector.broadcast %24 : vector<1x512xf32> to vector<8x512xf32>
    %335 = arith.mulf %326, %334 : vector<8x512xf32>
    %336 = vector.broadcast %37 : vector<1x512xf32> to vector<8x512xf32>
    %337 = arith.mulf %327, %336 : vector<8x512xf32>
    %338 = vector.broadcast %50 : vector<1x512xf32> to vector<8x512xf32>
    %339 = arith.mulf %328, %338 : vector<8x512xf32>
    %340 = vector.broadcast %72 : vector<1x512xf32> to vector<8x512xf32>
    %341 = arith.mulf %329, %340 : vector<8x512xf32>
    %342 = vector.broadcast %85 : vector<1x512xf32> to vector<8x512xf32>
    %343 = arith.mulf %268, %342 : vector<8x512xf32>
    %344 = vector.broadcast %98 : vector<1x512xf32> to vector<8x512xf32>
    %345 = arith.mulf %330, %344 : vector<8x512xf32>
    %346 = vector.broadcast %120 : vector<1x512xf32> to vector<8x512xf32>
    %347 = arith.mulf %331, %346 : vector<8x512xf32>
    %348 = vector.broadcast %133 : vector<1x512xf32> to vector<8x512xf32>
    %349 = arith.mulf %332, %348 : vector<8x512xf32>
    %350 = vector.broadcast %146 : vector<1x512xf32> to vector<8x512xf32>
    %351 = arith.mulf %333, %350 : vector<8x512xf32>
    %352 = tpu.concatenate %335, %337, %339, %341, %343, %345, %347, %349, %351 in 0 : vector<8x512xf32>, vector<8x512xf32>, vector<8x512xf32>, vector<8x512xf32>, vector<8x512xf32>, vector<8x512xf32>, vector<8x512xf32>, vector<8x512xf32>, vector<8x512xf32> -> vector<72x512xf32>
    %cst_135 = arith.constant dense<0.000000e+00> : vector<16x512xf32>
    %353 = tpu.matmul %325, %352, %cst_135 {dimension_numbers = #tpu.dot_dimension_numbers<[1], [0], [0], [1], [0, 0, 1, 1], [], []>} : vector<16x72xf32>, vector<72x512xf32>, vector<16x512xf32> -> vector<16x512xf32>
    %c0_136 = arith.constant 0 : index
    %c0_137 = arith.constant 0 : index
    %354 = vector.load %arg11[%c0_136, %c0_137] : memref<16x1xf32, #tpu.memory_space<vmem>>, vector<16x1xf32>
    %c0_138 = arith.constant 0 : index
    %c0_139 = arith.constant 0 : index
    %355 = vector.load %arg12[%c0_138, %c0_139] : memref<16x1xf32, #tpu.memory_space<vmem>>, vector<16x1xf32>
    %cst_140 = arith.constant dense<0.000000e+00> : vector<16xf32>
    %356 = vector.multi_reduction <add>, %353, %cst_140 [1] : vector<16x512xf32> to vector<16xf32>
    %357 = vector.shape_cast %356 : vector<16xf32> to vector<16x1xf32>
    %cst_141 = arith.constant 5.120000e+02 : f32
    %358 = vector.broadcast %cst_141 : f32 to vector<16x1xf32>
    %359 = arith.divf %357, %358 : vector<16x1xf32>
    %360 = arith.mulf %353, %353 : vector<16x512xf32>
    %cst_142 = arith.constant dense<0.000000e+00> : vector<16xf32>
    %361 = vector.multi_reduction <add>, %360, %cst_142 [1] : vector<16x512xf32> to vector<16xf32>
    %362 = vector.shape_cast %361 : vector<16xf32> to vector<16x1xf32>
    %cst_143 = arith.constant 5.120000e+02 : f32
    %363 = vector.broadcast %cst_143 : f32 to vector<16x1xf32>
    %364 = arith.divf %362, %363 : vector<16x1xf32>
    %365 = arith.mulf %359, %359 : vector<16x1xf32>
    %366 = arith.subf %364, %365 : vector<16x1xf32>
    %cst_144 = arith.constant 9.99999974E-6 : f32
    %367 = vector.broadcast %cst_144 : f32 to vector<16x1xf32>
    %368 = arith.addf %366, %367 : vector<16x1xf32>
    %369 = math.rsqrt %368 : vector<16x1xf32>
    %370 = vector.broadcast %359 : vector<16x1xf32> to vector<16x512xf32>
    %371 = arith.subf %353, %370 : vector<16x512xf32>
    %372 = vector.broadcast %369 : vector<16x1xf32> to vector<16x512xf32>
    %373 = arith.mulf %371, %372 : vector<16x512xf32>
    %374 = vector.broadcast %354 : vector<16x1xf32> to vector<16x512xf32>
    %375 = arith.mulf %373, %374 : vector<16x512xf32>
    %376 = vector.broadcast %355 : vector<16x1xf32> to vector<16x512xf32>
    %377 = arith.addf %375, %376 : vector<16x512xf32>
    %cst_145 = arith.constant 0.000000e+00 : f32
    %378 = vector.broadcast %cst_145 : f32 to vector<16x512xf32>
    %379 = arith.maximumf %377, %378 : vector<16x512xf32>
    %c0_146 = arith.constant 0 : index
    %c0_147 = arith.constant 0 : index
    %380 = vector.load %arg13[%c0_146, %c0_147] : memref<16x144xf32, #tpu.memory_space<vmem>>, vector<16x144xf32>
    %c17_i32_148 = arith.constant 17 : i32
    %381 = tpu.dynamic_rotate %379 by %c17_i32_148 dim 1 : vector<16x512xf32>, i32 -> vector<16x512xf32>
    %c16_i32_149 = arith.constant 16 : i32
    %382 = tpu.dynamic_rotate %379 by %c16_i32_149 dim 1 : vector<16x512xf32>, i32 -> vector<16x512xf32>
    %c15_i32_150 = arith.constant 15 : i32
    %383 = tpu.dynamic_rotate %379 by %c15_i32_150 dim 1 : vector<16x512xf32>, i32 -> vector<16x512xf32>
    %c1_i32_151 = arith.constant 1 : i32
    %384 = tpu.dynamic_rotate %379 by %c1_i32_151 dim 1 : vector<16x512xf32>, i32 -> vector<16x512xf32>
    %c511_i32_152 = arith.constant 511 : i32
    %385 = tpu.dynamic_rotate %379 by %c511_i32_152 dim 1 : vector<16x512xf32>, i32 -> vector<16x512xf32>
    %c497_i32_153 = arith.constant 497 : i32
    %386 = tpu.dynamic_rotate %379 by %c497_i32_153 dim 1 : vector<16x512xf32>, i32 -> vector<16x512xf32>
    %c496_i32_154 = arith.constant 496 : i32
    %387 = tpu.dynamic_rotate %379 by %c496_i32_154 dim 1 : vector<16x512xf32>, i32 -> vector<16x512xf32>
    %c495_i32_155 = arith.constant 495 : i32
    %388 = tpu.dynamic_rotate %379 by %c495_i32_155 dim 1 : vector<16x512xf32>, i32 -> vector<16x512xf32>
    %389 = vector.broadcast %24 : vector<1x512xf32> to vector<16x512xf32>
    %390 = arith.mulf %381, %389 : vector<16x512xf32>
    %391 = vector.broadcast %37 : vector<1x512xf32> to vector<16x512xf32>
    %392 = arith.mulf %382, %391 : vector<16x512xf32>
    %393 = vector.broadcast %50 : vector<1x512xf32> to vector<16x512xf32>
    %394 = arith.mulf %383, %393 : vector<16x512xf32>
    %395 = vector.broadcast %72 : vector<1x512xf32> to vector<16x512xf32>
    %396 = arith.mulf %384, %395 : vector<16x512xf32>
    %397 = vector.broadcast %85 : vector<1x512xf32> to vector<16x512xf32>
    %398 = arith.mulf %379, %397 : vector<16x512xf32>
    %399 = vector.broadcast %98 : vector<1x512xf32> to vector<16x512xf32>
    %400 = arith.mulf %385, %399 : vector<16x512xf32>
    %401 = vector.broadcast %120 : vector<1x512xf32> to vector<16x512xf32>
    %402 = arith.mulf %386, %401 : vector<16x512xf32>
    %403 = vector.broadcast %133 : vector<1x512xf32> to vector<16x512xf32>
    %404 = arith.mulf %387, %403 : vector<16x512xf32>
    %405 = vector.broadcast %146 : vector<1x512xf32> to vector<16x512xf32>
    %406 = arith.mulf %388, %405 : vector<16x512xf32>
    %407 = tpu.concatenate %390, %392, %394, %396, %398, %400, %402, %404, %406 in 0 : vector<16x512xf32>, vector<16x512xf32>, vector<16x512xf32>, vector<16x512xf32>, vector<16x512xf32>, vector<16x512xf32>, vector<16x512xf32>, vector<16x512xf32>, vector<16x512xf32> -> vector<144x512xf32>
    %cst_156 = arith.constant dense<0.000000e+00> : vector<16x512xf32>
    %408 = tpu.matmul %380, %407, %cst_156 {dimension_numbers = #tpu.dot_dimension_numbers<[1], [0], [0], [1], [0, 0, 1, 1], [], []>} : vector<16x144xf32>, vector<144x512xf32>, vector<16x512xf32> -> vector<16x512xf32>
    %c0_157 = arith.constant 0 : index
    %c0_158 = arith.constant 0 : index
    %409 = vector.load %arg14[%c0_157, %c0_158] : memref<16x1xf32, #tpu.memory_space<vmem>>, vector<16x1xf32>
    %c0_159 = arith.constant 0 : index
    %c0_160 = arith.constant 0 : index
    %410 = vector.load %arg15[%c0_159, %c0_160] : memref<16x1xf32, #tpu.memory_space<vmem>>, vector<16x1xf32>
    %cst_161 = arith.constant dense<0.000000e+00> : vector<16xf32>
    %411 = vector.multi_reduction <add>, %408, %cst_161 [1] : vector<16x512xf32> to vector<16xf32>
    %412 = vector.shape_cast %411 : vector<16xf32> to vector<16x1xf32>
    %cst_162 = arith.constant 5.120000e+02 : f32
    %413 = vector.broadcast %cst_162 : f32 to vector<16x1xf32>
    %414 = arith.divf %412, %413 : vector<16x1xf32>
    %415 = arith.mulf %408, %408 : vector<16x512xf32>
    %cst_163 = arith.constant dense<0.000000e+00> : vector<16xf32>
    %416 = vector.multi_reduction <add>, %415, %cst_163 [1] : vector<16x512xf32> to vector<16xf32>
    %417 = vector.shape_cast %416 : vector<16xf32> to vector<16x1xf32>
    %cst_164 = arith.constant 5.120000e+02 : f32
    %418 = vector.broadcast %cst_164 : f32 to vector<16x1xf32>
    %419 = arith.divf %417, %418 : vector<16x1xf32>
    %420 = arith.mulf %414, %414 : vector<16x1xf32>
    %421 = arith.subf %419, %420 : vector<16x1xf32>
    %cst_165 = arith.constant 9.99999974E-6 : f32
    %422 = vector.broadcast %cst_165 : f32 to vector<16x1xf32>
    %423 = arith.addf %421, %422 : vector<16x1xf32>
    %424 = math.rsqrt %423 : vector<16x1xf32>
    %425 = vector.broadcast %414 : vector<16x1xf32> to vector<16x512xf32>
    %426 = arith.subf %408, %425 : vector<16x512xf32>
    %427 = vector.broadcast %424 : vector<16x1xf32> to vector<16x512xf32>
    %428 = arith.mulf %426, %427 : vector<16x512xf32>
    %429 = vector.broadcast %409 : vector<16x1xf32> to vector<16x512xf32>
    %430 = arith.mulf %428, %429 : vector<16x512xf32>
    %431 = vector.broadcast %410 : vector<16x1xf32> to vector<16x512xf32>
    %432 = arith.addf %430, %431 : vector<16x512xf32>
    %cst_166 = arith.constant 0.000000e+00 : f32
    %433 = vector.broadcast %cst_166 : f32 to vector<16x512xf32>
    %434 = arith.maximumf %432, %433 : vector<16x512xf32>
    %435 = tpu.concatenate %266, %324, %434, %269 in 0 : vector<8x512xf32>, vector<16x512xf32>, vector<16x512xf32>, vector<8x512xf32> -> vector<48x512xf32>
    %c0_167 = arith.constant 0 : index
    %c0_168 = arith.constant 0 : index
    %436 = vector.load %arg16[%c0_167, %c0_168] : memref<48x512xf32, #tpu.memory_space<vmem>>, vector<48x512xf32>
    tpu.vector_store %arg16[%c0_167, %c0_168], %435 {strides = array<i32>} : memref<48x512xf32, #tpu.memory_space<vmem>>, vector<48x512xf32>,
    return
  }
}

</mosaic_0001>

<bundles_post_ra>
// kernel: inception_a_forward.1
= control target key start
LH: loop header
LB: loop body
LE: loop exit
PB: predicated region body
PF: predicated region fallthrough
CT: control target
= control target key end

     0   :  { %s2487_s26 = smov 17   ;;  %s2488_s27 = smov 16   ;;  %v2490_v22 = vmov 0   ;;  %v4665_v23 = vmov 0.0   ;;  %vm426_vm7 = vcmask 1043456   ;;  %vm603_vm8 = vcmask 31744   ;;  %s4647_s0 = inlined_call_operand.vmem [shape: f32[4,512], index: 0, kind: input, shape index: {}]   ;;  %s4648_s1 = inlined_call_operand.vmem [shape: f32[1,512], index: 1, kind: input, shape index: {}]   ;;  %s4649_s2 = inlined_call_operand.vmem [shape: f32[1,512], index: 2, kind: input, shape index: {}]   ;;  %s4650_s5 = inlined_call_operand.vmem [shape: f32[32,1], index: 5, kind: input, shape index: {}]   ;;  %s4651_s6 = inlined_call_operand.vmem [shape: f32[32,1], index: 6, kind: input, shape index: {}]   ;;  %s4652_s3 = inlined_call_operand.vmem [shape: f32[24,4], index: 3, kind: input, shape index: {}]   ;;  %s4653_s4 = inlined_call_operand.vmem [shape: f32[8,4], index: 4, kind: input, shape index: {}]   ;;  %s4654_s12 = inlined_call_operand.vmem [shape: f32[16,1], index: 12, kind: input, shape index: {}]   ;;  %s4655_s11 = inlined_call_operand.vmem [shape: f32[16,1], index: 11, kind: input, shape index: {}]   ;;  %s4656_s7 = inlined_call_operand.vmem [shape: f32[16,72], index: 7, kind: input, shape index: {}]   ;;  %s4657_s10 = inlined_call_operand.vmem [shape: f32[16,72], index: 10, kind: input, shape index: {}]   ;;  %s4658_s16 = inlined_call_operand.vmem [shape: f32[48,512], index: 16, kind: output, shape index: {}]   ;;  %s4659_s8 = inlined_call_operand.vmem [shape: f32[16,1], index: 8, kind: input, shape index: {}]   ;;  %s4660_s9 = inlined_call_operand.vmem [shape: f32[16,1], index: 9, kind: input, shape index: {}]   ;;  %s4661_s13 = inlined_call_operand.vmem [shape: f32[16,144], index: 13, kind: input, shape index: {}]   ;;  %s4662_s14 = inlined_call_operand.vmem [shape: f32[16,1], index: 14, kind: input, shape index: {}]   ;;  %s4663_s15 = inlined_call_operand.vmem [shape: f32[16,1], index: 15, kind: input, shape index: {}]  }
   0x1   :  { %4747 = sst [smem:[#allocation46_spill]] %s4647_s0  ;;  %v2609_v12 = vld [vmem:[%s4648_s1] sm:$0xf]  ;;  %s2489_s1 = smov 15   ;;  %2462 = vset.pattern.permute.xlu1 %v2490_v22  ;;  %2464 = vset.pattern.permute.xlu0 %v2490_v22  ;;  %v822_v58 = vld [vmem:[%s4650_s5 + $0x8] sm:$0xff] }
   0x2   :  { %s4748_s23 = sld [smem:[#allocation46_spill]]  ;;  %v2614_v13 = vld [vmem:[%s4649_s2] sm:$0xf]  ;;  %vm80_vm2 = vcmp.ge.f32.partialorder %v2609_v12, 0.0  ;;  %vm81_vm3 = vcmp.le.f32.partialorder %v2609_v12, 15.0  ;;  %2463 = vset.pattern.permute.xlu2 %v2490_v22  ;;  %s2492_s2 = smov 1  }
   0x3   :  { %vm68_vm0 = vcmp.ge.f32.partialorder %v2614_v13, 0.0  ;;  %vm69_vm1 = vcmp.le.f32.partialorder %v2614_v13, 15.0  ;;  %vm2627_vm5 = vmand %vm80_vm2, %vm81_vm3  ;;  %s2493_s17 = smov 127   ;;  %s2494_s20 = smov 113  }
   0x4   :  { %vm2623_vm4 = vmand %vm68_vm0, %vm69_vm1  ;;  %s2495_s0 = smov 112   ;;  %s2496_s21 = smov 111  }
   0x5   :  { %vm85_vm6 = vmand %vm2627_vm5, %vm2623_vm4 }
   0x6   :  { %v86_v24 = vsel %vm85_vm6, 1.0, %v4665_v23 }
   0x7   :  { %v2398_v27 = vadd.f32 -1.0, %v86_v24  ;;  %v2646_v30 = vperm.slane %v86_v24, 3  ;;  %v2648_v32 = vperm.slane %v86_v24, 1  ;;  %v2654_v35 = vperm.slane %v86_v24, 2 }
   0x8   :  { %v2586_v0 = vld [vmem:[%s4748_s23 + $0x8] sm:$0xff]  ;;  %v2591_v1 = vld [vmem:[%s4748_s23] sm:$0xff]  ;;  %v2660_v41 = vperm.slane %v86_v24, 0 }
   0x9   :  { %103 = vst [vmem:[#allocation1 + $0x10] ss:$2 sm:$0xff] %v2586_v0  ;;  %v434_v31 = vmul.f32 1e+30, %v2398_v27  ;;  %v425_v36 = vrot.slane %v2646_v30, 4  ;;  %v424_v42 = vrot.slane %v2648_v32, 4 }
   0xa   :  { %101 = vst [vmem:[#allocation1] ss:$2 sm:$0xff] %v2591_v1 }
   0xb   :  { %4753 = vst [vmem:[#allocation2_spill] sm:$0xff] %v2646_v30  ;;  %v439_v37 = vperm.slane %v434_v31, 3  ;;  %v437_v40 = vperm.slane %v434_v31, 1  ;;  %v428_v43 = vsel %vm426_vm7, %v2654_v35, %v425_v36  ;;  %v438_v44 = vperm.slane %v434_v31, 2 }
   0xc   :  { %4754 = vst [vmem:[#allocation3_spill] sm:$0xff] %v2648_v32  ;;  %v436_v46 = vperm.slane %v434_v31, 0  ;;  %v427_v50 = vsel %vm426_vm7, %v2660_v41, %v424_v42  ;;  %v432_v51 = vmul.f32 %v428_v43, %v2586_v0  ;;  %v61_v31 = vadd.f32 -1.0, %v2614_v13 }
   0xd   :  { %4755 = vst [vmem:[#allocation4_spill] sm:$0xff] %v2654_v35  ;;  %v441_v45 = vrot.slane %v439_v37, 4  ;;  %v440_v47 = vrot.slane %v437_v40, 4  ;;  %v431_v55 = vmul.f32 %v427_v50, %v2591_v1  ;;  %v73_v37 = vadd.f32 1.0, %v2614_v13 }
   0xe   :  { %4756 = vst [vmem:[#allocation5_spill] sm:$0xff] %v2660_v41  ;;  %vm62_vm11 = vcmp.ge.f32.partialorder %v61_v31, 0.0  ;;  %vm63_vm12 = vcmp.le.f32.partialorder %v61_v31, 15.0  ;;  %v120_v42 = vlaneseq }
   0xf   :  { %v443_v54 = vsel %vm426_vm7, %v438_v44, %v441_v45  ;;  %v442_v56 = vsel %vm426_vm7, %v436_v46, %v440_v47  ;;  %vm2773_vm14 = vmand %vm62_vm11, %vm63_vm12  ;;  %vm74_vm1 = vcmp.ge.f32.partialorder %v73_v37, 0.0  ;;  %vm75_vm2 = vcmp.le.f32.partialorder %v73_v37, 15.0 }
  0x10   :  { %v106_v2 = vld.sshfl [vmem:[#allocation1 + $0x10] sm:$0xff pattern:$0x75316420]  ;;  %v107_v3 = vld.sshfl [vmem:[#allocation1 + $0x18] sm:$0xff pattern:$0x75316420]  ;;  %v447_v57 = vadd.f32 %v443_v54, %v432_v51  ;;  %v446_v59 = vadd.f32 %v442_v56, %v431_v55  ;;  %vm2793_vm3 = vmand %vm74_vm1, %vm75_vm2 }
  0x11   :  { %116 = vrot.lane.b32.xlu1 %v106_v2, %s2487_s26  ;;  %v104_v4 = vld.sshfl [vmem:[#allocation1] sm:$0xff pattern:$0x75316420]  ;;  %129 = vst [vmem:[#allocation1 + $0x10] ss:$2 sm:$0xff] %v2586_v0  ;;  %v823_v2 = vld [vmem:[%s4650_s5 + $0x10] sm:$0xff]  ;;  %vm83_vm11 = vmand %vm2627_vm5, %vm2773_vm14 }
  0x12   :  { %112 = vrot.lane.b32.xlu0 %v104_v4, %s2487_s26  ;;  %v105_v5 = vld.sshfl [vmem:[#allocation1 + $0x8] sm:$0xff pattern:$0x75316420]  ;;  %v2791_v44 = vand.u32 127, %v120_v42  ;;  %vm87_vm12 = vmand %vm2627_vm5, %vm2793_vm3 }
  0x13   :  { %127 = vst [vmem:[#allocation1] ss:$2 sm:$0xff] %v2591_v1 }
  0x14   :  { %vm194_vm5 = vcmp.lt.s32.totalorder %v2791_v44, 1  ;;  %vm218_vm2 = vcmp.lt.s32.totalorder %v2791_v44, 127 }
  0x18   :  { %v133_v6 = vld.sshfl [vmem:[#allocation1 + $0x18] sm:$0xff pattern:$0x75316420]  ;;  %v132_v7 = vld.sshfl [vmem:[#allocation1 + $0x10] sm:$0xff pattern:$0x75316420] }
  0x19   :  { %118 = vrot.lane.b32.xlu1 %v107_v3, %s2487_s26  ;;  %153 = vst [vmem:[#allocation1 + $0x10] ss:$2 sm:$0xff] %v2586_v0  ;;  %v826_v3 = vld [vmem:[%s4651_s6 + $0x8] sm:$0xff] }
  0x1a   :  { %114 = vrot.lane.b32.xlu0 %v105_v5, %s2487_s26  ;;  %v130_v8 = vld.sshfl [vmem:[#allocation1] sm:$0xff pattern:$0x75316420]  ;;  %v131_v9 = vld.sshfl [vmem:[#allocation1 + $0x8] sm:$0xff pattern:$0x75316420] }
  0x1b   :  { %138 = vrot.lane.b32.xlu2 %v130_v8, %s2488_s27  ;;  %151 = vst [vmem:[#allocation1] ss:$2 sm:$0xff] %v2591_v1  ;;  %v593_v8 = vld [vmem:[%s4652_s3] sm:$0xff] }
  0x20   :  { %v156_v10 = vld.sshfl [vmem:[#allocation1 + $0x10] sm:$0xff pattern:$0x75316420]  ;;  %v157_v11 = vld.sshfl [vmem:[#allocation1 + $0x18] sm:$0xff pattern:$0x75316420] }
  0x21   :  { %144 = vrot.lane.b32.xlu1 %v133_v6, %s2488_s27  ;;  %177 = vst [vmem:[#allocation1 + $0x10] ss:$2 sm:$0xff] %v2586_v0 }
  0x22   :  { %142 = vrot.lane.b32.xlu0 %v132_v7, %s2488_s27  ;;  %v155_v14 = vld.sshfl [vmem:[#allocation1 + $0x8] sm:$0xff pattern:$0x75316420]  ;;  %v154_v15 = vld.sshfl [vmem:[#allocation1] sm:$0xff pattern:$0x75316420] }
  0x23   :  { %175 = vst [vmem:[#allocation1] ss:$2 sm:$0xff] %v2591_v1  ;;  %140 = vrot.lane.b32.xlu2 %v131_v9, %s2488_s27 }
  0x28   :  { %v180_v17 = vld.sshfl [vmem:[#allocation1 + $0x10] sm:$0xff pattern:$0x75316420]  ;;  %v181_v18 = vld.sshfl [vmem:[#allocation1 + $0x18] sm:$0xff pattern:$0x75316420] }
  0x29   :  { %166 = vrot.lane.b32.xlu1 %v156_v10, %s2489_s1  ;;  %201 = vst [vmem:[#allocation1 + $0x10] ss:$2 sm:$0xff] %v2586_v0 }
  0x2a   :  { %164 = vrot.lane.b32.xlu0 %v155_v14, %s2489_s1  ;;  %v179_v20 = vld.sshfl [vmem:[#allocation1 + $0x8] sm:$0xff pattern:$0x75316420]  ;;  %v178_v21 = vld.sshfl [vmem:[#allocation1] sm:$0xff pattern:$0x75316420] }
  0x2b   :  { %199 = vst [vmem:[#allocation1] ss:$2 sm:$0xff] %v2591_v1  ;;  %162 = vrot.lane.b32.xlu2 %v154_v15, %s2489_s1  ;;  %v594_v14 = vld [vmem:[%s4652_s3 + $0x8] sm:$0xff]  ;;  %v595_v15 = vld [vmem:[%s4652_s3 + $0x10] sm:$0xff] }
  0x30   :  { %v205_v25 = vld.sshfl [vmem:[#allocation1 + $0x18] sm:$0xff pattern:$0x75316420]  ;;  %v204_v26 = vld.sshfl [vmem:[#allocation1 + $0x10] sm:$0xff pattern:$0x75316420] }
  0x31   :  { %188 = vrot.lane.b32.xlu1 %v179_v20, %s2492_s2  ;;  %225 = vst [vmem:[#allocation1 + $0x10] ss:$2 sm:$0xff] %v2586_v0 }
  0x32   :  { %186 = vrot.lane.b32.xlu0 %v178_v21, %s2492_s2  ;;  %v203_v28 = vld.sshfl [vmem:[#allocation1 + $0x8] sm:$0xff pattern:$0x75316420]  ;;  %v202_v29 = vld.sshfl [vmem:[#allocation1] sm:$0xff pattern:$0x75316420] }
  0x33   :  { %223 = vst [vmem:[#allocation1] ss:$2 sm:$0xff] %v2591_v1  ;;  %168 = vrot.lane.b32.xlu2 %v157_v11, %s2489_s1 }
  0x38   :  { %v228_v33 = vld.sshfl [vmem:[#allocation1 + $0x10] sm:$0xff pattern:$0x75316420]  ;;  %v2650_v34 = vld.sshfl [vmem:[#allocation1 + $0x18] sm:$0xff pattern:$0x75316420] }
  0x39   :  { %210 = vrot.lane.b32.xlu1 %v202_v29, %s2493_s17  ;;  %249 = vst [vmem:[#allocation1 + $0x10] ss:$2 sm:$0xff] %v2586_v0 }
  0x3a   :  { %192 = vrot.lane.b32.xlu0 %v181_v18, %s2492_s2  ;;  %v227_v38 = vld.sshfl [vmem:[#allocation1 + $0x8] sm:$0xff pattern:$0x75316420]  ;;  %v226_v39 = vld.sshfl [vmem:[#allocation1] sm:$0xff pattern:$0x75316420] }
  0x3b   :  { %190 = vrot.lane.b32.xlu2 %v180_v17, %s2492_s2  ;;  %247 = vst [vmem:[#allocation1] ss:$2 sm:$0xff] %v2591_v1 }
  0x40   :  { %v2665_v48 = vld.sshfl [vmem:[#allocation1 + $0x10] sm:$0xff pattern:$0x75316420]  ;;  %v2667_v49 = vld.sshfl [vmem:[#allocation1 + $0x18] sm:$0xff pattern:$0x75316420] }
  0x41   :  { %216 = vrot.lane.b32.xlu1 %v205_v25, %s2493_s17  ;;  %273 = vst [vmem:[#allocation1 + $0x10] ss:$2 sm:$0xff] %v2586_v0 }
  0x42   :  { %214 = vrot.lane.b32.xlu0 %v204_v26, %s2493_s17  ;;  %v250_v52 = vld.sshfl [vmem:[#allocation1] sm:$0xff pattern:$0x75316420]  ;;  %v251_v53 = vld.sshfl [vmem:[#allocation1 + $0x8] sm:$0xff pattern:$0x75316420] }
  0x43   :  { %271 = vst [vmem:[#allocation1] ss:$2 sm:$0xff] %v2591_v1  ;;  %212 = vrot.lane.b32.xlu2 %v203_v28, %s2493_s17  ;;  %v57_v28 = vadd.f32 -1.0, %v2609_v12 }
  0x45   :  { %vm58_vm9 = vcmp.ge.f32.partialorder %v57_v28, 0.0  ;;  %vm59_vm10 = vcmp.le.f32.partialorder %v57_v28, 15.0 }
  0x46   :  { %vm2766_vm13 = vmand %vm58_vm9, %vm59_vm10  ;;  %vm146_vm9 = vcmp.lt.s32.totalorder %v2791_v44, 16  ;;  %vm122_vm10 = vcmp.lt.s32.totalorder %v2791_v44, 17 }
  0x47   :  { %vm71_vm15 = vmand %vm2766_vm13, %vm2623_vm4 }
  0x48   :  { %v276_v60 = vld.sshfl [vmem:[#allocation1 + $0x10] sm:$0xff pattern:$0x75316420]  ;;  %v277_v61 = vld.sshfl [vmem:[#allocation1 + $0x18] sm:$0xff pattern:$0x75316420]  ;;  %vm65_vm0 = vmand %vm2766_vm13, %vm2773_vm14 }
  0x49   :  { %991 = vperm.xlu1 %2462, %v822_v58   ;;  %452 = vst [vmem:[#allocation1 + $0x10] ss:$2 sm:$0xff] %v447_v57  ;;  %v72_v13 = vsel %vm71_vm15, 1.0, %v4665_v23  ;;  %v66_v43 = vsel %vm65_vm0, 1.0, %v4665_v23  ;;  %vm77_vm6 = vmand %vm2766_vm13, %vm2793_vm3  ;;  %vm170_vm13 = vcmp.lt.s32.totalorder %v2791_v44, 15 }
  0x4a   :  { %236 = vrot.lane.b32.xlu0 %v227_v38, %s2494_s20  ;;  %v274_v62 = vld.sshfl [vmem:[#allocation1] sm:$0xff pattern:$0x75316420]  ;;  %v275_v63 = vld.sshfl [vmem:[#allocation1 + $0x8] sm:$0xff pattern:$0x75316420] }
  0x4b   :  { %450 = vst [vmem:[#allocation1] ss:$2 sm:$0xff] %v446_v59  ;;  %234 = vrot.lane.b32.xlu2 %v226_v39, %s2494_s20  ;;  %v2395_v47 = vadd.f32 -1.0, %v72_v13  ;;  %v2808_v51 = vperm.slane %v72_v13, 1  ;;  %v2826_v58 = vperm.slane %v66_v43, 0  ;;  %v2828_v59 = vperm.slane %v66_v43, 3 }
  0x4c   :  { %v2856_v28 = vperm.slane %v72_v13, 3 }
  0x4d   :  { %4764 = vst [vmem:[#allocation7_spill] sm:$0xff] %v2808_v51 }
  0x4e   :  { %4765 = vst [vmem:[#allocation8_spill] sm:$0xff] %v2826_v58 }
  0x4f   :  { %4766 = vst [vmem:[#allocation9_spill] sm:$0xff] %v2828_v59 }
  0x50   :  { %v2691_v4 = vld.sshfl [vmem:[#allocation1 + $0x10] sm:$0xff pattern:$0x75316420]  ;;  %v2693_v5 = vld.sshfl [vmem:[#allocation1 + $0x18] sm:$0xff pattern:$0x75316420] }
  0x51   :  { %4757 = vst [vmem:[#allocation6_spill] sm:$0xff] %v2691_v4  ;;  %996 = vperm.xlu1 %2462, %v823_v2  }
  0x52   :  { %598 = vst [vmem:[#allocation1 + $0x10] ss:$2 sm:$0xff] %v2586_v0  ;;  %v2696_v6 = vld.sshfl [vmem:[#allocation1] sm:$0xff pattern:$0x75316420]  ;;  %238 = vrot.lane.b32.xlu0 %v228_v33, %s2494_s20  ;;  %v827_v0 = vld [vmem:[%s4651_s6 + $0x10] sm:$0xff] }
  0x53   :  { %v2698_v7 = vld.sshfl [vmem:[#allocation1 + $0x8] sm:$0xff pattern:$0x75316420]  ;;  %1027 = vperm.xlu2 %2463, %v826_v3   ;;  %v2836_v3 = vperm.slane %v66_v43, 1  ;;  %4772 = vst [vmem:[#allocation15_spill] sm:$0xff] %v2856_v28 }
  0x54   :  { %596 = vst [vmem:[#allocation1] ss:$2 sm:$0xff] %v2591_v1 }
  0x55   :  { %4767 = vst [vmem:[#allocation10_spill] sm:$0xff] %v2836_v3 }
  0x59   :  { %v601_v9 = vld.sshfl [vmem:[#allocation1 + $0x10] sm:$0xff pattern:$0x75316420]  ;;  %v602_v10 = vld.sshfl [vmem:[#allocation1 + $0x18] sm:$0xff pattern:$0x75316420]  ;;  %258 = vrot.lane.b32.xlu1 %v250_v52, %s2495_s0 }
  0x5a   :  { %2411 = vmatpush.msk.msra.mxu2 %vm426_vm7, %v601_v9  ;;  %2415 = vmatpush.msk.msra.mxu3 %vm426_vm7, %v602_v10  ;;  %v2810_v52 = vmul.f32 1e+30, %v2395_v47  ;;  %v2869_v47 = vsel %vm87_vm12, 1.0, %v4665_v23  ;;  %vm290_vm12 = vcmp.lt.s32.totalorder %v2791_v44, 111 }
  0x5b   :  { %2412 = vmatmul.msk.f32.vlgmr.msra.gmra.mxu2 %vm603_vm8, %v593_v8  ;;  %2416 = vmatmul.msk.f32.vlgmr.msra.gmra.mxu3 %vm603_vm8, %v593_v8  ;;  %v599_v1 = vld.sshfl [vmem:[#allocation1] sm:$0xff pattern:$0x75316420]  ;;  %v600_v11 = vld.sshfl [vmem:[#allocation1 + $0x8] sm:$0xff pattern:$0x75316420] }
  0x5c   :  { %2403 = vmatpush.msk.msra.mxu0 %vm426_vm7, %v599_v1  ;;  %2407 = vmatpush.msk.msra.mxu1 %vm426_vm7, %v600_v11  ;;  %v2845_v1 = vsel %vm83_vm11, 1.0, %v4665_v23  ;;  %v342_v42 = vperm.slane %v2810_v52, 3  ;;  %v2399_v32 = vadd.f32 -1.0, %v2869_v47  ;;  %vm242_vm11 = vcmp.lt.s32.totalorder %v2791_v44, 113 }
  0x5d   :  { %2404 = vmatmul.msk.f32.vlgmr.msra.gmra.mxu0 %vm603_vm8, %v593_v8  ;;  %2408 = vmatmul.msk.f32.vlgmr.msra.gmra.mxu1 %vm603_vm8, %v593_v8  ;;  %v2838_v8 = vperm.slane %v66_v43, 2 }
  0x5e   :  { %1032 = vperm.xlu0 %2464, %v827_v0   ;;  %240 = vrot.lane.b32.xlu2 %v2650_v34, %s2494_s20  ;;  %v2842_v0 = vperm.slane %v72_v13, 0 }
  0x5f   :  { %4768 = vst [vmem:[#allocation11_spill] sm:$0xff] %v2838_v8 }
  0x60   :  { %4769 = vst [vmem:[#allocation12_spill] sm:$0xff] %v2842_v0 }
  0x61   :  { %262 = vrot.lane.b32.xlu1 %v2665_v48, %s2495_s0 }
  0x63   :  { %2413 = vmatmul.msk.f32.gmra.mxu2 %vm603_vm8, %v594_v14  ;;  %2417 = vmatmul.msk.f32.gmra.mxu3 %vm603_vm8, %v594_v14 }
  0x65   :  { %2405 = vmatmul.msk.f32.gmra.mxu0 %vm603_vm8, %v594_v14  ;;  %2409 = vmatmul.msk.f32.gmra.mxu1 %vm603_vm8, %v594_v14  ;;  %v339_v14 = vperm.slane %v2810_v52, 0 }
  0x66   :  { %282 = vrot.lane.b32.xlu0 %v274_v62, %s2496_s21  ;;  %260 = vrot.lane.b32.xlu2 %v251_v53, %s2495_s0  ;;  %v78_v53 = vsel %vm77_vm6, 1.0, %v4665_v23 }
  0x67   :  { %v2396_v56 = vadd.f32 -1.0, %v78_v53  ;;  %v2865_v19 = vperm.slane %v78_v53, 0 }
  0x69   :  { %286 = vrot.lane.b32.xlu1 %v276_v60, %s2496_s21  ;;  %v340_v60 = vperm.slane %v2810_v52, 1  ;;  %v2858_v31 = vmul.f32 1e+30, %v2396_v56  ;;  %4773 = vst [vmem:[#allocation16_spill] sm:$0xff] %v2865_v19  ;;  %v2879_v56 = vperm.slane %v2845_v1, 2 }
  0x6b   :  { %2414 = vmatmul.msk.f32.gmra.mxu2 %vm603_vm8, %v595_v15  ;;  %2418 = vmatmul.msk.f32.gmra.mxu3 %vm603_vm8, %v595_v15  ;;  %4777 = vst [vmem:[#allocation20_spill] sm:$0xff] %v2879_v56 }
  0x6d   :  { %2406 = vmatmul.msk.f32.gmra.mxu0 %vm603_vm8, %v595_v15  ;;  %2410 = vmatmul.msk.f32.gmra.mxu1 %vm603_vm8, %v595_v15  ;;  %v2854_v15 = vperm.slane %v72_v13, 2  ;;  %v89_v13 = vadd.f32 1.0, %v2609_v12  ;;  %v371_v12 = vperm.slane %v2858_v31, 0 }
  0x6e   :  { %288 = vrot.lane.b32.xlu0 %v277_v61, %s2496_s21  ;;  %284 = vrot.lane.b32.xlu2 %v275_v63, %s2496_s21 }
  0x6f   :  { %4771 = vst [vmem:[#allocation14_spill] sm:$0xff] %v2854_v15  ;;  %vm90_vm15 = vcmp.ge.f32.partialorder %v89_v13, 0.0  ;;  %vm91_vm0 = vcmp.le.f32.partialorder %v89_v13, 15.0  ;;  %v373_v13 = vperm.slane %v2858_v31, 2 }
  0x70   :  { %vm2936_vm1 = vmand %vm90_vm15, %vm91_vm0 }
  0x71   :  { %vm93_vm6 = vmand %vm2936_vm1, %vm2773_vm14 }
  0x72   :  { %vm95_vm14 = vmand %vm2936_vm1, %vm2623_vm4 }
  0x73   :  { %vm97_vm4 = vmand %vm2936_vm1, %vm2793_vm3  ;;  %vm266_vm3 = vcmp.lt.s32.totalorder %v2791_v44, 112 }
  0x75   :  { %v2740_v17 = vpop.permute.xlu2 %138 }
  0x76   :  { %264 = vrot.lane.b32.xlu2 %v2667_v49, %s2495_s0  ;;  %v2394_v49 = vadd.f32 -1.0, %v66_v43  ;;  %v2397_v43 = vadd.f32 -1.0, %v2845_v1 }
  0x78   :  { %v2813_v54 = vmul.f32 1e+30, %v2394_v49  ;;  %v2872_v49 = vperm.slane %v78_v53, 3  ;;  %v2910_v30 = vmul.f32 1e+30, %v2397_v43 }
  0x7a   :  { %v311_v63 = vperm.slane %v2813_v54, 0  ;;  %v314_v2 = vperm.slane %v2813_v54, 3  ;;  %v312_v9 = vperm.slane %v2813_v54, 1  ;;  %v313_v10 = vperm.slane %v2813_v54, 2  ;;  %4774 = vst [vmem:[#allocation17_spill] sm:$0xff] %v2872_v49 }
  0x7b   :  { %v2874_v54 = vperm.slane %v78_v53, 1 }
  0x7d   :  { %v2744_v18 = vpop.permute.xlu2 %140  ;;  %4775 = vst [vmem:[#allocation18_spill] sm:$0xff] %v2874_v54 }
  0x7e   :  { %v149_v55 = vsel %vm146_vm9, %v2740_v17, %v2744_v18 }
  0x7f   :  { %v333_v61 = vmul.f32 %v2808_v51, %v149_v55  ;;  %v2876_v55 = vperm.slane %v78_v53, 2 }
  0x81   :  { %v2860_v34 = vadd.f32 %v340_v60, %v333_v61  ;;  %4776 = vst [vmem:[#allocation19_spill] sm:$0xff] %v2876_v55 }
  0x83   :  { %v2746_v20 = vpop.permute.xlu1 %116 }
  0x84   :  { %v2748_v21 = vpop.permute.xlu0 %112 }
  0x85   :  { %v2750_v22 = vpop.permute.xlu2 %162 }
  0x8b   :  { %v2752_v24 = vpop.permute.xlu1 %118 }
  0x8c   :  { %v2754_v25 = vpop.permute.xlu0 %114  ;;  %v123_v60 = vsel %vm122_vm10, %v2746_v20, %v2752_v24  ;;  %v126_v61 = vsel %vm122_vm10, %v2752_v24, %v2748_v21  ;;  %v372_v24 = vperm.slane %v2858_v31, 1 }
  0x8d   :  { %v2756_v26 = vpop.permute.xlu2 %168  ;;  %v124_v23 = vsel %vm122_vm10, %v2754_v25, %v2746_v20  ;;  %v125_v51 = vsel %vm122_vm10, %v2748_v21, %v2754_v25  ;;  %v304_v20 = vmul.f32 %v2826_v58, %v126_v61  ;;  %v307_v35 = vmul.f32 %v2828_v59, %v123_v60 }
  0x8e   :  { %v174_v25 = vsel %vm170_vm13, %v2756_v26, %v2750_v22  ;;  %v306_v43 = vmul.f32 %v2838_v8, %v124_v23  ;;  %v2932_v58 = vperm.slane %v2845_v1, 1  ;;  %v2934_v59 = vmul.f32 1e+30, %v2399_v32 }
  0x8f   :  { %v2953_v8 = vperm.slane %v2845_v1, 0 }
  0x90   :  { %v321_v4 = vadd.f32 %v313_v10, %v306_v43  ;;  %v406_v43 = vperm.slane %v2910_v30, 3 }
  0x93   :  { %v2758_v27 = vpop.permute.xlu1 %144 }
  0x94   :  { %v2761_v29 = vpop.permute.xlu0 %142  ;;  %v150_v37 = vsel %vm146_vm9, %v2758_v27, %v2740_v17  ;;  %v305_v17 = vmul.f32 %v2836_v3, %v125_v51  ;;  %v404_v3 = vperm.slane %v2910_v30, 1 }
  0x95   :  { %v2764_v33 = vpop.permute.xlu2 %190  ;;  %v147_v21 = vsel %vm146_vm9, %v2761_v29, %v2758_v27  ;;  %v332_v60 = vmul.f32 %v2842_v0, %v150_v37  ;;  %v148_v27 = vsel %vm146_vm9, %v2744_v18, %v2761_v29  ;;  %v364_v37 = vmul.f32 %v2865_v19, %v174_v25 }
  0x96   :  { %v335_v61 = vmul.f32 %v2856_v28, %v147_v21  ;;  %v2946_v0 = vperm.slane %v2869_v47, 0  ;;  %v319_v18 = vadd.f32 %v311_v63, %v304_v20  ;;  %v322_v29 = vadd.f32 %v314_v2, %v307_v35 }
  0x97   :  { %v334_v21 = vmul.f32 %v2854_v15, %v148_v27  ;;  %v379_v38 = vadd.f32 %v371_v12, %v364_v37  ;;  %v3009_v2 = vperm.slane %v2869_v47, 1 }
  0x98   :  { %v350_v10 = vadd.f32 %v342_v42, %v335_v61  ;;  %v4782_v42 = vperm.slane %v2810_v52, 2 }
  0x9a   :  { %v349_v61 = vadd.f32 %v4782_v42, %v334_v21  ;;  %v4784_v21 = vperm.slane %v2858_v31, 3 }
  0x9b   :  { %v2770_v36 = vpop.permute.xlu1 %166 }
  0x9c   :  { %v2777_v39 = vpop.permute.xlu0 %164  ;;  %v171_v32 = vsel %vm170_vm13, %v2770_v36, %v2756_v26  ;;  %v347_v26 = vadd.f32 %v339_v14, %v332_v60 }
  0x9d   :  { %v2779_v40 = vpop.permute.xlu2 %212  ;;  %v173_v25 = vsel %vm170_vm13, %v2750_v22, %v2777_v39  ;;  %v172_v63 = vsel %vm170_vm13, %v2777_v39, %v2770_v36  ;;  %v367_v20 = vmul.f32 %v2872_v49, %v171_v32  ;;  %v4781_v39 = vmov 0.0  }
  0x9e   :  { %v365_v14 = vmul.f32 %v2874_v54, %v173_v25  ;;  %v366_v12 = vmul.f32 %v2876_v55, %v172_v63  ;;  %v351_v37 = vmax.f32 %v319_v18, %v347_v26  ;;  %v2999_v25 = vperm.slane %v2869_v47, 3 }
  0x9f   :  { %v382_v63 = vadd.f32 %v4784_v21, %v367_v20 }
  0xa0   :  { %4783 = vst [vmem:[#allocation22_spill] sm:$0xff] %v2999_v25  ;;  %v380_v18 = vadd.f32 %v372_v24, %v365_v14  ;;  %v381_v31 = vadd.f32 %v373_v13, %v366_v12  ;;  %v383_v20 = vmax.f32 %v351_v37, %v379_v38  ;;  %v482_v14 = vperm.slane %v2934_v59, 1 }
  0xa3   :  { %v2797_v46 = vpop.permute.xlu1 %188 }
  0xa4   :  { %v2799_v48 = vpop.permute.xlu0 %186  ;;  %v196_v24 = vsel %vm194_vm5, %v2797_v46, %v2764_v33 }
  0xa5   :  { %v2805_v50 = vpop.permute.xlu2 %234  ;;  %v197_v32 = vsel %vm194_vm5, %v2799_v48, %v2797_v46  ;;  %v398_v46 = vmul.f32 %v2879_v56, %v196_v24 }
  0xab   :  { %v2824_v57 = vpop.permute.xlu1 %210 }
  0xac   :  { %v2832_v62 = vpop.permute.xlu0 %192  ;;  %v221_v38 = vsel %vm218_vm2, %v2824_v57, %v2779_v40 }
  0xad   :  { %v2851_v11 = vpop.permute.xlu2 %1027  ;;  %v198_v36 = vsel %vm194_vm5, %v2832_v62, %v2799_v48  ;;  %v195_v27 = vsel %vm194_vm5, %v2764_v33, %v2832_v62  ;;  %v3012_v48 = vperm.slane %v2869_v47, 2  ;;  %v483_v47 = vperm.slane %v2934_v59, 2 }
  0xae   :  { %4770 = vst [vmem:[#allocation13_spill] sm:$0xff] %v2851_v11  ;;  %v320_v11 = vadd.f32 %v312_v9, %v305_v17  ;;  %v2973_v9 = vperm.slane %v2845_v1, 3  ;;  %v403_v17 = vperm.slane %v2910_v30, 0  ;;  %v94_v1 = vsel %vm93_vm6, 1.0, %v4781_v39 }
  0xaf   :  { %v396_v42 = vmul.f32 %v2953_v8, %v198_v36  ;;  %v2400_v62 = vadd.f32 -1.0, %v94_v1  ;;  %4785 = vst [vmem:[#allocation23_spill] sm:$0xff] %v3012_v48  ;;  %v3050_v21 = vperm.slane %v94_v1, 3 }
  0xb0   :  { %4780 = vst [vmem:[#allocation21_spill] sm:$0xff] %v2973_v9  ;;  %v352_v60 = vmax.f32 %v320_v11, %v2860_v34  ;;  %v484_v11 = vperm.slane %v2934_v59, 3  ;;  %v354_v34 = vmax.f32 %v322_v29, %v350_v10  ;;  %v399_v26 = vmul.f32 %v2973_v9, %v195_v27 }
  0xb1   :  { %v353_v29 = vmax.f32 %v321_v4, %v349_v61  ;;  %v397_v10 = vmul.f32 %v2932_v58, %v197_v32  ;;  %v411_v36 = vadd.f32 %v403_v17, %v396_v42  ;;  %v3026_v27 = vmul.f32 1e+30, %v2400_v62  ;;  %4786 = vst [vmem:[#allocation24_spill] sm:$0xff] %v3050_v21 }
  0xb2   :  { %v386_v16 = vmax.f32 %v354_v34, %v382_v63  ;;  %v3031_v61 = vsel %vm95_vm14, 1.0, %v4781_v39  ;;  %v384_v33 = vmax.f32 %v352_v60, %v380_v18  ;;  %v414_v12 = vadd.f32 %v406_v43, %v399_v26 }
  0xb3   :  { %v2892_v53 = vpop.permute.xlu1 %216  ;;  %v385_v37 = vmax.f32 %v353_v29, %v381_v31  ;;  %v412_v17 = vadd.f32 %v404_v3, %v397_v10  ;;  %v3044_v34 = vperm.slane %v94_v1, 0  ;;  %v3052_v63 = vperm.slane %v94_v1, 1 }
  0xb4   :  { %v2904_v41 = vpop.permute.xlu0 %214  ;;  %v222_v32 = vsel %vm218_vm2, %v2892_v53, %v2824_v57  ;;  %v2401_v43 = vadd.f32 -1.0, %v3031_v61  ;;  %v474_v3 = vmul.f32 %v2946_v0, %v221_v38  ;;  %v415_v62 = vmax.f32 %v383_v20, %v411_v36 }
  0xb5   :  { %v220_v60 = vsel %vm218_vm2, %v2779_v40, %v2904_v41  ;;  %v513_v57 = vperm.slane %v3026_v27, 0  ;;  %v3059_v18 = vperm.slane %v94_v1, 2  ;;  %v4788_v40 = vperm.slane %v2910_v30, 2 }
  0xb6   :  { %v418_v29 = vmax.f32 %v386_v16, %v414_v12  ;;  %v477_v31 = vmul.f32 %v2999_v25, %v222_v32  ;;  %v416_v10 = vmax.f32 %v384_v33, %v412_v17  ;;  %v219_v45 = vsel %vm218_vm2, %v2904_v41, %v2892_v53 }
  0xb7   :  { %4787 = vst [vmem:[#allocation25_spill] sm:$0xff] %v3059_v18  ;;  %v413_v26 = vadd.f32 %v4788_v40, %v398_v46  ;;  %v475_v51 = vmul.f32 %v3009_v2, %v220_v60  ;;  %v516_v1 = vperm.slane %v3026_v27, 3  ;;  %v514_v30 = vperm.slane %v3026_v27, 1 }
  0xb8   :  { %v2940_v23 = vpop.permute.xlu2 %240  ;;  %v3080_v20 = vmul.f32 1e+30, %v2401_v43  ;;  %v3083_v16 = vsel %vm97_vm4, 1.0, %v4781_v39  ;;  %v4789_v36 = vperm.slane %v2934_v59, 0  ;;  %v461_v46 = vmax.f32 %v415_v62, %v2696_v6 }
  0xb9   :  { %v3090_v53 = vperm.slane %v3031_v61, 0  ;;  %v417_v38 = vmax.f32 %v385_v37, %v413_v26  ;;  %v464_v12 = vmax.f32 %v418_v29, %v2693_v5  ;;  %v492_v17 = vadd.f32 %v484_v11, %v477_v31  ;;  %v4790_v31 = vld [vmem:[#allocation6_spill] sm:$0xff] }
  0xba   :  { %v489_v33 = vadd.f32 %v4789_v36, %v474_v3  ;;  %v476_v32 = vmul.f32 %v3012_v48, %v219_v45  ;;  %v462_v60 = vmax.f32 %v416_v10, %v2698_v7  ;;  %v490_v39 = vadd.f32 %v482_v14, %v475_v51 }
  0xbb   :  { %v2961_v35 = vpop.permute.xlu1 %991  ;;  %v246_v43 = vsel %vm242_vm11, %v2940_v23, %v2805_v50  ;;  %v2402_v62 = vadd.f32 -1.0, %v3083_v16  ;;  %v515_v37 = vperm.slane %v3026_v27, 2  ;;  %v545_v11 = vperm.slane %v3080_v20, 0 }
  0xbc   :  { %v2975_v22 = vpop.permute.xlu0 %236  ;;  %v493_v29 = vmax.f32 %v461_v46, %v489_v33  ;;  %v496_v27 = vmax.f32 %v464_v12, %v492_v17  ;;  %v509_v10 = vmul.f32 %v3050_v21, %v246_v43  ;;  %v494_v45 = vmax.f32 %v462_v60, %v490_v39 }
  0xbd   :  { %v245_v24 = vsel %vm242_vm11, %v2805_v50, %v2975_v22  ;;  %v3122_v36 = vmul.f32 1e+30, %v2402_v62  ;;  %v3132_v33 = vperm.slane %v3083_v16, 0  ;;  %v3135_v46 = vperm.slane %v3031_v61, 2 }
  0xbe   :  { %v506_v41 = vmul.f32 %v3044_v34, %v245_v24  ;;  %v463_v24 = vmax.f32 %v417_v38, %v4790_v31  ;;  %v524_v12 = vadd.f32 %v516_v1, %v509_v10  ;;  %v546_v17 = vperm.slane %v3080_v20, 1 }
  0xbf   :  { %4792 = vst [vmem:[#allocation26_spill] sm:$0xff] %v3132_v33  ;;  %v548_v62 = vperm.slane %v3080_v20, 3  ;;  %vm1210_vm4 = vcmask 588800  }
  0xc0   :  { %v3002_v52 = vpop.permute.xlu2 %260  ;;  %v521_v14 = vadd.f32 %v513_v57, %v506_v41  ;;  %v3120_v57 = vperm.slane %v3031_v61, 3  ;;  %4793 = vst [vmem:[#allocation27_spill] sm:$0xff] %v3135_v46 }
  0xc2   :  { %4791 = vst [vmem:[#allocation6_spill] sm:$0xff] %v3120_v57  ;;  %v525_v41 = vmax.f32 %v493_v29, %v521_v14  ;;  %v528_v29 = vmax.f32 %v496_v27, %v524_v12 }
  0xc3   :  { %v3028_v4 = vpop.permute.xlu1 %996 }
  0xc4   :  { %v239_v13 = vpop.permute.xlu0 %238 }
  0xc5   :  { %v244_v5 = vsel %vm242_vm11, %v2975_v22, %v239_v13  ;;  %v243_v50 = vsel %vm242_vm11, %v239_v13, %v2940_v23  ;;  %v491_v22 = vadd.f32 %v483_v47, %v476_v32  ;;  %v3126_v13 = vperm.slane %v3031_v61, 1 }
  0xc6   :  { %v507_v51 = vmul.f32 %v3052_v63, %v244_v5  ;;  %v508_v23 = vmul.f32 %v3059_v18, %v243_v50  ;;  %v547_v32 = vperm.slane %v3080_v20, 2  ;;  %v577_v5 = vperm.slane %v3122_v36, 0 }
  0xc7   :  { %v495_v38 = vmax.f32 %v463_v24, %v491_v22  ;;  %v3158_v22 = vperm.slane %v3083_v16, 1 }
  0xc8   :  { %v3055_v42 = vpop.permute.xlu2 %284  ;;  %v522_v60 = vadd.f32 %v514_v30, %v507_v51 }
  0xca   :  { %v526_v10 = vmax.f32 %v494_v45, %v522_v60  ;;  %v579_v45 = vperm.slane %v3122_v36, 2 }
  0xcb   :  { %v259_v6 = vpop.permute.xlu1 %258 }
  0xcc   :  { %v269_v7 = vsel %vm266_vm3, %v259_v6, %v3002_v52 }
  0xcd   :  { %v538_v40 = vmul.f32 %v3090_v53, %v269_v7 }
  0xcf   :  { %v553_v47 = vadd.f32 %v545_v11, %v538_v40  ;;  %v523_v11 = vadd.f32 %v515_v37, %v508_v23 }
  0xd0   :  { %v3099_v3 = vpop.permute.xlu0 %1032  ;;  %v265_v26 = vpop.permute.xlu2 %264 }
  0xd1   :  { %v270_v59 = vsel %vm266_vm3, %v265_v26, %v259_v6  ;;  %v557_v40 = vmax.f32 %v525_v41, %v553_v47  ;;  %v527_v27 = vmax.f32 %v495_v38, %v523_v11 }
  0xd2   :  { %v541_v6 = vmul.f32 %v3120_v57, %v270_v59 }
  0xd3   :  { %v263_v39 = vpop.permute.xlu1 %262 }
  0xd4   :  { %v268_v61 = vsel %vm266_vm3, %v3002_v52, %v263_v39  ;;  %v267_v30 = vsel %vm266_vm3, %v263_v39, %v265_v26  ;;  %v556_v52 = vadd.f32 %v548_v62, %v541_v6  ;;  %v3161_v26 = vperm.slane %v3083_v16, 2 }
  0xd5   :  { %v539_v20 = vmul.f32 %v3126_v13, %v268_v61  ;;  %v540_v37 = vmul.f32 %v3135_v46, %v267_v30  ;;  %v3168_v39 = vperm.slane %v3083_v16, 3  ;;  %v578_v6 = vperm.slane %v3122_v36, 1 }
  0xd6   :  { %4796 = vst [vmem:[#allocation30_spill] sm:$0xff] %v3161_v26  ;;  %v560_v12 = vmax.f32 %v528_v29, %v556_v52 }
  0xd7   :  { %v554_v24 = vadd.f32 %v546_v17, %v539_v20  ;;  %v555_v59 = vadd.f32 %v547_v32, %v540_v37  ;;  %4797 = vst [vmem:[#allocation31_spill] sm:$0xff] %v3168_v39  ;;  %v580_v17 = vperm.slane %v3122_v36, 3 }
  0xd8   :  { %v283_v43 = vpop.permute.xlu0 %282 }
  0xd9   :  { %v293_v1 = vsel %vm290_vm12, %v283_v43, %v3055_v42  ;;  %v558_v60 = vmax.f32 %v526_v10, %v554_v24  ;;  %v559_v30 = vmax.f32 %v527_v27, %v555_v59 }
  0xda   :  { %v3150_v7 = vpop.f32.mrf.mxu0  ;;  %v3152_v14 = vpop.f32.mrf.mxu1  ;;  %v570_v50 = vmul.f32 %v3132_v33, %v293_v1 }
  0xdb   :  { %4794 = vst [vmem:[#allocation28_spill] sm:$0xff] %v3150_v7  ;;  %v287_v41 = vpop.permute.xlu1 %286 }
  0xdc   :  { %4795 = vst [vmem:[#allocation29_spill] sm:$0xff] %v3152_v14  ;;  %v585_v31 = vadd.f32 %v577_v5, %v570_v50  ;;  %v292_v32 = vsel %vm290_vm12, %v3055_v42, %v287_v41 }
  0xdd   :  { %v571_v61 = vmul.f32 %v3158_v22, %v292_v32 }
  0xde   :  { %v3163_v51 = vpop.f32.mrf.mxu2  ;;  %v3165_v23 = vpop.f32.mrf.mxu3  ;;  %v589_v47 = vmax.f32 %v557_v40, %v585_v31 }
  0xdf   :  { %v586_v37 = vadd.f32 %v578_v6, %v571_v61 }
  0xe0   :  { %v289_v62 = vpop.permute.xlu0 %288  ;;  %2419 = vmatpush.msk.msrb.mxu3 %vm426_vm7, %v589_v47 }
  0xe1   :  { %v291_v16 = vsel %vm290_vm12, %v287_v41, %v289_v62  ;;  %v294_v38 = vsel %vm290_vm12, %v289_v62, %v283_v43  ;;  %v590_v10 = vmax.f32 %v558_v60, %v586_v37  ;;  %v2497_v37 = vmov 512.0  }
  0xe2   :  { %v3181_v5 = vpop.f32.mrf.mxu0  ;;  %v3183_v11 = vpop.f32.mrf.mxu1  ;;  %v572_v1 = vmul.f32 %v3161_v26, %v291_v16  ;;  %v573_v36 = vmul.f32 %v3168_v39, %v294_v38  ;;  %2465 = vrcp.f32 %v2497_v37 }
  0xe3   :  { %v864_v42 = vmul.f32 %v3181_v5, %v3181_v5  ;;  %v834_v20 = vadd.f32 %v3183_v11, %v3181_v5  ;;  %v865_v43 = vmul.f32 %v3183_v11, %v3183_v11  ;;  %2421 = vmatpush.msk.msrb.mxu1 %vm426_vm7, %v590_v10 }
  0xe4   :  { %v588_v50 = vadd.f32 %v580_v17, %v573_v36  ;;  %v587_v40 = vadd.f32 %v579_v45, %v572_v1 }
  0xe5   :  { %v881_v29 = vadd.f32 %v865_v43, %v864_v42 }
  0xe6   :  { %v3194_v52 = vpop.f32.mrf.mxu2  ;;  %v3196_v31 = vpop.f32.mrf.mxu3  ;;  %v592_v24 = vmax.f32 %v560_v12, %v588_v50  ;;  %v591_v59 = vmax.f32 %v559_v30, %v587_v40 }
  0xe7   :  { %v866_v47 = vmul.f32 %v3194_v52, %v3194_v52  ;;  %v835_v27 = vadd.f32 %v834_v20, %v3194_v52  ;;  %v867_v41 = vmul.f32 %v3196_v31, %v3196_v31 }
  0xe8   :  { %2423 = vmatpush.msk.msrb.mxu2 %vm426_vm7, %v591_v59  ;;  %2425 = vmatpush.msk.msra.mxu3 %vm426_vm7, %v592_v24  ;;  %v2466_v40 = vpop.eup %2465 }
  0xe9   :  { %v836_v17 = vadd.f32 %v835_v27, %v3196_v31  ;;  %v882_v62 = vadd.f32 %v881_v29, %v866_v47  ;;  %v850_v29 = vmul.f32 512.0, %v2466_v40  ;;  %vm854_vm7 = vweird.f32 %v2466_v40 }
  0xea   :  { %v3207_v12 = vpop.f32.mrf.mxu0  ;;  %v3209_v6 = vpop.f32.mrf.mxu1 }
  0xeb   :  { %837 = vadd.xlane.f32.xlu0 %v836_v17  ;;  %v868_v45 = vmul.f32 %v3207_v12, %v3207_v12  ;;  %v839_v32 = vadd.f32 %v3209_v6, %v3207_v12  ;;  %v869_v16 = vmul.f32 %v3209_v6, %v3209_v6  ;;  %v883_v38 = vadd.f32 %v882_v62, %v867_v41 }
  0xec   :  { %v851_v24 = vsub.f32 1.0, %v850_v29 }
  0xed   :  { %884 = vadd.xlane.f32.xlu1 %v883_v38  ;;  %v886_v30 = vadd.f32 %v869_v16, %v868_v45 }
  0xee   :  { %v3217_v60 = vpop.f32.mrf.mxu2  ;;  %v3219_v61 = vpop.f32.mrf.mxu3  ;;  %v852_v10 = vmul.f32 %v2466_v40, %v851_v24 }
  0xef   :  { %v870_v1 = vmul.f32 %v3217_v60, %v3217_v60  ;;  %v840_v36 = vadd.f32 %v839_v32, %v3217_v60  ;;  %v871_v20 = vmul.f32 %v3219_v61, %v3219_v61 }
  0xf0   :  { %v853_v59 = vadd.f32 %v2466_v40, %v852_v10 }
  0xf1   :  { %v841_v42 = vadd.f32 %v840_v36, %v3219_v61  ;;  %v887_v43 = vadd.f32 %v886_v30, %v870_v1 }
  0xf2   :  { %v3227_v47 = vsel %vm854_vm7, %v2466_v40, %v853_v59 }
  0xf3   :  { %842 = vadd.xlane.f32.xlu2 %v841_v42  ;;  %v888_v50 = vadd.f32 %v887_v43, %v871_v20  ;;  %4798 = vst [vmem:[#allocation32_spill] sm:$0xff] %v3227_v47 }
  0xfb   :  { %889 = vadd.xlane.f32.xlu2 %v888_v50 }
 0x15e   :  { %v838_v27 = vpop.xlane.xlu0 %837 }
 0x15f   :  { %v857_v41 = vmul.f32 %v3227_v47, %v838_v27 }
 0x160   :  { %v885_v17 = vpop.xlane.xlu1 %884 }
 0x161   :  { %v897_v62 = vmul.f32 %v885_v17, %v3227_v47  ;;  %v901_v45 = vmul.f32 %v857_v41, %v857_v41  ;;  %v956_v43 = vsub.f32 %v3181_v5, %v857_v41  ;;  %v958_v50 = vsub.f32 %v3194_v52, %v857_v41 }
 0x162   :  { %v959_v37 = vsub.f32 %v3196_v31, %v857_v41 }
 0x163   :  { %v905_v32 = vsub.f32 %v897_v62, %v901_v45  ;;  %v4799_v62 = vld [vmem:[#allocation13_spill] sm:$0xff] }
 0x165   :  { %v909_v16 = vadd.f32 1e-05, %v905_v32 }
 0x167   :  { %2467 = vrsqrt.f32 %v909_v16  ;;  %vm928_vm0 = vweird.f32 %v909_v16 }
 0x16d   :  { %v2468_v38 = vpop.eup %2467 }
 0x16e   :  { %v923_v1 = vmul.f32 %v2468_v38, %v909_v16  ;;  %vm929_vm15 = vweird.f32 %v2468_v38 }
 0x16f   :  { %vm930_vm1 = vmor %vm928_vm0, %vm929_vm15 }
 0x170   :  { %v924_v36 = vmul.f32 %v2468_v38, %v923_v1 }
 0x172   :  { %v925_v30 = vmul.f32 0.5, %v924_v36 }
 0x174   :  { %v926_v42 = vsub.f32 1.5, %v925_v30  ;;  %v843_v30 = vpop.xlane.xlu2 %842 }
 0x176   :  { %v927_v20 = vmul.f32 %v2468_v38, %v926_v42 }
 0x178   :  { %v931_v40 = vsel %vm930_vm1, %v2468_v38, %v927_v20  ;;  %v957_v38 = vsub.f32 %v3183_v11, %v857_v41  ;;  %v3270_v11 = vmul.f32 %v3227_v47, %v843_v30 }
 0x179   :  { %v972_v29 = vmul.f32 %v956_v43, %v931_v40  ;;  %v974_v24 = vmul.f32 %v958_v50, %v931_v40  ;;  %v975_v10 = vmul.f32 %v959_v37, %v931_v40  ;;  %v725_v50 = vld [vmem:[%s4653_s4] sm:$0xff] }
 0x17a   :  { %v973_v1 = vmul.f32 %v957_v38, %v931_v40  ;;  %v902_v41 = vmul.f32 %v3270_v11, %v3270_v11  ;;  %2420 = vmatmul.msk.f32.vlgmr.msrb.gmra.mxu3 %vm603_vm8, %v725_v50  ;;  %2424 = vmatmul.msk.f32.vlgmr.msrb.gmra.mxu2 %vm603_vm8, %v725_v50  ;;  %v963_v38 = vsub.f32 %v3219_v61, %v3270_v11 }
 0x17b   :  { %v1008_v59 = vmul.f32 %v2961_v35, %v972_v29  ;;  %v1010_v27 = vmul.f32 %v2961_v35, %v974_v24  ;;  %v1011_v17 = vmul.f32 %v2961_v35, %v975_v10  ;;  %2422 = vmatmul.msk.f32.vlgmr.msrb.gmra.mxu1 %vm603_vm8, %v725_v50 }
 0x17c   :  { %v1009_v36 = vmul.f32 %v2961_v35, %v973_v1  ;;  %v890_v35 = vpop.xlane.xlu2 %889  ;;  %v960_v1 = vsub.f32 %v3207_v12, %v3270_v11 }
 0x17d   :  { %v1044_v45 = vadd.f32 %v4799_v62, %v1008_v59  ;;  %v1046_v32 = vadd.f32 %v4799_v62, %v1010_v27  ;;  %v1047_v5 = vadd.f32 %v4799_v62, %v1011_v17  ;;  %v898_v43 = vmul.f32 %v890_v35, %v3227_v47  ;;  %v4810_v47 = vld [vmem:[#allocation10_spill] sm:$0xff] }
 0x17e   :  { %v1045_v42 = vadd.f32 %v4799_v62, %v1009_v36 }
 0x17f   :  { %v3240_v52 = vmax.f32 %v1044_v45, 0.0  ;;  %v3242_v31 = vmax.f32 %v1046_v32, 0.0  ;;  %v3244_v16 = vmax.f32 %v1047_v5, 0.0  ;;  %v906_v37 = vsub.f32 %v898_v43, %v902_v41 }
 0x180   :  { %v3261_v20 = vmax.f32 %v1045_v42, 0.0  ;;  %v962_v45 = vsub.f32 %v3217_v60, %v3270_v11 }
 0x181   :  { %1164 = vrot.lane.b32.xlu0 %v3244_v16, %s2496_s21  ;;  %1162 = vrot.lane.b32.xlu1 %v3242_v31, %s2496_s21  ;;  %v910_v40 = vadd.f32 1e-05, %v906_v37  ;;  %v961_v37 = vsub.f32 %v3209_v6, %v3270_v11 }
 0x182   :  { %1158 = vrot.lane.b32.xlu2 %v3240_v52, %s2496_s21  ;;  %2426 = vmatmul.msk.f32.vlgmr.msra.gmra.mxu3 %vm603_vm8, %v725_v50 }
 0x183   :  { %2469 = vrsqrt.f32 %v910_v40  ;;  %vm938_vm8 = vweird.f32 %v910_v40 }
 0x189   :  { %1152 = vrot.lane.b32.xlu0 %v3244_v16, %s2495_s0  ;;  %1150 = vrot.lane.b32.xlu1 %v3242_v31, %s2495_s0  ;;  %v2470_v29 = vpop.eup %2469 }
 0x18a   :  { %1138 = vrot.lane.b32.xlu2 %v3242_v31, %s2494_s20  ;;  %v933_v24 = vmul.f32 %v2470_v29, %v910_v40  ;;  %vm939_vm6 = vweird.f32 %v2470_v29 }
 0x18b   :  { %vm940_vm14 = vmor %vm938_vm8, %vm939_vm6 }
 0x18c   :  { %v934_v10 = vmul.f32 %v2470_v29, %v933_v24 }
 0x18e   :  { %v935_v59 = vmul.f32 0.5, %v934_v10 }
 0x190   :  { %v936_v27 = vsub.f32 1.5, %v935_v59 }
 0x191   :  { %1146 = vrot.lane.b32.xlu0 %v3240_v52, %s2495_s0  ;;  %1140 = vrot.lane.b32.xlu1 %v3244_v16, %s2494_s20 }
 0x192   :  { %1160 = vrot.lane.b32.xlu2 %v3261_v20, %s2496_s21  ;;  %v937_v17 = vmul.f32 %v2470_v29, %v936_v27 }
 0x194   :  { %v941_v62 = vsel %vm940_vm14, %v2470_v29, %v937_v17 }
 0x195   :  { %v978_v32 = vmul.f32 %v962_v45, %v941_v62  ;;  %v979_v60 = vmul.f32 %v963_v38, %v941_v62  ;;  %v976_v36 = vmul.f32 %v960_v1, %v941_v62  ;;  %v977_v40 = vmul.f32 %v961_v37, %v941_v62 }
 0x197   :  { %v1014_v5 = vmul.f32 %v3028_v4, %v978_v32  ;;  %v1015_v42 = vmul.f32 %v3028_v4, %v979_v60  ;;  %v1012_v61 = vmul.f32 %v3028_v4, %v976_v36  ;;  %v1013_v24 = vmul.f32 %v3028_v4, %v977_v40 }
 0x199   :  { %1128 = vrot.lane.b32.xlu0 %v3244_v16, %s2493_s17  ;;  %1126 = vrot.lane.b32.xlu1 %v3242_v31, %s2493_s17  ;;  %v1050_v30 = vadd.f32 %v3099_v3, %v1014_v5  ;;  %v1051_v12 = vadd.f32 %v3099_v3, %v1015_v42  ;;  %v1048_v41 = vadd.f32 %v3099_v3, %v1012_v61 }
 0x19a   :  { %1134 = vrot.lane.b32.xlu2 %v3240_v52, %s2494_s20  ;;  %v1049_v6 = vadd.f32 %v3099_v3, %v1013_v24 }
 0x19b   :  { %v3334_v35 = vmax.f32 %v1050_v30, 0.0  ;;  %v3344_v43 = vmax.f32 %v1051_v12, 0.0  ;;  %v3346_v50 = vmax.f32 %v1048_v41, 0.0 }
 0x19c   :  { %v3366_v10 = vmax.f32 %v1049_v6, 0.0 }
 0x1a1   :  { %1122 = vrot.lane.b32.xlu0 %v3240_v52, %s2493_s17  ;;  %1148 = vrot.lane.b32.xlu1 %v3261_v20, %s2495_s0 }
 0x1a2   :  { %1136 = vrot.lane.b32.xlu2 %v3261_v20, %s2494_s20 }
 0x1a9   :  { %1114 = vrot.lane.b32.xlu0 %v3242_v31, %s2492_s2  ;;  %1112 = vrot.lane.b32.xlu1 %v3261_v20, %s2492_s2 }
 0x1aa   :  { %1124 = vrot.lane.b32.xlu2 %v3261_v20, %s2493_s17 }
 0x1b1   :  { %1102 = vrot.lane.b32.xlu0 %v3242_v31, %s2489_s1  ;;  %1100 = vrot.lane.b32.xlu1 %v3261_v20, %s2489_s1 }
 0x1b2   :  { %1116 = vrot.lane.b32.xlu2 %v3244_v16, %s2492_s2 }
 0x1b9   :  { %1090 = vrot.lane.b32.xlu0 %v3242_v31, %s2488_s27  ;;  %1088 = vrot.lane.b32.xlu1 %v3261_v20, %s2488_s27 }
 0x1ba   :  { %1104 = vrot.lane.b32.xlu2 %v3244_v16, %s2489_s1 }
 0x1c1   :  { %1076 = vrot.lane.b32.xlu0 %v3261_v20, %s2487_s26  ;;  %1110 = vrot.lane.b32.xlu1 %v3240_v52, %s2492_s2 }
 0x1c2   :  { %1078 = vrot.lane.b32.xlu2 %v3242_v31, %s2487_s26 }
 0x1c9   :  { %1098 = vrot.lane.b32.xlu0 %v3240_v52, %s2489_s1  ;;  %1092 = vrot.lane.b32.xlu1 %v3244_v16, %s2488_s27 }
 0x1ca   :  { %1086 = vrot.lane.b32.xlu2 %v3240_v52, %s2488_s27 }
 0x1d1   :  { %1080 = vrot.lane.b32.xlu0 %v3244_v16, %s2487_s26  ;;  %1074 = vrot.lane.b32.xlu1 %v3240_v52, %s2487_s26 }
 0x1d2   :  { %1521 = vrot.lane.b32.xlu2 %v3334_v35, %s2496_s21 }
 0x1d9   :  { %1511 = vrot.lane.b32.xlu0 %v3344_v43, %s2495_s0  ;;  %1523 = vrot.lane.b32.xlu1 %v3344_v43, %s2496_s21 }
 0x1da   :  { %1517 = vrot.lane.b32.xlu2 %v3346_v50, %s2496_s21 }
 0x1dc   :  { %v1159_v29 = vpop.permute.xlu2 %1158 }
 0x1e1   :  { %1497 = vrot.lane.b32.xlu0 %v3334_v35, %s2494_s20  ;;  %1509 = vrot.lane.b32.xlu1 %v3334_v35, %s2495_s0 }
 0x1e2   :  { %1499 = vrot.lane.b32.xlu2 %v3344_v43, %s2494_s20 }
 0x1e4   :  { %v3364_v11 = vpop.permute.xlu2 %1138 }
 0x1e9   :  { %1519 = vrot.lane.b32.xlu0 %v3366_v10, %s2496_s21  ;;  %1505 = vrot.lane.b32.xlu1 %v3346_v50, %s2495_s0 }
 0x1ea   :  { %1485 = vrot.lane.b32.xlu2 %v3334_v35, %s2493_s17 }
 0x1ec   :  { %v1161_v4 = vpop.permute.xlu2 %1160 }
 0x1ed   :  { %v1168_v59 = vsel %vm290_vm12, %v1159_v29, %v1161_v4 }
 0x1ee   :  { %v1206_v27 = vmul.f32 %v1168_v59, %v3132_v33 }
 0x1f0   :  { %1224 = vmatpush.msrb.mxu0 %v1206_v27 }
 0x1f1   :  { %1493 = vrot.lane.b32.xlu0 %v3346_v50, %s2494_s20  ;;  %1487 = vrot.lane.b32.xlu1 %v3344_v43, %s2493_s17 }
 0x1f2   :  { %1507 = vrot.lane.b32.xlu2 %v3366_v10, %s2495_s0 }
 0x1f3   :  { %v1165_v3 = vpop.permute.xlu0 %1164  ;;  %v1163_v17 = vpop.permute.xlu1 %1162 }
 0x1f4   :  { %v1169_v62 = vsel %vm290_vm12, %v1165_v3, %v1159_v29  ;;  %v1166_v45 = vsel %vm290_vm12, %v1163_v17, %v1165_v3  ;;  %v1167_v32 = vsel %vm290_vm12, %v1161_v4, %v1163_v17  ;;  %v1135_v5 = vpop.permute.xlu2 %1134 }
 0x1f5   :  { %v1209_v38 = vmul.f32 %v1169_v62, %v3168_v39  ;;  %v1207_v1 = vmul.f32 %v1167_v32, %v3158_v22  ;;  %v1208_v60 = vmul.f32 %v1166_v45, %v3161_v26 }
 0x1f7   :  { %1247 = vmatpush.msra.mxu1 %v1207_v1  ;;  %1270 = vmatpush.msra.mxu2 %v1208_v60 }
 0x1f8   :  { %1293 = vmatpush.msrb.mxu3 %v1209_v38  ;;  %v4800_v38 = vld [vmem:[#allocation4_spill] sm:$0xff] }
 0x1f9   :  { %1495 = vrot.lane.b32.xlu0 %v3366_v10, %s2494_s20  ;;  %1481 = vrot.lane.b32.xlu1 %v3346_v50, %s2493_s17  ;;  %v1192_v1 = vmul.f32 %v3242_v31, %v4800_v38 }
 0x1fa   :  { %1471 = vrot.lane.b32.xlu2 %v3366_v10, %s2492_s2 }
 0x1fb   :  { %v1153_v36 = vpop.permute.xlu0 %1152  ;;  %v1151_v30 = vpop.permute.xlu1 %1150 }
 0x1fc   :  { %v1137_v42 = vpop.permute.xlu2 %1136  ;;  %v1154_v61 = vsel %vm266_vm3, %v1151_v30, %v1153_v36 }
 0x1fd   :  { %v1204_v12 = vmul.f32 %v1154_v61, %v3135_v46 }
 0x1ff   :  { %1271 = vmatpush.msra.mxu2 %v1204_v12 }
 0x201   :  { %1483 = vrot.lane.b32.xlu0 %v3366_v10, %s2493_s17  ;;  %1473 = vrot.lane.b32.xlu1 %v3334_v35, %s2492_s2 }
 0x202   :  { %1459 = vrot.lane.b32.xlu2 %v3366_v10, %s2489_s1 }
 0x203   :  { %v1147_v41 = vpop.permute.xlu0 %1146  ;;  %v1141_v37 = vpop.permute.xlu1 %1140 }
 0x204   :  { %v1157_v40 = vsel %vm266_vm3, %v1153_v36, %v1147_v41  ;;  %v1125_v29 = vpop.permute.xlu2 %1124  ;;  %v1142_v24 = vsel %vm242_vm11, %v3364_v11, %v1141_v37  ;;  %v1145_v6 = vsel %vm242_vm11, %v1141_v37, %v1135_v5 }
 0x205   :  { %v1205_v4 = vmul.f32 %v1157_v40, %v3120_v57  ;;  %v1200_v59 = vmul.f32 %v1142_v24, %v3059_v18  ;;  %v1201_v27 = vmul.f32 %v1145_v6, %v3050_v21  ;;  %v1143_v24 = vsel %vm242_vm11, %v1137_v42, %v3364_v11 }
 0x207   :  { %1294 = vmatpush.msrb.mxu3 %v1205_v4  ;;  %1272 = vmatpush.msra.mxu2 %v1200_v59  ;;  %v1144_v59 = vsel %vm242_vm11, %v1135_v5, %v1137_v42 }
 0x208   :  { %v1198_v11 = vmul.f32 %v1144_v59, %v3044_v34 }
 0x209   :  { %1475 = vrot.lane.b32.xlu0 %v3344_v43, %s2492_s2  ;;  %1295 = vmatpush.msrb.mxu3 %v1201_v27  ;;  %v4801_v27 = vld [vmem:[#allocation2_spill] sm:$0xff] }
 0x20a   :  { %1461 = vrot.lane.b32.xlu1 %v3334_v35, %s2489_s1  ;;  %1447 = vrot.lane.b32.xlu2 %v3366_v10, %s2488_s27 }
 0x20b   :  { %v1129_v3 = vpop.permute.xlu0 %1128  ;;  %v1127_v17 = vpop.permute.xlu1 %1126 }
 0x20c   :  { %v3423_v62 = vpop.permute.xlu2 %1116  ;;  %v1130_v45 = vsel %vm218_vm2, %v1127_v17, %v1129_v3 }
 0x20d   :  { %v1196_v32 = vmul.f32 %v1130_v45, %v3012_v48  ;;  %v1199_v45 = vmul.f32 %v1143_v24, %v3052_v63 }
 0x20f   :  { %1273 = vmatpush.msra.mxu2 %v1196_v32 }
 0x211   :  { %1463 = vrot.lane.b32.xlu0 %v3344_v43, %s2489_s1  ;;  %1274 = vmatpush.msra.mxu2 %v1192_v1  ;;  %v4802_v1 = vld [vmem:[#allocation5_spill] sm:$0xff] }
 0x212   :  { %1449 = vrot.lane.b32.xlu1 %v3334_v35, %s2488_s27  ;;  %1469 = vrot.lane.b32.xlu2 %v3346_v50, %s2492_s2 }
 0x213   :  { %v1123_v60 = vpop.permute.xlu0 %1122  ;;  %v1149_v36 = vpop.permute.xlu1 %1148 }
 0x214   :  { %v1133_v61 = vsel %vm218_vm2, %v1129_v3, %v1123_v60  ;;  %v3438_v12 = vpop.permute.xlu2 %1104  ;;  %v1155_v37 = vsel %vm266_vm3, %v1149_v36, %v1151_v30  ;;  %v1156_v31 = vsel %vm266_vm3, %v1147_v41, %v1149_v36  ;;  %v1193_v30 = vmul.f32 %v3244_v16, %v4801_v27 }
 0x215   :  { %v1197_v40 = vmul.f32 %v1133_v61, %v2999_v25  ;;  %v1203_v6 = vmul.f32 %v1155_v37, %v3126_v13  ;;  %v1202_v4 = vmul.f32 %v1156_v31, %v3090_v53  ;;  %v1131_v41 = vsel %vm218_vm2, %v1125_v29, %v1127_v17  ;;  %v4803_v61 = vld [vmem:[#allocation3_spill] sm:$0xff] }
 0x216   :  { %v1132_v3 = vsel %vm218_vm2, %v1123_v60, %v1125_v29  ;;  %v1195_v16 = vmul.f32 %v1131_v41, %v3009_v2  ;;  %v1190_v60 = vmul.f32 %v3240_v52, %v4802_v1  ;;  %v1191_v37 = vmul.f32 %v3261_v20, %v4803_v61 }
 0x217   :  { %1296 = vmatpush.msrb.mxu3 %v1197_v40  ;;  %1225 = vmatpush.msrb.mxu0 %v1202_v4  ;;  %v1194_v42 = vmul.f32 %v1132_v3, %v2946_v0 }
 0x218   :  { %1248 = vmatpush.msra.mxu1 %v1203_v6 }
 0x219   :  { %1437 = vrot.lane.b32.xlu0 %v3334_v35, %s2487_s26  ;;  %1297 = vmatpush.msrb.mxu3 %v1193_v30 }
 0x21a   :  { %1435 = vrot.lane.b32.xlu1 %v3366_v10, %s2487_s26  ;;  %1451 = vrot.lane.b32.xlu2 %v3344_v43, %s2488_s27 }
 0x21b   :  { %1226 = vmatpush.msrb.mxu0 %v1198_v11  ;;  %1249 = vmatpush.msra.mxu1 %v1199_v45  ;;  %v1115_v5 = vpop.permute.xlu0 %1114  ;;  %v1113_v29 = vpop.permute.xlu1 %1112 }
 0x21c   :  { %v1118_v17 = vsel %vm194_vm5, %v1115_v5, %v3423_v62  ;;  %v3471_v32 = vpop.permute.xlu2 %1078  ;;  %v1119_v36 = vsel %vm194_vm5, %v1113_v29, %v1115_v5  ;;  %v821_v5 = vld [vmem:[%s4650_s5] sm:$0xff] }
 0x21d   :  { %1227 = vmatpush.msrb.mxu0 %v1194_v42  ;;  %1250 = vmatpush.msra.mxu1 %v1195_v16  ;;  %v1185_v31 = vmul.f32 %v1118_v17, %v2973_v9  ;;  %v1184_v40 = vmul.f32 %v1119_v36, %v2879_v56 }
 0x21f   :  { %1228 = vmatpush.msrb.mxu0 %v1190_v60  ;;  %1251 = vmatpush.msra.mxu1 %v1191_v37 }
 0x220   :  { %1275 = vmatpush.msra.mxu2 %v1184_v40  ;;  %1298 = vmatpush.msrb.mxu3 %v1185_v31  ;;  %v4804_v40 = vld [vmem:[#allocation11_spill] sm:$0xff] }
 0x221   :  { %1439 = vrot.lane.b32.xlu0 %v3344_v43, %s2487_s26 }
 0x222   :  { %1457 = vrot.lane.b32.xlu1 %v3346_v50, %s2489_s1  ;;  %1445 = vrot.lane.b32.xlu2 %v3346_v50, %s2488_s27 }
 0x223   :  { %v1103_v52 = vpop.permute.xlu0 %1102  ;;  %v1101_v24 = vpop.permute.xlu1 %1100 }
 0x224   :  { %v1106_v20 = vsel %vm170_vm13, %v1103_v52, %v3438_v12  ;;  %v1087_v6 = vpop.permute.xlu2 %1086  ;;  %v1107_v4 = vsel %vm170_vm13, %v1101_v24, %v1103_v52 }
 0x225   :  { %v1181_v59 = vmul.f32 %v1106_v20, %v2872_v49  ;;  %v1180_v30 = vmul.f32 %v1107_v4, %v2876_v55 }
 0x227   :  { %1299 = vmatpush.msrb.mxu3 %v1181_v59  ;;  %1276 = vmatpush.msra.mxu2 %v1180_v30  ;;  %v1665_v59 = vld [vmem:[%s4654_s12] sm:$0xff]  ;;  %v3520_v30 = vpop.f32.mrf.mxu3 }
 0x228   :  { %4805 = vst [vmem:[#allocation13_spill] sm:$0xff] %v3520_v30 }
 0x22a   :  { %1433 = vrot.lane.b32.xlu1 %v3346_v50, %s2487_s26 }
 0x22b   :  { %v1091_v41 = vpop.permute.xlu0 %1090  ;;  %v1089_v3 = vpop.permute.xlu1 %1088 }
 0x22c   :  { %v3496_v11 = vpop.permute.xlu2 %1521  ;;  %v1095_v45 = vsel %vm146_vm9, %v1089_v3, %v1091_v41 }
 0x22d   :  { %v1176_v16 = vmul.f32 %v1095_v45, %v2854_v15  ;;  %v3522_v45 = vpop.f32.mrf.mxu1 }
 0x22e   :  { %4806 = vst [vmem:[#allocation5_spill] sm:$0xff] %v3522_v45 }
 0x22f   :  { %1277 = vmatpush.msra.mxu2 %v1176_v16 }
 0x232   :  { %986 = vperm.xlu1 %2462, %v821_v5  }
 0x233   :  { %v1077_v42 = vpop.permute.xlu0 %1076  ;;  %v1111_v17 = vpop.permute.xlu1 %1110 }
 0x234   :  { %v1083_v60 = vsel %vm122_vm10, %v1077_v42, %v3471_v32  ;;  %v3507_v36 = vpop.permute.xlu2 %1517  ;;  %v1120_v37 = vsel %vm194_vm5, %v1111_v17, %v1113_v29  ;;  %v1121_v31 = vsel %vm194_vm5, %v3423_v62, %v1111_v17  ;;  %v1096_v62 = vsel %vm146_vm9, %v1087_v6, %v1089_v3 }
 0x235   :  { %v1172_v52 = vmul.f32 %v1083_v60, %v4804_v40  ;;  %v1183_v20 = vmul.f32 %v1120_v37, %v2932_v58  ;;  %v1182_v4 = vmul.f32 %v1121_v31, %v2953_v8 }
 0x237   :  { %1278 = vmatpush.msra.mxu2 %v1172_v52  ;;  %1229 = vmatpush.msrb.mxu0 %v1182_v4  ;;  %v4807_v4 = vld [vmem:[#allocation7_spill] sm:$0xff] }
 0x238   :  { %1252 = vmatpush.msra.mxu1 %v1183_v20 }
 0x23a   :  { %1761 = vperm.xlu1 %2462, %v1665_v59   ;;  %v4808_v59 = vld [vmem:[#allocation12_spill] sm:$0xff] }
 0x23b   :  { %v1099_v29 = vpop.permute.xlu0 %1098  ;;  %v1093_v16 = vpop.permute.xlu1 %1092 }
 0x23c   :  { %v1108_v5 = vsel %vm170_vm13, %v1099_v29, %v1101_v24  ;;  %v1109_v17 = vsel %vm170_vm13, %v3438_v12, %v1099_v29  ;;  %v3531_v60 = vpop.permute.xlu2 %1499  ;;  %v1094_v37 = vsel %vm146_vm9, %v1091_v41, %v1093_v16  ;;  %v1097_v31 = vsel %vm146_vm9, %v1093_v16, %v1087_v6  ;;  %v3544_v41 = vpop.f32.mrf.mxu2 }
 0x23d   :  { %v1179_v52 = vmul.f32 %v1108_v5, %v2874_v54  ;;  %v1178_v3 = vmul.f32 %v1109_v17, %v2865_v19  ;;  %v1177_v20 = vmul.f32 %v1094_v37, %v2856_v28  ;;  %v1175_v24 = vmul.f32 %v1096_v62, %v4807_v4  ;;  %v3552_v17 = vpop.f32.mrf.mxu3 }
 0x23e   :  { %v1174_v12 = vmul.f32 %v1097_v31, %v4808_v59  ;;  %v844_v29 = vadd.f32 %v3522_v45, %v3520_v30  ;;  %v829_v6 = vadd.f32 %v3152_v14, %v3150_v7  ;;  %v872_v16 = vmul.f32 %v3520_v30, %v3520_v30 }
 0x23f   :  { %1230 = vmatpush.msrb.mxu0 %v1178_v3  ;;  %1253 = vmatpush.msra.mxu1 %v1179_v52  ;;  %v873_v62 = vmul.f32 %v3522_v45, %v3522_v45  ;;  %v860_v31 = vmul.f32 %v3150_v7, %v3150_v7  ;;  %v861_v52 = vmul.f32 %v3152_v14, %v3152_v14  ;;  %v4811_v14 = vld [vmem:[#allocation8_spill] sm:$0xff] }
 0x240   :  { %1300 = vmatpush.msrb.mxu3 %v1177_v20  ;;  %v845_v37 = vadd.f32 %v844_v29, %v3544_v41  ;;  %v4809_v29 = vld [vmem:[#allocation9_spill] sm:$0xff]  ;;  %v830_v7 = vadd.f32 %v829_v6, %v3163_v51  ;;  %v874_v54 = vmul.f32 %v3544_v41, %v3544_v41 }
 0x241   :  { %1231 = vmatpush.msrb.mxu0 %v1174_v12  ;;  %1254 = vmatpush.msra.mxu1 %v1175_v24  ;;  %v891_v19 = vadd.f32 %v873_v62, %v872_v16 }
 0x243   :  { %v1081_v5 = vpop.permute.xlu0 %1080  ;;  %v1075_v3 = vpop.permute.xlu1 %1074 }
 0x244   :  { %v1082_v20 = vsel %vm122_vm10, %v3471_v32, %v1081_v5  ;;  %v3562_v24 = vpop.permute.xlu2 %1485  ;;  %v1084_v12 = vsel %vm122_vm10, %v1075_v3, %v1077_v42  ;;  %v1085_v45 = vsel %vm122_vm10, %v1081_v5, %v1075_v3  ;;  %v846_v32 = vadd.f32 %v845_v37, %v3552_v17 }
 0x245   :  { %v1173_v30 = vmul.f32 %v1082_v20, %v4809_v29  ;;  %v1171_v4 = vmul.f32 %v1084_v12, %v4810_v47  ;;  %v1170_v59 = vmul.f32 %v1085_v45, %v4811_v14  ;;  %v862_v42 = vmul.f32 %v3163_v51, %v3163_v51 }
 0x246   :  { %v831_v5 = vadd.f32 %v830_v7, %v3165_v23  ;;  %v876_v3 = vadd.f32 %v861_v52, %v860_v31  ;;  %v875_v45 = vmul.f32 %v3552_v17, %v3552_v17  ;;  %v892_v20 = vadd.f32 %v891_v19, %v874_v54 }
 0x247   :  { %1301 = vmatpush.msrb.mxu3 %v1173_v30  ;;  %1232 = vmatpush.msrb.mxu0 %v1170_v59  ;;  %v863_v7 = vmul.f32 %v3165_v23, %v3165_v23 }
 0x248   :  { %1255 = vmatpush.msra.mxu1 %v1171_v4  ;;  %v877_v16 = vadd.f32 %v876_v3, %v862_v42  ;;  %v893_v31 = vadd.f32 %v892_v20, %v875_v45 }
 0x24a   :  { %v878_v19 = vadd.f32 %v877_v16, %v863_v7 }
 0x24b   :  { %847 = vadd.xlane.f32.xlu2 %v846_v32  ;;  %v1512_v6 = vpop.permute.xlu0 %1511  ;;  %832 = vadd.xlane.f32.xlu0 %v831_v5  ;;  %v1524_v12 = vpop.permute.xlu1 %1523 }
 0x24c   :  { %v1508_v30 = vpop.permute.xlu2 %1507  ;;  %v1525_v59 = vsel %vm290_vm12, %v3496_v11, %v1524_v12  ;;  %v1528_v4 = vsel %vm290_vm12, %v1524_v12, %v3507_v36 }
 0x24d   :  { %v1563_v62 = vmul.f32 %v1525_v59, %v3161_v26  ;;  %v1564_v37 = vmul.f32 %v1528_v4, %v3168_v39 }
 0x24f   :  { %1624 = vmatpush.msrb.mxu2 %v1563_v62  ;;  %1647 = vmatpush.msra.mxu3 %v1564_v37 }
 0x253   :  { %894 = vadd.xlane.f32.xlu2 %v893_v31  ;;  %v1498_v54 = vpop.permute.xlu0 %1497  ;;  %879 = vadd.xlane.f32.xlu0 %v878_v19  ;;  %v1510_v52 = vpop.permute.xlu1 %1509 }
 0x254   :  { %v1501_v32 = vsel %vm242_vm11, %v1498_v54, %v3531_v60  ;;  %v1513_v5 = vsel %vm266_vm3, %v1510_v52, %v1512_v6  ;;  %v3596_v3 = vpop.permute.xlu2 %1471  ;;  %v1514_v12 = vsel %vm266_vm3, %v1508_v30, %v1510_v52 }
 0x255   :  { %v1559_v42 = vmul.f32 %v1513_v5, %v3135_v46  ;;  %v1555_v45 = vmul.f32 %v1501_v32, %v3059_v18  ;;  %v1558_v52 = vmul.f32 %v1514_v12, %v3126_v13  ;;  %v1547_v12 = vmul.f32 %v3334_v35, %v4800_v38  ;;  %v1666_v35 = vld [vmem:[%s4654_s12 + $0x8] sm:$0xff] }
 0x257   :  { %1625 = vmatpush.msrb.mxu2 %v1559_v42 }
 0x259   :  { %1626 = vmatpush.msrb.mxu2 %v1555_v45 }
 0x25b   :  { %v1520_v20 = vpop.permute.xlu0 %1519  ;;  %v1506_v7 = vpop.permute.xlu1 %1505 }
 0x25c   :  { %v1526_v59 = vsel %vm290_vm12, %v1520_v20, %v3496_v11  ;;  %v1527_v4 = vsel %vm290_vm12, %v3507_v36, %v1520_v20  ;;  %v1515_v37 = vsel %vm266_vm3, %v1506_v7, %v1508_v30  ;;  %v1516_v31 = vsel %vm266_vm3, %v1512_v6, %v1506_v7  ;;  %v3616_v36 = vpop.permute.xlu2 %1459  ;;  %v1664_v6 = vld [vmem:[%s4655_s11 + $0x8] sm:$0xff] }
 0x25d   :  { %v1561_v16 = vmul.f32 %v1527_v4, %v3132_v33  ;;  %v1562_v62 = vmul.f32 %v1526_v59, %v3158_v22  ;;  %v1560_v19 = vmul.f32 %v1516_v31, %v3120_v57  ;;  %v1557_v11 = vmul.f32 %v1515_v37, %v3090_v53 }
 0x25f   :  { %1578 = vmatpush.msra.mxu0 %v1561_v16  ;;  %1601 = vmatpush.msrb.mxu1 %v1562_v62 }
 0x260   :  { %1648 = vmatpush.msra.mxu3 %v1560_v19 }
 0x261   :  { %1579 = vmatpush.msra.mxu0 %v1557_v11  ;;  %1602 = vmatpush.msrb.mxu1 %v1558_v52  ;;  %v1548_v11 = vmul.f32 %v3344_v43, %v4801_v27  ;;  %v825_v43 = vld [vmem:[%s4651_s6] sm:$0xff] }
 0x263   :  { %v1494_v32 = vpop.permute.xlu0 %1493  ;;  %v1488_v5 = vpop.permute.xlu1 %1487 }
 0x264   :  { %v1504_v30 = vsel %vm242_vm11, %v3531_v60, %v1494_v32  ;;  %v1489_v45 = vsel %vm218_vm2, %v3562_v24, %v1488_v5  ;;  %v1663_v60 = vld [vmem:[%s4655_s11] sm:$0xff]  ;;  %v3634_v59 = vpop.permute.xlu2 %1447 }
 0x265   :  { %v1556_v42 = vmul.f32 %v1504_v30, %v3050_v21  ;;  %v1551_v20 = vmul.f32 %v1489_v45, %v3012_v48 }
 0x267   :  { %1748 = vperm.xlu0 %2464, %v1664_v6   ;;  %1649 = vmatpush.msra.mxu3 %v1556_v42 }
 0x268   :  { %1627 = vmatpush.msrb.mxu2 %v1551_v20 }
 0x26a   :  { %1628 = vmatpush.msrb.mxu2 %v1547_v12 }
 0x26b   :  { %1743 = vperm.xlu2 %2463, %v1663_v60   ;;  %v1496_v4 = vpop.permute.xlu0 %1495  ;;  %v1482_v62 = vpop.permute.xlu1 %1481 }
 0x26c   :  { %v1502_v7 = vsel %vm242_vm11, %v1496_v4, %v1498_v54  ;;  %v1503_v16 = vsel %vm242_vm11, %v1494_v32, %v1496_v4  ;;  %v1492_v19 = vsel %vm218_vm2, %v1488_v5, %v1482_v62  ;;  %v1072_v54 = vld [vmem:[%s4656_s7] sm:$0xff]  ;;  %v1470_v30 = vpop.permute.xlu2 %1469 }
 0x26d   :  { %v1553_v37 = vmul.f32 %v1503_v16, %v3044_v34  ;;  %v1554_v31 = vmul.f32 %v1502_v7, %v3052_v63  ;;  %v1552_v52 = vmul.f32 %v1492_v19, %v2999_v25  ;;  %2431 = vmatmul.msk.f32.vlgmr.msra.gmra.mxu2 %vm1210_vm4, %v1072_v54  ;;  %2433 = vmatmul.msk.f32.vlgmr.msrb.gmra.mxu3 %vm1210_vm4, %v1072_v54 }
 0x26e   :  { %2427 = vmatmul.msk.f32.vlgmr.msrb.gmra.mxu0 %vm1210_vm4, %v1072_v54  ;;  %2429 = vmatmul.msk.f32.vlgmr.msra.gmra.mxu1 %vm1210_vm4, %v1072_v54  ;;  %v1479_v4 = vsel %vm194_vm5, %v1470_v30, %v3596_v3  ;;  %v1545_v7 = vmul.f32 %v3346_v50, %v4802_v1  ;;  %v1546_v16 = vmul.f32 %v3366_v10, %v4803_v61 }
 0x26f   :  { %1766 = vperm.xlu0 %2464, %v1666_v35   ;;  %1580 = vmatpush.msra.mxu0 %v1553_v37 }
 0x270   :  { %1603 = vmatpush.msrb.mxu1 %v1554_v31  ;;  %1650 = vmatpush.msra.mxu3 %v1552_v52 }
 0x272   :  { %1651 = vmatpush.msra.mxu3 %v1548_v11 }
 0x273   :  { %v1484_v32 = vpop.permute.xlu0 %1483  ;;  %v1474_v42 = vpop.permute.xlu1 %1473 }
 0x274   :  { %v1490_v5 = vsel %vm218_vm2, %v1484_v32, %v3562_v24  ;;  %v1491_v6 = vsel %vm218_vm2, %v1482_v62, %v1484_v32  ;;  %v1478_v12 = vsel %vm194_vm5, %v3596_v3, %v1474_v42  ;;  %v1073_v24 = vld [vmem:[%s4656_s7 + $0x8] sm:$0xff]  ;;  %v1542_v62 = vmul.f32 %v1479_v4, %v2932_v58  ;;  %v1452_v11 = vpop.permute.xlu2 %1451  ;;  %v1431_v4 = vld [vmem:[%s4657_s10] sm:$0xff] }
 0x275   :  { %v1549_v45 = vmul.f32 %v1491_v6, %v2946_v0  ;;  %v1550_v20 = vmul.f32 %v1490_v5, %v3009_v2  ;;  %v1543_v60 = vmul.f32 %v1478_v12, %v2879_v56  ;;  %2432 = vmatmul.msk.f32.gmra.mxu2 %vm1210_vm4, %v1073_v24  ;;  %2434 = vmatmul.msk.f32.gmra.mxu3 %vm1210_vm4, %v1073_v24 }
 0x276   :  { %2428 = vmatmul.msk.f32.gmra.mxu0 %vm1210_vm4, %v1073_v24  ;;  %2430 = vmatmul.msk.f32.gmra.mxu1 %vm1210_vm4, %v1073_v24 }
 0x277   :  { %1022 = vperm.xlu0 %2464, %v825_v43   ;;  %1581 = vmatpush.msra.mxu0 %v1549_v45 }
 0x278   :  { %1604 = vmatpush.msrb.mxu1 %v1550_v20  ;;  %1629 = vmatpush.msrb.mxu2 %v1543_v60 }
 0x279   :  { %1582 = vmatpush.msra.mxu0 %v1545_v7 }
 0x27a   :  { %1605 = vmatpush.msrb.mxu1 %v1546_v16 }
 0x27b   :  { %v1476_v35 = vpop.permute.xlu0 %1475 }
 0x27c   :  { %v1477_v50 = vsel %vm194_vm5, %v1474_v42, %v1476_v35  ;;  %v1480_v3 = vsel %vm194_vm5, %v1476_v35, %v1470_v30  ;;  %v1462_v10 = vpop.permute.xlu1 %1461  ;;  %1606 = vmatpush.msrb.mxu1 %v1542_v62  ;;  %v1446_v7 = vpop.permute.xlu2 %1445 }
 0x27d   :  { %v1541_v37 = vmul.f32 %v1480_v3, %v2953_v8  ;;  %v1544_v31 = vmul.f32 %v1477_v50, %v2973_v9  ;;  %v1466_v19 = vsel %vm170_vm13, %v3616_v36, %v1462_v10  ;;  %v1455_v62 = vsel %vm146_vm9, %v1446_v7, %v3634_v59 }
 0x27e   :  { %v1539_v52 = vmul.f32 %v1466_v19, %v2876_v55  ;;  %v1456_v3 = vsel %vm146_vm9, %v1452_v11, %v1446_v7  ;;  %v4812_v19 = vld [vmem:[#allocation16_spill] sm:$0xff] }
 0x27f   :  { %1583 = vmatpush.msra.mxu0 %v1541_v37  ;;  %1652 = vmatpush.msra.mxu3 %v1544_v31 }
 0x280   :  { %1630 = vmatpush.msrb.mxu2 %v1539_v52 }
 0x283   :  { %v1464_v54 = vpop.permute.xlu0 %1463 }
 0x284   :  { %v1465_v32 = vsel %vm170_vm13, %v1462_v10, %v1464_v54  ;;  %v1450_v30 = vpop.permute.xlu1 %1449 }
 0x285   :  { %v1540_v5 = vmul.f32 %v1465_v32, %v2872_v49  ;;  %v1453_v6 = vsel %vm146_vm9, %v1450_v30, %v1452_v11  ;;  %v1454_v42 = vsel %vm146_vm9, %v3634_v59, %v1450_v30  ;;  %v4813_v32 = vld [vmem:[#allocation18_spill] sm:$0xff] }
 0x286   :  { %v1535_v43 = vmul.f32 %v1454_v42, %v2854_v15  ;;  %v1536_v45 = vmul.f32 %v1453_v6, %v2856_v28  ;;  %v1432_v30 = vld [vmem:[%s4657_s10 + $0x8] sm:$0xff]  ;;  %v4815_v6 = vld [vmem:[#allocation7_spill] sm:$0xff] }
 0x287   :  { %1653 = vmatpush.msra.mxu3 %v1540_v5  ;;  %v4814_v5 = vld [vmem:[#allocation12_spill] sm:$0xff]  ;;  %v1534_v42 = vmul.f32 %v1455_v62, %v4815_v6 }
 0x288   :  { %1631 = vmatpush.msrb.mxu2 %v1535_v43  ;;  %v1533_v11 = vmul.f32 %v1456_v3, %v4814_v5 }
 0x289   :  { %1654 = vmatpush.msra.mxu3 %v1536_v45 }
 0x28b   :  { %v1438_v20 = vpop.permute.xlu0 %1437 }
 0x28c   :  { %v1436_v12 = vpop.permute.xlu1 %1435 }
 0x28d   :  { %v1442_v60 = vsel %vm122_vm10, %v1436_v12, %v1438_v20 }
 0x28e   :  { %v1531_v24 = vmul.f32 %v1442_v60, %v4804_v40 }
 0x290   :  { %1632 = vmatpush.msrb.mxu2 %v1531_v24  ;;  %v4816_v24 = vld [vmem:[#allocation32_spill] sm:$0xff] }
 0x291   :  { %2439 = vmatmul.msk.f32.vlgmr.msrb.gmra.mxu2 %vm1210_vm4, %v1431_v4 }
 0x293   :  { %v1440_v16 = vpop.permute.xlu0 %1439 }
 0x294   :  { %v1441_v35 = vsel %vm122_vm10, %v1438_v20, %v1440_v16  ;;  %v1458_v50 = vpop.permute.xlu1 %1457 }
 0x295   :  { %v1532_v10 = vmul.f32 %v1441_v35, %v4809_v29  ;;  %v1467_v37 = vsel %vm170_vm13, %v1458_v50, %v3616_v36  ;;  %v1468_v31 = vsel %vm170_vm13, %v1464_v54, %v1458_v50 }
 0x296   :  { %v1537_v52 = vmul.f32 %v1468_v31, %v4812_v19  ;;  %v1538_v59 = vmul.f32 %v1467_v37, %v4813_v32 }
 0x297   :  { %1655 = vmatpush.msra.mxu3 %v1532_v10 }
 0x298   :  { %1584 = vmatpush.msra.mxu0 %v1537_v52  ;;  %1607 = vmatpush.msrb.mxu1 %v1538_v59 }
 0x299   :  { %2441 = vmatmul.msk.f32.vlgmr.msra.gmra.mxu3 %vm1210_vm4, %v1431_v4  ;;  %2440 = vmatmul.msk.f32.gmra.mxu2 %vm1210_vm4, %v1432_v30 }
 0x29a   :  { %1585 = vmatpush.msra.mxu0 %v1533_v11  ;;  %1608 = vmatpush.msrb.mxu1 %v1534_v42 }
 0x29c   :  { %v1434_v36 = vpop.permute.xlu1 %1433 }
 0x29d   :  { %v1443_v54 = vsel %vm122_vm10, %v1434_v36, %v1436_v12  ;;  %v1444_v43 = vsel %vm122_vm10, %v1440_v16, %v1434_v36 }
 0x29e   :  { %v1529_v45 = vmul.f32 %v1444_v43, %v4811_v14  ;;  %v1530_v20 = vmul.f32 %v1443_v54, %v4810_v47 }
 0x2a0   :  { %1586 = vmatpush.msra.mxu0 %v1529_v45  ;;  %1609 = vmatpush.msrb.mxu1 %v1530_v20 }
 0x2a1   :  { %2435 = vmatmul.msk.f32.vlgmr.msra.gmra.mxu0 %vm1210_vm4, %v1431_v4  ;;  %2437 = vmatmul.msk.f32.vlgmr.msrb.gmra.mxu1 %vm1210_vm4, %v1431_v4 }
 0x2a2   :  { %2442 = vmatmul.msk.f32.gmra.mxu3 %vm1210_vm4, %v1432_v30 }
 0x2a9   :  { %2436 = vmatmul.msk.f32.gmra.mxu0 %vm1210_vm4, %v1432_v30  ;;  %2438 = vmatmul.msk.f32.gmra.mxu1 %vm1210_vm4, %v1432_v30 }
 0x2be   :  { %v848_v12 = vpop.xlane.xlu2 %847  ;;  %v833_v60 = vpop.xlane.xlu0 %832 }
 0x2bf   :  { %v3747_v7 = vmul.f32 %v4816_v24, %v848_v12  ;;  %v856_v16 = vmul.f32 %v4816_v24, %v833_v60 }
 0x2c1   :  { %v903_v62 = vmul.f32 %v3747_v7, %v3747_v7  ;;  %v900_v3 = vmul.f32 %v856_v16, %v856_v16 }
 0x2c6   :  { %v895_v35 = vpop.xlane.xlu2 %894  ;;  %v880_v50 = vpop.xlane.xlu0 %879 }
 0x2c7   :  { %v899_v4 = vmul.f32 %v895_v35, %v4816_v24  ;;  %v896_v10 = vmul.f32 %v880_v50, %v4816_v24 }
 0x2c9   :  { %v907_v37 = vsub.f32 %v899_v4, %v903_v62  ;;  %v904_v31 = vsub.f32 %v896_v10, %v900_v3  ;;  %v4817_v10 = vld [vmem:[#allocation28_spill] sm:$0xff] }
 0x2cb   :  { %v911_v52 = vadd.f32 1e-05, %v907_v37  ;;  %v908_v59 = vadd.f32 1e-05, %v904_v31  ;;  %v952_v37 = vsub.f32 %v4817_v10, %v856_v16  ;;  %v4818_v31 = vld [vmem:[#allocation29_spill] sm:$0xff] }
 0x2cd   :  { %2471 = vrsqrt.f32 %v911_v52  ;;  %vm948_vm15 = vweird.f32 %v911_v52  ;;  %vm918_vm1 = vweird.f32 %v908_v59 }
 0x2ce   :  { %2473 = vrsqrt.f32 %v908_v59 }
 0x2d3   :  { %v2472_v30 = vpop.eup %2471 }
 0x2d4   :  { %v2474_v11 = vpop.eup %2473  ;;  %v943_v42 = vmul.f32 %v2472_v30, %v911_v52  ;;  %vm949_vm0 = vweird.f32 %v2472_v30 }
 0x2d5   :  { %v913_v36 = vmul.f32 %v2474_v11, %v908_v59  ;;  %vm919_vm7 = vweird.f32 %v2474_v11  ;;  %vm950_vm6 = vmor %vm948_vm15, %vm949_vm0  ;;  %v4819_v59 = vld [vmem:[#allocation13_spill] sm:$0xff] }
 0x2d6   :  { %v944_v54 = vmul.f32 %v2472_v30, %v943_v42  ;;  %vm920_vm8 = vmor %vm918_vm1, %vm919_vm7  ;;  %v953_v42 = vsub.f32 %v4818_v31, %v856_v16 }
 0x2d7   :  { %v914_v43 = vmul.f32 %v2474_v11, %v913_v36  ;;  %v954_v36 = vsub.f32 %v3163_v51, %v856_v16 }
 0x2d8   :  { %v945_v45 = vmul.f32 0.5, %v944_v54  ;;  %v955_v54 = vsub.f32 %v3165_v23, %v856_v16  ;;  %v4821_v16 = vld [vmem:[#allocation5_spill] sm:$0xff] }
 0x2d9   :  { %v915_v20 = vmul.f32 0.5, %v914_v43  ;;  %v3754_v12 = vpop.permute.xlu0 %1748 }
 0x2da   :  { %v946_v60 = vsub.f32 1.5, %v945_v45 }
 0x2db   :  { %v916_v35 = vsub.f32 1.5, %v915_v20 }
 0x2dc   :  { %v947_v50 = vmul.f32 %v2472_v30, %v946_v60  ;;  %v964_v60 = vsub.f32 %v4819_v59, %v3747_v7 }
 0x2dd   :  { %v917_v62 = vmul.f32 %v2474_v11, %v916_v35 }
 0x2de   :  { %v951_v43 = vsel %vm950_vm6, %v2472_v30, %v947_v50  ;;  %v965_v30 = vsub.f32 %v4821_v16, %v3747_v7 }
 0x2df   :  { %v921_v4 = vsel %vm920_vm8, %v2474_v11, %v917_v62  ;;  %v3764_v40 = vmul.f32 %v964_v60, %v951_v43  ;;  %v987_v11 = vpop.permute.xlu1 %986  ;;  %vm2053_vm8 = vcmask 130048  }
 0x2e0   :  { %v968_v45 = vmul.f32 %v952_v37, %v921_v4  ;;  %v969_v52 = vmul.f32 %v953_v42, %v921_v4  ;;  %v970_v20 = vmul.f32 %v954_v36, %v921_v4  ;;  %v971_v35 = vmul.f32 %v955_v54, %v921_v4 }
 0x2e1   :  { %v3756_v3 = vpop.permute.xlu0 %1766  ;;  %4820 = vst [vmem:[#allocation3_spill] sm:$0xff] %v3764_v40  ;;  %v966_v36 = vsub.f32 %v3544_v41, %v3747_v7  ;;  %v3770_v54 = vmul.f32 %v965_v30, %v951_v43 }
 0x2e2   :  { %v1004_v62 = vmul.f32 %v987_v11, %v968_v45  ;;  %v1005_v29 = vmul.f32 %v987_v11, %v969_v52  ;;  %v1006_v10 = vmul.f32 %v987_v11, %v970_v20  ;;  %v1007_v15 = vmul.f32 %v987_v11, %v971_v35 }
 0x2e3   :  { %4822 = vst [vmem:[#allocation16_spill] sm:$0xff] %v3770_v54 }
 0x2e9   :  { %v1023_v31 = vpop.permute.xlu0 %1022 }
 0x2ea   :  { %v1040_v28 = vadd.f32 %v1023_v31, %v1004_v62  ;;  %v1041_v51 = vadd.f32 %v1023_v31, %v1005_v29  ;;  %v1042_v55 = vadd.f32 %v1023_v31, %v1006_v10  ;;  %v1043_v23 = vadd.f32 %v1023_v31, %v1007_v15 }
 0x2eb   :  { %v967_v29 = vsub.f32 %v3552_v17, %v3747_v7  ;;  %v3780_v15 = vmul.f32 %v966_v36, %v951_v43  ;;  %v3794_v17 = vpop.f32.mrf.mxu0  ;;  %v3796_v7 = vpop.f32.mrf.mxu1 }
 0x2ec   :  { %v1056_v50 = vmax.f32 %v1040_v28, 0.0  ;;  %v1057_v4 = vmax.f32 %v1041_v51, 0.0  ;;  %v1058_v37 = vmax.f32 %v1042_v55, 0.0  ;;  %v1059_v42 = vmax.f32 %v1043_v23, 0.0  ;;  %4825 = vst [vmem:[#allocation7_spill] sm:$0xff] %v3794_v17 }
 0x2ed   :  { %4823 = vst [vmem:[#allocation18_spill] sm:$0xff] %v3780_v15  ;;  %v3785_v28 = vmul.f32 %v967_v29, %v951_v43  ;;  %v1762_v15 = vpop.permute.xlu1 %1761  ;;  %v1313_v33 = vadd.f32 %v3796_v7, %v3794_v17 }
 0x2ee   :  { %2366 = vst [vmem:[%s4658_s16] sm:$0xff] %v1056_v50 }
 0x2ef   :  { %2367 = vst [vmem:[%s4658_s16 + $0x8] sm:$0xff] %v1057_v4 }
 0x2f0   :  { %2368 = vst [vmem:[%s4658_s16 + $0x10] sm:$0xff] %v1058_v37  ;;  %v3790_v55 = vpop.f32.mrf.mxu2  ;;  %v3792_v41 = vpop.f32.mrf.mxu3 }
 0x2f1   :  { %4824 = vst [vmem:[#allocation12_spill] sm:$0xff] %v3785_v28  ;;  %v1327_v14 = vmul.f32 %v3790_v55, %v3790_v55 }
 0x2f2   :  { %2369 = vst [vmem:[%s4658_s16 + $0x18] sm:$0xff] %v1059_v42 }
 0x2f3   :  { %4826 = vst [vmem:[#allocation28_spill] sm:$0xff] %v3796_v7  ;;  %v3802_v20 = vpop.f32.mrf.mxu0  ;;  %v3804_v43 = vpop.f32.mrf.mxu1 }
 0x2f4   :  { %4827 = vst [vmem:[#allocation29_spill] sm:$0xff] %v3802_v20  ;;  %v1330_v57 = vmul.f32 %v3804_v43, %v3804_v43 }
 0x2f5   :  { %4828 = vst [vmem:[#allocation13_spill] sm:$0xff] %v3804_v43 }
 0x2f8   :  { %v3798_v45 = vpop.f32.mrf.mxu2  ;;  %v3800_v52 = vpop.f32.mrf.mxu3 }
 0x314   :  { %v1634_v35 = vpop.f32.mrf.mxu2 }
 0x315   :  { %v1681_v51 = vmul.f32 %v1634_v35, %v1634_v35 }
 0x31c   :  { %v3806_v59 = vpop.f32.mrf.mxu3  ;;  %v3811_v37 = vpop.f32.mrf.mxu2 }
 0x31d   :  { %v1682_v16 = vmul.f32 %v3806_v59, %v3806_v59 }
 0x31e   :  { %v1588_v60 = vpop.f32.mrf.mxu0  ;;  %v1611_v11 = vpop.f32.mrf.mxu1 }
 0x31f   :  { %v1679_v62 = vmul.f32 %v1588_v60, %v1588_v60  ;;  %v1667_v10 = vadd.f32 %v1611_v11, %v1588_v60  ;;  %v1680_v31 = vmul.f32 %v1611_v11, %v1611_v11 }
 0x321   :  { %v1668_v23 = vadd.f32 %v1667_v10, %v1634_v35  ;;  %v1687_v30 = vadd.f32 %v1680_v31, %v1679_v62 }
 0x323   :  { %v1669_v50 = vadd.f32 %v1668_v23, %v3806_v59  ;;  %v1688_v4 = vadd.f32 %v1687_v30, %v1681_v51  ;;  %v1685_v51 = vmul.f32 %v3811_v37, %v3811_v37 }
 0x325   :  { %1670 = vadd.xlane.f32.xlu0 %v1669_v50  ;;  %v1689_v42 = vadd.f32 %v1688_v4, %v1682_v16  ;;  %v3813_v36 = vpop.f32.mrf.mxu3 }
 0x326   :  { %v3815_v29 = vpop.f32.mrf.mxu0  ;;  %v3817_v28 = vpop.f32.mrf.mxu1  ;;  %v1686_v16 = vmul.f32 %v3813_v36, %v3813_v36 }
 0x327   :  { %1690 = vadd.xlane.f32.xlu1 %v1689_v42  ;;  %v1683_v10 = vmul.f32 %v3815_v29, %v3815_v29  ;;  %v1672_v62 = vadd.f32 %v3817_v28, %v3815_v29  ;;  %v1684_v31 = vmul.f32 %v3817_v28, %v3817_v28 }
 0x329   :  { %v1673_v23 = vadd.f32 %v1672_v62, %v3811_v37  ;;  %v1692_v30 = vadd.f32 %v1684_v31, %v1683_v10 }
 0x32b   :  { %v1674_v50 = vadd.f32 %v1673_v23, %v3813_v36  ;;  %v1693_v4 = vadd.f32 %v1692_v30, %v1685_v51  ;;  %v1744_v51 = vpop.permute.xlu2 %1743 }
 0x32d   :  { %v1694_v42 = vadd.f32 %v1693_v4, %v1686_v16 }
 0x32f   :  { %1675 = vadd.xlane.f32.xlu1 %v1674_v50  ;;  %1695 = vadd.xlane.f32.xlu2 %v1694_v42 }
 0x398   :  { %v1671_v54 = vpop.xlane.xlu0 %1670 }
 0x399   :  { %v1677_v40 = vmul.f32 %v1671_v54, %v4816_v24 }
 0x39a   :  { %v1691_v49 = vpop.xlane.xlu1 %1690 }
 0x39b   :  { %v1697_v56 = vmul.f32 %v1691_v49, %v4816_v24  ;;  %v1699_v9 = vmul.f32 %v1677_v40, %v1677_v40  ;;  %v1726_v30 = vsub.f32 %v1611_v11, %v1677_v40  ;;  %v1727_v50 = vsub.f32 %v1634_v35, %v1677_v40 }
 0x39c   :  { %v1725_v27 = vsub.f32 %v1588_v60, %v1677_v40 }
 0x39d   :  { %v1701_v39 = vsub.f32 %v1697_v56, %v1699_v9 }
 0x39f   :  { %v1703_v62 = vadd.f32 1e-05, %v1701_v39 }
 0x3a1   :  { %2475 = vrsqrt.f32 %v1703_v62  ;;  %vm1711_vm4 = vweird.f32 %v1703_v62 }
 0x3a2   :  { %v1676_v49 = vpop.xlane.xlu1 %1675 }
 0x3a3   :  { %v3834_v48 = vmul.f32 %v1676_v49, %v4816_v24 }
 0x3a7   :  { %v2476_v26 = vpop.eup %2475 }
 0x3a8   :  { %v1706_v38 = vmul.f32 %v2476_v26, %v1703_v62  ;;  %vm1712_vm14 = vweird.f32 %v2476_v26 }
 0x3a9   :  { %vm1713_vm7 = vmor %vm1711_vm4, %vm1712_vm14 }
 0x3aa   :  { %v1707_v10 = vmul.f32 %v2476_v26, %v1706_v38 }
 0x3ac   :  { %v1708_v31 = vmul.f32 0.5, %v1707_v10 }
 0x3ae   :  { %v1709_v23 = vsub.f32 1.5, %v1708_v31  ;;  %v1696_v31 = vpop.xlane.xlu2 %1695 }
 0x3af   :  { %v1698_v11 = vmul.f32 %v1696_v31, %v4816_v24  ;;  %v1729_v31 = vsub.f32 %v3815_v29, %v3834_v48 }
 0x3b0   :  { %v1710_v16 = vmul.f32 %v2476_v26, %v1709_v23 }
 0x3b2   :  { %v1714_v54 = vsel %vm1713_vm7, %v2476_v26, %v1710_v16  ;;  %v1700_v26 = vmul.f32 %v3834_v48, %v3834_v48 }
 0x3b3   :  { %v1734_v4 = vmul.f32 %v1726_v30, %v1714_v54  ;;  %v1735_v42 = vmul.f32 %v1727_v50, %v1714_v54  ;;  %v1733_v39 = vmul.f32 %v1725_v27, %v1714_v54  ;;  %v1728_v30 = vsub.f32 %v3806_v59, %v1677_v40 }
 0x3b4   :  { %v1702_v60 = vsub.f32 %v1698_v11, %v1700_v26 }
 0x3b5   :  { %v1752_v56 = vmul.f32 %v1744_v51, %v1734_v4  ;;  %v1753_v9 = vmul.f32 %v1744_v51, %v1735_v42  ;;  %v1751_v35 = vmul.f32 %v1744_v51, %v1733_v39  ;;  %v1736_v4 = vmul.f32 %v1728_v30, %v1714_v54 }
 0x3b6   :  { %v1704_v16 = vadd.f32 1e-05, %v1702_v60 }
 0x3b7   :  { %v1770_v38 = vadd.f32 %v1762_v15, %v1752_v56  ;;  %v1771_v10 = vadd.f32 %v1762_v15, %v1753_v9  ;;  %v1769_v27 = vadd.f32 %v1762_v15, %v1751_v35  ;;  %v1754_v49 = vmul.f32 %v1744_v51, %v1736_v4 }
 0x3b8   :  { %2477 = vrsqrt.f32 %v1704_v16  ;;  %vm1721_vm15 = vweird.f32 %v1704_v16  ;;  %v1732_v4 = vsub.f32 %v3813_v36, %v3834_v48 }
 0x3b9   :  { %v3836_v25 = vmax.f32 %v1770_v38, 0.0  ;;  %v3838_v62 = vmax.f32 %v1771_v10, 0.0  ;;  %v3849_v23 = vmax.f32 %v1769_v27, 0.0  ;;  %v1772_v40 = vadd.f32 %v1762_v15, %v1754_v49 }
 0x3ba   :  { %v1731_v15 = vsub.f32 %v3811_v37, %v3834_v48  ;;  %v1730_v27 = vsub.f32 %v3817_v28, %v3834_v48 }
 0x3bb   :  { %4829 = vst [vmem:[#allocation5_spill] sm:$0xff] %v3838_v62  ;;  %1917 = vrot.lane.b32.xlu0 %v3838_v62, %s2494_s20  ;;  %1941 = vrot.lane.b32.xlu2 %v3838_v62, %s2495_s0  ;;  %v3870_v9 = vmax.f32 %v1772_v40, 0.0 }
 0x3bc   :  { %1937 = vrot.lane.b32.xlu1 %v3836_v25, %s2495_s0 }
 0x3bd   :  { %4830 = vst [vmem:[#allocation33_spill] sm:$0xff] %v3870_v9 }
 0x3be   :  { %v2478_v50 = vpop.eup %2477 }
 0x3bf   :  { %v1716_v42 = vmul.f32 %v2478_v50, %v1704_v16  ;;  %vm1722_vm0 = vweird.f32 %v2478_v50 }
 0x3c0   :  { %vm1723_vm1 = vmor %vm1721_vm15, %vm1722_vm0 }
 0x3c1   :  { %v1717_v56 = vmul.f32 %v2478_v50, %v1716_v42 }
 0x3c3   :  { %1893 = vrot.lane.b32.xlu0 %v3838_v62, %s2493_s17  ;;  %1913 = vrot.lane.b32.xlu2 %v3836_v25, %s2494_s20  ;;  %v1718_v59 = vmul.f32 0.5, %v1717_v56 }
 0x3c4   :  { %1933 = vrot.lane.b32.xlu1 %v3849_v23, %s2495_s0 }
 0x3c5   :  { %v1719_v39 = vsub.f32 1.5, %v1718_v59 }
 0x3c7   :  { %v1720_v51 = vmul.f32 %v2478_v50, %v1719_v39 }
 0x3c9   :  { %v1724_v54 = vsel %vm1723_vm1, %v2478_v50, %v1720_v51 }
 0x3ca   :  { %v1739_v38 = vmul.f32 %v1731_v15, %v1724_v54  ;;  %v1737_v35 = vmul.f32 %v1729_v31, %v1724_v54  ;;  %v1738_v29 = vmul.f32 %v1730_v27, %v1724_v54  ;;  %v1740_v42 = vmul.f32 %v1732_v4, %v1724_v54 }
 0x3cb   :  { %1889 = vrot.lane.b32.xlu2 %v3836_v25, %s2493_s17  ;;  %1885 = vrot.lane.b32.xlu0 %v3849_v23, %s2493_s17 }
 0x3cc   :  { %1861 = vrot.lane.b32.xlu1 %v3849_v23, %s2492_s2  ;;  %v1757_v10 = vmul.f32 %v3754_v12, %v1739_v38  ;;  %v1755_v26 = vmul.f32 %v3754_v12, %v1737_v35  ;;  %v1756_v16 = vmul.f32 %v3754_v12, %v1738_v29  ;;  %v1758_v49 = vmul.f32 %v3754_v12, %v1740_v42 }
 0x3ce   :  { %v1775_v37 = vadd.f32 %v3756_v3, %v1757_v10  ;;  %v1773_v60 = vadd.f32 %v3756_v3, %v1755_v26  ;;  %v1774_v28 = vadd.f32 %v3756_v3, %v1756_v16  ;;  %v1776_v48 = vadd.f32 %v3756_v3, %v1758_v49 }
 0x3d0   :  { %v3897_v11 = vmax.f32 %v1775_v37, 0.0  ;;  %v3909_v30 = vmax.f32 %v1773_v60, 0.0  ;;  %v3918_v50 = vmax.f32 %v1774_v28, 0.0  ;;  %v3942_v56 = vmax.f32 %v1776_v48, 0.0 }
 0x3d2   :  { %4831 = vst [vmem:[#allocation34_spill] sm:$0xff] %v3897_v11 }
 0x3d3   :  { %1837 = vrot.lane.b32.xlu0 %v3849_v23, %s2489_s1  ;;  %1909 = vrot.lane.b32.xlu2 %v3849_v23, %s2494_s20  ;;  %4832 = vst [vmem:[#allocation35_spill] sm:$0xff] %v3942_v56 }
 0x3d4   :  { %1841 = vrot.lane.b32.xlu1 %v3836_v25, %s2489_s1 }
 0x3db   :  { %1945 = vrot.lane.b32.xlu0 %v3870_v9, %s2495_s0  ;;  %1865 = vrot.lane.b32.xlu2 %v3836_v25, %s2492_s2 }
 0x3dc   :  { %1849 = vrot.lane.b32.xlu1 %v3870_v9, %s2489_s1 }
 0x3e3   :  { %1873 = vrot.lane.b32.xlu0 %v3870_v9, %s2492_s2  ;;  %1813 = vrot.lane.b32.xlu2 %v3849_v23, %s2488_s27 }
 0x3e4   :  { %1965 = vrot.lane.b32.xlu1 %v3838_v62, %s2496_s21 }
 0x3eb   :  { %1817 = vrot.lane.b32.xlu0 %v3836_v25, %s2488_s27  ;;  %1921 = vrot.lane.b32.xlu2 %v3870_v9, %s2494_s20 }
 0x3ec   :  { %1801 = vrot.lane.b32.xlu1 %v3870_v9, %s2487_s26 }
 0x3f3   :  { %1961 = vrot.lane.b32.xlu0 %v3836_v25, %s2496_s21  ;;  %1789 = vrot.lane.b32.xlu2 %v3849_v23, %s2487_s26 }
 0x3f4   :  { %1919 = vrot.lane.b32.xlu1 %v3897_v11, %s2494_s20 }
 0x3fb   :  { %1793 = vrot.lane.b32.xlu0 %v3836_v25, %s2487_s26  ;;  %1897 = vrot.lane.b32.xlu2 %v3870_v9, %s2493_s17 }
 0x3fc   :  { %1935 = vrot.lane.b32.xlu1 %v3909_v30, %s2495_s0 }
 0x403   :  { %1825 = vrot.lane.b32.xlu0 %v3870_v9, %s2488_s27  ;;  %1939 = vrot.lane.b32.xlu2 %v3918_v50, %s2495_s0 }
 0x404   :  { %1911 = vrot.lane.b32.xlu1 %v3909_v30, %s2494_s20 }
 0x40b   :  { %1957 = vrot.lane.b32.xlu0 %v3849_v23, %s2496_s21  ;;  %1891 = vrot.lane.b32.xlu2 %v3918_v50, %s2493_s17 }
 0x40c   :  { %1863 = vrot.lane.b32.xlu1 %v3909_v30, %s2492_s2 }
 0x413   :  { %1943 = vrot.lane.b32.xlu0 %v3897_v11, %s2495_s0  ;;  %1867 = vrot.lane.b32.xlu2 %v3918_v50, %s2492_s2 }
 0x414   :  { %1843 = vrot.lane.b32.xlu1 %v3918_v50, %s2489_s1 }
 0x415   :  { %v1942_v36 = vpop.permute.xlu2 %1941 }
 0x41b   :  { %1915 = vrot.lane.b32.xlu0 %v3918_v50, %s2494_s20  ;;  %1947 = vrot.lane.b32.xlu2 %v3942_v56, %s2495_s0 }
 0x41c   :  { %1815 = vrot.lane.b32.xlu1 %v3909_v30, %s2488_s27 }
 0x41d   :  { %v1914_v12 = vpop.permute.xlu2 %1913 }
 0x423   :  { %1895 = vrot.lane.b32.xlu0 %v3897_v11, %s2493_s17  ;;  %1875 = vrot.lane.b32.xlu2 %v3942_v56, %s2492_s2 }
 0x424   :  { %1923 = vrot.lane.b32.xlu1 %v3942_v56, %s2494_s20 }
 0x425   :  { %v1890_v3 = vpop.permute.xlu2 %1889 }
 0x42b   :  { %1819 = vrot.lane.b32.xlu2 %v3918_v50, %s2488_s27  ;;  %1887 = vrot.lane.b32.xlu0 %v3909_v30, %s2493_s17 }
 0x42c   :  { %1851 = vrot.lane.b32.xlu1 %v3942_v56, %s2489_s1 }
 0x42d   :  { %v1918_v40 = vpop.permute.xlu0 %1917  ;;  %v1910_v59 = vpop.permute.xlu2 %1909 }
 0x42e   :  { %v3964_v39 = vsel %vm242_vm11, %v1914_v12, %v1918_v40  ;;  %v1938_v51 = vpop.permute.xlu1 %1937  ;;  %v3968_v54 = vsel %vm242_vm11, %v1910_v59, %v1914_v12 }
 0x42f   :  { %v3972_v15 = vsel %vm266_vm3, %v1938_v51, %v1942_v36 }
 0x433   :  { %1791 = vrot.lane.b32.xlu2 %v3909_v30, %s2487_s26  ;;  %1839 = vrot.lane.b32.xlu0 %v3909_v30, %s2489_s1 }
 0x434   :  { %1967 = vrot.lane.b32.xlu1 %v3897_v11, %s2496_s21 }
 0x435   :  { %v1894_v38 = vpop.permute.xlu0 %1893  ;;  %v3980_v10 = vpop.permute.xlu2 %1865 }
 0x436   :  { %v3984_v31 = vsel %vm218_vm2, %v1890_v3, %v1894_v38  ;;  %v1934_v35 = vpop.permute.xlu1 %1933 }
 0x43b   :  { %1845 = vrot.lane.b32.xlu2 %v3838_v62, %s2489_s1  ;;  %1963 = vrot.lane.b32.xlu0 %v3918_v50, %s2496_s21 }
 0x43c   :  { %1827 = vrot.lane.b32.xlu1 %v3942_v56, %s2488_s27 }
 0x43d   :  { %v1886_v37 = vpop.permute.xlu0 %1885  ;;  %v3992_v26 = vpop.permute.xlu2 %1813 }
 0x43e   :  { %v3996_v27 = vsel %vm218_vm2, %v1886_v37, %v1890_v3  ;;  %v3998_v29 = vpop.permute.xlu1 %1861 }
 0x443   :  { %1899 = vrot.lane.b32.xlu2 %v3942_v56, %s2493_s17  ;;  %1795 = vrot.lane.b32.xlu0 %v3918_v50, %s2487_s26 }
 0x444   :  { %1959 = vrot.lane.b32.xlu1 %v3909_v30, %s2496_s21 }
 0x445   :  { %v4006_v60 = vpop.permute.xlu0 %1837  ;;  %v1922_v16 = vpop.permute.xlu2 %1921 }
 0x446   :  { %v4008_v28 = vpop.permute.xlu1 %1841  ;;  %v4012_v4 = vsel %vm242_vm11, %v1918_v40, %v1922_v16  ;;  %v4016_v42 = vsel %vm242_vm11, %v1922_v16, %v1910_v59 }
 0x447   :  { %4833 = vst [vmem:[#allocation36_spill] sm:$0xff] %v4012_v4 }
 0x448   :  { %4834 = vst [vmem:[#allocation37_spill] sm:$0xff] %v4016_v42 }
 0x44b   :  { %1803 = vrot.lane.b32.xlu2 %v3942_v56, %s2487_s26  ;;  %1869 = vrot.lane.b32.xlu0 %v3838_v62, %s2492_s2 }
 0x44c   :  { %1847 = vrot.lane.b32.xlu1 %v3897_v11, %s2489_s1 }
 0x44d   :  { %v1946_v49 = vpop.permute.xlu0 %1945  ;;  %v4024_v48 = vpop.permute.xlu2 %1789 }
 0x44e   :  { %v4028_v12 = vsel %vm266_vm3, %v1942_v36, %v1946_v49  ;;  %v4032_v3 = vsel %vm266_vm3, %v1946_v49, %v1934_v35  ;;  %v4034_v40 = vpop.permute.xlu1 %1849 }
 0x44f   :  { %4835 = vst [vmem:[#allocation38_spill] sm:$0xff] %v4028_v12 }
 0x450   :  { %4836 = vst [vmem:[#allocation39_spill] sm:$0xff] %v4032_v3 }
 0x453   :  { %1871 = vrot.lane.b32.xlu2 %v3897_v11, %s2492_s2  ;;  %1971 = vrot.lane.b32.xlu0 %v3942_v56, %s2496_s21 }
 0x454   :  { %1823 = vrot.lane.b32.xlu1 %v3897_v11, %s2488_s27 }
 0x455   :  { %v4042_v59 = vpop.permute.xlu0 %1873  ;;  %v1898_v16 = vpop.permute.xlu2 %1897 }
 0x456   :  { %v4044_v36 = vpop.permute.xlu1 %1965  ;;  %v4048_v49 = vsel %vm218_vm2, %v1894_v38, %v1898_v16  ;;  %v4052_v24 = vsel %vm218_vm2, %v1898_v16, %v1886_v37 }
 0x457   :  { %4837 = vst [vmem:[#allocation40_spill] sm:$0xff] %v4048_v49 }
 0x458   :  { %4838 = vst [vmem:[#allocation41_spill] sm:$0xff] %v4052_v24 }
 0x45b   :  { %1969 = vrot.lane.b32.xlu2 %v3870_v9, %s2496_s21  ;;  %1821 = vrot.lane.b32.xlu0 %v3838_v62, %s2488_s27 }
 0x45c   :  { %1799 = vrot.lane.b32.xlu1 %v3897_v11, %s2487_s26  ;;  %v1953_v11 = vsel %vm266_vm3, %v1934_v35, %v1938_v51  ;;  %v1318_v51 = vadd.f32 %v3804_v43, %v3802_v20  ;;  %v1328_v43 = vmul.f32 %v3792_v41, %v3792_v41 }
 0x45d   :  { %v4060_v56 = vpop.permute.xlu0 %1817  ;;  %v1940_v4 = vpop.permute.xlu2 %1939  ;;  %v2037_v12 = vmul.f32 %v1953_v11, %v3090_v53 }
 0x45e   :  { %v4062_v18 = vpop.permute.xlu1 %1801 }
 0x463   :  { %1797 = vrot.lane.b32.xlu2 %v3838_v62, %s2487_s26 }
 0x465   :  { %v4066_v38 = vpop.permute.xlu0 %1961  ;;  %v4068_v37 = vpop.permute.xlu2 %1891 }
 0x466   :  { %v4070_v16 = vpop.permute.xlu1 %1919 }
 0x46d   :  { %v4072_v9 = vpop.permute.xlu0 %1793  ;;  %v4074_v49 = vpop.permute.xlu2 %1867 }
 0x46e   :  { %4839 = vst [vmem:[#allocation42_spill] sm:$0xff] %v4072_v9  ;;  %v4076_v24 = vpop.permute.xlu1 %1935 }
 0x46f   :  { %4840 = vst [vmem:[#allocation43_spill] sm:$0xff] %v4076_v24  ;;  %v1954_v42 = vsel %vm266_vm3, %v4076_v24, %v1940_v4 }
 0x470   :  { %v2041_v62 = vmul.f32 %v1954_v42, %v3090_v53  ;;  %v1325_v53 = vmul.f32 %v3794_v17, %v3794_v17  ;;  %v1314_v42 = vadd.f32 %v1313_v33, %v3790_v55 }
 0x472   :  { %2060 = vmatpush.msrb.mxu0 %v2041_v62  ;;  %v1326_v62 = vmul.f32 %v3796_v7, %v3796_v7  ;;  %v1315_v17 = vadd.f32 %v1314_v42, %v3792_v41  ;;  %v1331_v7 = vmul.f32 %v3798_v45, %v3798_v45 }
 0x474   :  { %2061 = vmatpush.msrb.mxu0 %v2037_v12  ;;  %v1329_v12 = vmul.f32 %v3802_v20, %v3802_v20  ;;  %v1333_v9 = vadd.f32 %v1326_v62, %v1325_v53 }
 0x475   :  { %v4085_v21 = vpop.permute.xlu0 %1825  ;;  %v4087_v46 = vpop.permute.xlu2 %1947 }
 0x476   :  { %4841 = vst [vmem:[#allocation44_spill] sm:$0xff] %v4087_v46  ;;  %v4089_v3 = vpop.permute.xlu1 %1911  ;;  %v1338_v46 = vadd.f32 %v1330_v57, %v1329_v12  ;;  %v1334_v20 = vadd.f32 %v1333_v9, %v1327_v14  ;;  %v2038_v14 = vmul.f32 %v3972_v15, %v3126_v13  ;;  %v2029_v15 = vmul.f32 %v3968_v54, %v3044_v34 }
 0x478   :  { %v1339_v62 = vadd.f32 %v1338_v46, %v1331_v7 }
 0x47d   :  { %v4095_v35 = vpop.permute.xlu0 %1957  ;;  %v4097_v47 = vpop.permute.xlu2 %1875 }
 0x47e   :  { %4842 = vst [vmem:[#allocation45_spill] sm:$0xff] %v4095_v35  ;;  %v4103_v11 = vpop.permute.xlu1 %1863  ;;  %v1319_v35 = vadd.f32 %v1318_v51, %v3798_v45 }
 0x47f   :  { %v1882_v54 = vsel %vm194_vm5, %v4103_v11, %v4074_v49 }
 0x480   :  { %v1320_v33 = vadd.f32 %v1319_v35, %v3800_v52  ;;  %v1332_v35 = vmul.f32 %v3800_v52, %v3800_v52 }
 0x482   :  { %v1340_v9 = vadd.f32 %v1339_v62, %v1332_v35 }
 0x485   :  { %v4117_v24 = vpop.permute.xlu0 %1943  ;;  %1316 = vadd.xlane.f32.xlu0 %v1315_v17  ;;  %v4126_v57 = vpop.permute.xlu2 %1819  ;;  %v1335_v17 = vadd.f32 %v1334_v20, %v1328_v43  ;;  %v2030_v43 = vmul.f32 %v3964_v39, %v3052_v63  ;;  %v2018_v39 = vmul.f32 %v3918_v50, %v4803_v61  ;;  %v1881_v50 = vsel %vm194_vm5, %v3998_v29, %v3980_v10 }
 0x486   :  { %v1952_v51 = vsel %vm266_vm3, %v1940_v4, %v4117_v24  ;;  %1321 = vadd.xlane.f32.xlu1 %v1320_v33  ;;  %v4124_v53 = vpop.permute.xlu1 %1843 }
 0x487   :  { %v2042_v42 = vmul.f32 %v1952_v51, %v3126_v13 }
 0x489   :  { %2106 = vmatpush.msra.mxu2 %v2042_v42 }
 0x48b   :  { %2107 = vmatpush.msra.mxu2 %v2038_v14  ;;  %v828_v14 = vld [vmem:[%s4651_s6 + $0x18] sm:$0xff] }
 0x48c   :  { %1336 = vadd.xlane.f32.xlu2 %v1335_v17 }
 0x48d   :  { %v1916_v4 = vpop.permute.xlu0 %1915  ;;  %1341 = vadd.xlane.f32.xlu0 %v1340_v9  ;;  %v4143_v20 = vpop.permute.xlu2 %1791 }
 0x48e   :  { %v1928_v12 = vsel %vm242_vm11, %v1916_v4, %v4070_v16  ;;  %v1930_v46 = vsel %vm242_vm11, %v4089_v3, %v1916_v4  ;;  %v4139_v7 = vpop.permute.xlu1 %1815  ;;  %v2010_v4 = vmul.f32 %v1882_v54, %v2932_v58  ;;  %v1859_v54 = vsel %vm170_vm13, %v4034_v40, %v4006_v60 }
 0x48f   :  { %v2033_v33 = vmul.f32 %v1930_v46, %v3044_v34  ;;  %v2034_v13 = vmul.f32 %v1928_v12, %v3052_v63  ;;  %v2022_v63 = vmul.f32 %v3984_v31, %v3009_v2  ;;  %v824_v46 = vld [vmem:[%s4650_s5 + $0x18] sm:$0xff] }
 0x491   :  { %2062 = vmatpush.msrb.mxu0 %v2033_v33  ;;  %2108 = vmatpush.msra.mxu2 %v2034_v13  ;;  %v1884_v33 = vsel %vm194_vm5, %v4097_v47, %v4103_v11  ;;  %v1883_v11 = vsel %vm194_vm5, %v4042_v59, %v3998_v29 }
 0x493   :  { %2063 = vmatpush.msrb.mxu0 %v2029_v15  ;;  %2109 = vmatpush.msra.mxu2 %v2030_v43 }
 0x495   :  { %v4149_v51 = vpop.permute.xlu0 %1895  ;;  %v4160_v34 = vpop.permute.xlu2 %1845 }
 0x496   :  { %v1904_v62 = vsel %vm218_vm2, %v4068_v37, %v4149_v51  ;;  %v4155_v35 = vpop.permute.xlu1 %1923 }
 0x497   :  { %v2026_v42 = vmul.f32 %v1904_v62, %v3009_v2  ;;  %v2014_v2 = vmul.f32 %v3836_v25, %v4803_v61  ;;  %v2021_v25 = vmul.f32 %v3996_v27, %v2946_v0  ;;  %v2006_v61 = vmul.f32 %v1881_v50, %v2932_v58  ;;  %v1309_v58 = vld [vmem:[%s4659_s8] sm:$0xff] }
 0x498   :  { %v2013_v27 = vmul.f32 %v3849_v23, %v4802_v1  ;;  %v2009_v62 = vmul.f32 %v1884_v33, %v2953_v8  ;;  %v1834_v23 = vsel %vm146_vm9, %v4139_v7, %v4126_v57 }
 0x499   :  { %2110 = vmatpush.msra.mxu2 %v2026_v42 }
 0x49b   :  { %2111 = vmatpush.msra.mxu2 %v2022_v63  ;;  %v2005_v63 = vmul.f32 %v1883_v11, %v2953_v8  ;;  %v4845_v11 = vld [vmem:[#allocation8_spill] sm:$0xff] }
 0x49d   :  { %v4171_v17 = vpop.permute.xlu0 %1887  ;;  %2112 = vmatpush.msra.mxu2 %v2018_v39  ;;  %v4199_v13 = vpop.permute.xlu2 %1899  ;;  %v1310_v39 = vld [vmem:[%s4659_s8 + $0x8] sm:$0xff] }
 0x49e   :  { %v1906_v31 = vsel %vm218_vm2, %v4171_v17, %v4068_v37  ;;  %v4183_v9 = vpop.permute.xlu1 %1851  ;;  %v2017_v37 = vmul.f32 %v3909_v30, %v4802_v1  ;;  %v1857_v30 = vsel %vm170_vm13, %v4006_v60, %v4008_v28  ;;  %v1975_v60 = vsel %vm290_vm12, %v4066_v38, %v4044_v36 }
 0x49f   :  { %v2025_v12 = vmul.f32 %v1906_v31, %v2946_v0  ;;  %1037 = vperm.xlu1 %2462, %v828_v14   ;;  %2113 = vmatpush.msra.mxu2 %v2014_v2  ;;  %v1998_v42 = vmul.f32 %v1857_v30, %v4813_v32  ;;  %v1833_v14 = vsel %vm146_vm9, %v3992_v26, %v4060_v56 }
 0x4a0   :  { %v1997_v2 = vmul.f32 %v1859_v54, %v4812_v19  ;;  %v1990_v31 = vmul.f32 %v1833_v14, %v4815_v6  ;;  %v4848_v54 = vld [vmem:[#allocation45_spill] sm:$0xff] }
 0x4a1   :  { %2064 = vmatpush.msrb.mxu0 %v2025_v12  ;;  %2114 = vmatpush.msra.mxu2 %v2010_v4  ;;  %v1977_v14 = vsel %vm290_vm12, %v4848_v54, %v4066_v38  ;;  %v4851_v38 = vld [vmem:[#allocation39_spill] sm:$0xff] }
 0x4a3   :  { %2065 = vmatpush.msrb.mxu0 %v2021_v25  ;;  %2115 = vmatpush.msra.mxu2 %v2006_v61 }
 0x4a4   :  { %1001 = vperm.xlu2 %2463, %v824_v46  }
 0x4a5   :  { %v1840_v0 = vpop.permute.xlu0 %1839  ;;  %2066 = vmatpush.msrb.mxu0 %v2017_v37  ;;  %v4249_v4 = vpop.permute.xlu2 %1803  ;;  %v2046_v37 = vmul.f32 %v1975_v60, %v3158_v22 }
 0x4a6   :  { %v1858_v43 = vsel %vm170_vm13, %v1840_v0, %v4124_v53  ;;  %v4217_v15 = vpop.permute.xlu1 %1967  ;;  %v1860_v29 = vsel %vm170_vm13, %v4183_v9, %v1840_v0  ;;  %v1812_v33 = vsel %vm122_vm10, %v4249_v4, %v4143_v20  ;;  %v4843_v0 = vld [vmem:[#allocation43_spill] sm:$0xff] }
 0x4a7   :  { %v2002_v1 = vmul.f32 %v1858_v43, %v4813_v32  ;;  %1389 = vperm.xlu1 %2462, %v1309_v58   ;;  %2067 = vmatpush.msrb.mxu0 %v2013_v27  ;;  %v1994_v32 = vmul.f32 %v1834_v23, %v4815_v6  ;;  %v2001_v8 = vmul.f32 %v1860_v29, %v4812_v19  ;;  %v4844_v27 = vld [vmem:[#allocation44_spill] sm:$0xff] }
 0x4a8   :  { %v1835_v19 = vsel %vm146_vm9, %v4085_v21, %v3992_v26  ;;  %v1311_v26 = vld [vmem:[%s4660_s9] sm:$0xff]  ;;  %v1956_v30 = vsel %vm266_vm3, %v4844_v27, %v4843_v0  ;;  %v1908_v0 = vsel %vm218_vm2, %v4199_v13, %v4171_v17  ;;  %v1902_v17 = vsel %vm218_vm2, %v4149_v51, %v4199_v13  ;;  %v4377_v51 = vld [vmem:[%s4661_s13 + $0x10] sm:$0xff] }
 0x4a9   :  { %2068 = vmatpush.msrb.mxu0 %v2009_v62  ;;  %2116 = vmatpush.msra.mxu2 %v2002_v1  ;;  %v1989_v58 = vmul.f32 %v1835_v19, %v4814_v5  ;;  %v4846_v1 = vld [vmem:[#allocation42_spill] sm:$0xff]  ;;  %v4860_v13 = vld [vmem:[#allocation23_spill] sm:$0xff] }
 0x4aa   :  { %v1809_v23 = vsel %vm122_vm10, %v4024_v48, %v4846_v1 }
 0x4ab   :  { %2069 = vmatpush.msrb.mxu0 %v2005_v63  ;;  %2117 = vmatpush.msra.mxu2 %v1998_v42  ;;  %v4847_v63 = vld [vmem:[#allocation6_spill] sm:$0xff] }
 0x4ac   :  { %1394 = vperm.xlu2 %2463, %v1310_v39   ;;  %v2044_v39 = vmul.f32 %v1956_v30, %v4847_v63  ;;  %v4855_v30 = vld [vmem:[#allocation37_spill] sm:$0xff] }
 0x4ad   :  { %v1964_v50 = vpop.permute.xlu0 %1963  ;;  %2070 = vmatpush.msrb.mxu0 %v2001_v8  ;;  %2118 = vmatpush.msra.mxu2 %v1994_v32  ;;  %v4849_v32 = vld [vmem:[#allocation10_spill] sm:$0xff] }
 0x4ae   :  { %v1976_v12 = vsel %vm290_vm12, %v1964_v50, %v4217_v15  ;;  %v4254_v25 = vpop.permute.xlu1 %1827  ;;  %v1982_v19 = vmul.f32 %v1809_v23, %v4849_v32  ;;  %v4857_v23 = vld [vmem:[#allocation22_spill] sm:$0xff] }
 0x4af   :  { %v2050_v6 = vmul.f32 %v1976_v12, %v3158_v22  ;;  %v1836_v61 = vsel %vm146_vm9, %v4254_v25, %v4139_v7  ;;  %2071 = vmatpush.msrb.mxu0 %v1997_v2  ;;  %2119 = vmatpush.msra.mxu2 %v1990_v31  ;;  %v4278_v7 = vld [vmem:[%s4661_s13 + $0x8] sm:$0xff]  ;;  %v1811_v22 = vsel %vm122_vm10, %v4062_v18, %v4024_v48 }
 0x4b0   :  { %v1993_v46 = vmul.f32 %v1836_v61, %v4814_v5  ;;  %v1985_v5 = vmul.f32 %v1812_v33, %v4845_v11  ;;  %v1981_v62 = vmul.f32 %v1811_v22, %v4845_v11  ;;  %v1932_v2 = vsel %vm242_vm11, %v4155_v35, %v4089_v3  ;;  %v4850_v31 = vld [vmem:[#allocation26_spill] sm:$0xff]  ;;  %v4333_v3 = vld [vmem:[%s4661_s13] sm:$0xff]  ;;  %v4852_v61 = vld [vmem:[#allocation27_spill] sm:$0xff] }
 0x4b1   :  { %2143 = vmatpush.msrb.mxu3 %v2050_v6  ;;  %v2040_v12 = vmul.f32 %v4851_v38, %v4847_v63  ;;  %v4325_v6 = vpop.permute.xlu2 %1871  ;;  %v4858_v63 = vld [vmem:[#allocation36_spill] sm:$0xff] }
 0x4b2   :  { %2072 = vmatpush.msrb.mxu0 %v1993_v46  ;;  %v4863_v38 = vld [vmem:[#allocation40_spill] sm:$0xff] }
 0x4b3   :  { %2144 = vmatpush.msrb.mxu3 %v2046_v37  ;;  %v4853_v37 = vld [vmem:[#allocation24_spill] sm:$0xff] }
 0x4b4   :  { %2073 = vmatpush.msrb.mxu0 %v1989_v58  ;;  %1407 = vperm.xlu2 %2463, %v1311_v26   ;;  %v2036_v33 = vmul.f32 %v1932_v2, %v4853_v37  ;;  %v1926_v26 = vsel %vm242_vm11, %v4070_v16, %v4155_v35  ;;  %v4854_v58 = vld [vmem:[#allocation38_spill] sm:$0xff]  ;;  %v2032_v11 = vmul.f32 %v4855_v30, %v4853_v37  ;;  %v4355_v16 = vld [vmem:[%s4661_s13 + $0x18] sm:$0xff]  ;;  %v4856_v35 = vld [vmem:[#allocation25_spill] sm:$0xff] }
 0x4b5   :  { %v4289_v43 = vpop.permute.xlu0 %1795  ;;  %2445 = vmatmul.msk.f32.vlgmr.msrb.gmra.mxu3 %vm2053_vm8, %v4278_v7  ;;  %v2039_v22 = vmul.f32 %v4854_v58, %v4852_v61  ;;  %v4861_v2 = vld [vmem:[#allocation2_spill] sm:$0xff] }
 0x4b6   :  { %v1810_v29 = vsel %vm122_vm10, %v4143_v20, %v4289_v43  ;;  %v4302_v42 = vpop.permute.xlu1 %1959  ;;  %2074 = vmatpush.msrb.mxu0 %v1985_v5  ;;  %v1950_v20 = vsel %vm266_vm3, %v4117_v24, %v4844_v27  ;;  %v2245_v24 = vld [vmem:[%s4662_s14 + $0x8] sm:$0xff] }
 0x4b7   :  { %v1986_v8 = vmul.f32 %v1810_v29, %v4849_v32  ;;  %v1978_v48 = vsel %vm290_vm12, %v4302_v42, %v1964_v50  ;;  %v2045_v50 = vmul.f32 %v1977_v14, %v4850_v31  ;;  %v2043_v46 = vmul.f32 %v1950_v20, %v4852_v61  ;;  %v1312_v14 = vld [vmem:[%s4660_s9 + $0x8] sm:$0xff]  ;;  %v4859_v32 = vld [vmem:[#allocation41_spill] sm:$0xff] }
 0x4b8   :  { %v2049_v60 = vmul.f32 %v1978_v48, %v4850_v31  ;;  %2075 = vmatpush.msrb.mxu0 %v1981_v62  ;;  %v2035_v62 = vmul.f32 %v1926_v26, %v4856_v35  ;;  %v2028_v29 = vmul.f32 %v1908_v0, %v4857_v23  ;;  %v2027_v48 = vmul.f32 %v1902_v17, %v4860_v13  ;;  %v4862_v31 = vld [vmem:[#allocation35_spill] sm:$0xff]  ;;  %v4866_v37 = vld [vmem:[#allocation34_spill] sm:$0xff] }
 0x4b9   :  { %2120 = vmatpush.msra.mxu2 %v1986_v8  ;;  %2076 = vmatmul.f32.vlgmr.msrb.gmra.mxu0 %v4333_v3  ;;  %v2024_v8 = vmul.f32 %v4859_v32, %v4857_v23  ;;  %v1970_v20 = vpop.permute.xlu2 %1969  ;;  %v4867_v30 = vld [vmem:[#allocation30_spill] sm:$0xff] }
 0x4ba   :  { %2198 = vmatpush.msra.mxu0 %v2044_v39  ;;  %2097 = vmatpush.msra.mxu1 %v2049_v60  ;;  %v2031_v39 = vmul.f32 %v4858_v63, %v4856_v35  ;;  %v2020_v60 = vmul.f32 %v4862_v31, %v4861_v2  ;;  %v1973_v26 = vsel %vm290_vm12, %v4044_v36, %v1970_v20  ;;  %v4868_v35 = vld [vmem:[#allocation31_spill] sm:$0xff] }
 0x4bb   :  { %2121 = vmatpush.msra.mxu2 %v1982_v19  ;;  %v1878_v19 = vsel %vm194_vm5, %v4325_v6, %v4097_v47  ;;  %v1979_v0 = vsel %vm290_vm12, %v1970_v20, %v4848_v54  ;;  %v2047_v23 = vmul.f32 %v1973_v26, %v4867_v30  ;;  %v1855_v20 = vsel %vm170_vm13, %v4008_v28, %v4160_v34  ;;  %v4874_v28 = vld [vmem:[#allocation15_spill] sm:$0xff] }
 0x4bc   :  { %2199 = vmatpush.msra.mxu0 %v2040_v12  ;;  %2098 = vmatpush.msra.mxu1 %v2045_v50  ;;  %v2023_v12 = vmul.f32 %v4863_v38, %v4860_v13  ;;  %v4864_v50 = vld [vmem:[#allocation33_spill] sm:$0xff]  ;;  %v2048_v63 = vmul.f32 %v1979_v0, %v4868_v35 }
 0x4bd   :  { %2329 = vperm.xlu2 %2463, %v2245_v24   ;;  %v1870_v27 = vpop.permute.xlu0 %1869  ;;  %2122 = vmatmul.f32.vlgmr.msra.gmra.mxu2 %v4333_v3  ;;  %v2016_v61 = vmul.f32 %v4864_v50, %v4861_v2  ;;  %v4875_v50 = vld [vmem:[#allocation14_spill] sm:$0xff] }
 0x4be   :  { %2152 = vmatpush.msrb.mxu1 %v2043_v46  ;;  %2200 = vmatpush.msra.mxu0 %v2036_v33  ;;  %v1848_v5 = vpop.permute.xlu1 %1847  ;;  %v4865_v46 = vld [vmem:[#allocation4_spill] sm:$0xff]  ;;  %v1877_v36 = vsel %vm194_vm5, %v1870_v27, %v4042_v59  ;;  %v4870_v59 = vld [vmem:[#allocation5_spill] sm:$0xff] }
 0x4bf   :  { %2446 = vmatmul.msk.f32.gmra.mxu3 %vm2053_vm8, %v4355_v16  ;;  %2443 = vmatmul.msk.f32.vlgmr.msra.gmra.mxu1 %vm2053_vm8, %v4278_v7  ;;  %v2019_v33 = vmul.f32 %v4866_v37, %v4865_v46  ;;  %v1854_v54 = vsel %vm170_vm13, %v1848_v5, %v4183_v9  ;;  %v1853_v9 = vsel %vm170_vm13, %v4160_v34, %v4034_v40 }
 0x4c0   :  { %2153 = vmatpush.msrb.mxu1 %v2039_v22  ;;  %2201 = vmatpush.msra.mxu0 %v2032_v11 }
 0x4c1   :  { %2079 = vmatmul.f32.gmra.mxu0 %v4377_v51 }
 0x4c2   :  { %2154 = vmatpush.msrb.mxu1 %v2035_v62  ;;  %2202 = vmatpush.msra.mxu0 %v2028_v29  ;;  %v2015_v29 = vmul.f32 %v4870_v59, %v4865_v46  ;;  %v4876_v46 = vld [vmem:[#allocation9_spill] sm:$0xff] }
 0x4c4   :  { %2155 = vmatpush.msrb.mxu1 %v2031_v39  ;;  %2203 = vmatpush.msra.mxu0 %v2024_v8  ;;  %v2247_v39 = vld [vmem:[%s4663_s15 + $0x8] sm:$0xff] }
 0x4c5   :  { %1412 = vperm.xlu2 %2463, %v1312_v14   ;;  %v1972_v24 = vpop.permute.xlu0 %1971  ;;  %2125 = vmatmul.f32.gmra.mxu2 %v4377_v51  ;;  %v4871_v14 = vld [vmem:[#allocation20_spill] sm:$0xff] }
 0x4c6   :  { %2156 = vmatpush.msrb.mxu1 %v2027_v48  ;;  %2204 = vmatpush.msra.mxu0 %v2020_v60  ;;  %v1974_v58 = vsel %vm290_vm12, %v4217_v15, %v1972_v24  ;;  %v1980_v47 = vsel %vm290_vm12, %v1972_v24, %v4302_v42  ;;  %v1824_v22 = vpop.permute.xlu1 %1823  ;;  %v1880_v15 = vsel %vm194_vm5, %v4074_v49, %v4325_v6  ;;  %v4869_v42 = vld [vmem:[#allocation21_spill] sm:$0xff]  ;;  %v1798_v60 = vpop.permute.xlu2 %1797 }
 0x4c7   :  { %v2051_v11 = vmul.f32 %v1974_v58, %v4867_v30  ;;  %v2052_v62 = vmul.f32 %v1980_v47, %v4868_v35  ;;  %v2012_v17 = vmul.f32 %v1878_v19, %v4869_v42  ;;  %v1879_v49 = vsel %vm194_vm5, %v3980_v10, %v1870_v27  ;;  %v4872_v27 = vld [vmem:[#allocation17_spill] sm:$0xff]  ;;  %2444 = vmatmul.msk.f32.gmra.mxu1 %vm2053_vm8, %v4355_v16  ;;  %v4878_v58 = vld [vmem:[#allocation32_spill] sm:$0xff] }
 0x4c8   :  { %2157 = vmatpush.msrb.mxu1 %v2023_v12  ;;  %2205 = vmatpush.msra.mxu0 %v2016_v61  ;;  %v2008_v6 = vmul.f32 %v1877_v36, %v4869_v42  ;;  %v2011_v32 = vmul.f32 %v1880_v15, %v4871_v14  ;;  %v1856_v10 = vsel %vm170_vm13, %v4124_v53, %v1848_v5 }
 0x4c9   :  { %2189 = vmatpush.msra.mxu3 %v2051_v11  ;;  %2235 = vmatpush.msrb.mxu2 %v2052_v62  ;;  %v2004_v8 = vmul.f32 %v1854_v54, %v4872_v27  ;;  %v2007_v13 = vmul.f32 %v1879_v49, %v4871_v14  ;;  %v1830_v48 = vsel %vm146_vm9, %v1824_v22, %v4254_v25  ;;  %v4873_v25 = vld [vmem:[#allocation19_spill] sm:$0xff] }
 0x4ca   :  { %2158 = vmatpush.msrb.mxu1 %v2019_v33  ;;  %2206 = vmatpush.msra.mxu0 %v2012_v17  ;;  %v2000_v53 = vmul.f32 %v1853_v9, %v4872_v27  ;;  %v2003_v31 = vmul.f32 %v1856_v10, %v4873_v25  ;;  %v1832_v38 = vsel %vm146_vm9, %v4126_v57, %v1824_v22  ;;  %v4880_v9 = vld [vmem:[#allocation16_spill] sm:$0xff] }
 0x4cb   :  { %2190 = vmatpush.msra.mxu3 %v2047_v23  ;;  %2236 = vmatpush.msrb.mxu2 %v2048_v63  ;;  %v1996_v34 = vmul.f32 %v1830_v48, %v4874_v28  ;;  %v1805_v24 = vsel %vm122_vm10, %v1798_v60, %v4062_v18  ;;  %v1995_v61 = vmul.f32 %v1832_v38, %v4875_v50  ;;  %v4877_v18 = vld [vmem:[#allocation11_spill] sm:$0xff] }
 0x4cc   :  { %2159 = vmatpush.msrb.mxu1 %v2015_v29  ;;  %2207 = vmatpush.msra.mxu0 %v2008_v6  ;;  %v1984_v33 = vmul.f32 %v1805_v24, %v4876_v46  ;;  %v4879_v6 = vld [vmem:[#allocation3_spill] sm:$0xff] }
 0x4cd   :  { %2347 = vperm.xlu2 %2463, %v2247_v39   ;;  %v1822_v40 = vpop.permute.xlu0 %1821  ;;  %2447 = vmatmul.msk.f32.vlgmr.msra.gmra.mxu3 %vm2053_vm8, %v4278_v7 }
 0x4ce   :  { %2160 = vmatpush.msrb.mxu1 %v2011_v32  ;;  %2208 = vmatpush.msra.mxu0 %v2004_v8  ;;  %v1829_v5 = vsel %vm146_vm9, %v1822_v40, %v4085_v21  ;;  %v1800_v2 = vpop.permute.xlu1 %1799  ;;  %v1999_v21 = vmul.f32 %v1855_v20, %v4873_v25  ;;  %v1831_v57 = vsel %vm146_vm9, %v4060_v56, %v1822_v40  ;;  %v4881_v32 = vld [vmem:[#allocation18_spill] sm:$0xff]  ;;  %v4882_v8 = vld [vmem:[#allocation12_spill] sm:$0xff] }
 0x4cf   :  { %v1992_v12 = vmul.f32 %v1829_v5, %v4874_v28  ;;  %v1806_v19 = vsel %vm122_vm10, %v1800_v2, %v4249_v4  ;;  %2449 = vmatmul.msk.f32.vlgmr.msrb.gmra.mxu2 %vm2053_vm8, %v4278_v7  ;;  %v1808_v4 = vsel %vm122_vm10, %v4289_v43, %v1800_v2  ;;  %v1991_v7 = vmul.f32 %v1831_v57, %v4875_v50 }
 0x4d0   :  { %2161 = vmatpush.msrb.mxu1 %v2007_v13  ;;  %2209 = vmatpush.msra.mxu0 %v2000_v53  ;;  %v1988_v37 = vmul.f32 %v1806_v19, %v4876_v46  ;;  %v1807_v56 = vsel %vm122_vm10, %v4846_v1, %v1798_v60  ;;  %v1987_v26 = vmul.f32 %v1808_v4, %v4877_v18  ;;  %v4884_v19 = vld [vmem:[#allocation28_spill] sm:$0xff] }
 0x4d1   :  { %v1983_v43 = vmul.f32 %v1807_v56, %v4877_v18 }
 0x4d2   :  { %2162 = vmatpush.msrb.mxu1 %v2003_v31  ;;  %2210 = vmatpush.msra.mxu0 %v1996_v34 }
 0x4d4   :  { %2163 = vmatpush.msrb.mxu1 %v1999_v21  ;;  %2211 = vmatpush.msra.mxu0 %v1992_v12  ;;  %v4883_v12 = vld [vmem:[#allocation7_spill] sm:$0xff] }
 0x4d5   :  { %2448 = vmatmul.msk.f32.gmra.mxu3 %vm2053_vm8, %v4355_v16 }
 0x4d6   :  { %2164 = vmatpush.msrb.mxu1 %v1995_v61  ;;  %2212 = vmatpush.msra.mxu0 %v1988_v37 }
 0x4d7   :  { %2450 = vmatmul.msk.f32.gmra.mxu2 %vm2053_vm8, %v4355_v16 }
 0x4d8   :  { %2165 = vmatpush.msrb.mxu1 %v1991_v7  ;;  %2213 = vmatpush.msra.mxu0 %v1984_v33 }
 0x4d9   :  { %2214 = vmatmul.f32.vlgmr.msra.gmra.mxu0 %v4333_v3 }
 0x4da   :  { %2166 = vmatpush.msrb.mxu1 %v1987_v26 }
 0x4dc   :  { %2167 = vmatpush.msrb.mxu1 %v1983_v43 }
 0x4dd   :  { %2168 = vmatmul.f32.vlgmr.msrb.gmra.mxu1 %v4333_v3 }
 0x4e1   :  { %2217 = vmatmul.f32.gmra.mxu0 %v4377_v51 }
 0x4e5   :  { %2171 = vmatmul.f32.gmra.mxu1 %v4377_v51 }
 0x4f8   :  { %v1317_v44 = vpop.xlane.xlu0 %1316 }
 0x4f9   :  { %v1322_v1 = vpop.xlane.xlu1 %1321  ;;  %v1323_v47 = vmul.f32 %v1317_v44, %v4878_v58 }
 0x4fa   :  { %v4495_v22 = vmul.f32 %v1322_v1, %v4878_v58 }
 0x4fb   :  { %v1345_v36 = vmul.f32 %v1323_v47, %v1323_v47  ;;  %v1371_v21 = vsub.f32 %v4883_v12, %v1323_v47  ;;  %v1372_v57 = vsub.f32 %v4884_v19, %v1323_v47  ;;  %v1373_v24 = vsub.f32 %v3790_v55, %v1323_v47 }
 0x4fc   :  { %v1346_v3 = vmul.f32 %v4495_v22, %v4495_v22  ;;  %v1374_v46 = vsub.f32 %v3792_v41, %v1323_v47 }
 0x4ff   :  { %v1337_v0 = vpop.xlane.xlu2 %1336 }
 0x500   :  { %v1343_v30 = vmul.f32 %v1337_v0, %v4878_v58  ;;  %v1342_v11 = vpop.xlane.xlu0 %1341 }
 0x501   :  { %v1344_v16 = vmul.f32 %v1342_v11, %v4878_v58 }
 0x502   :  { %v1347_v35 = vsub.f32 %v1343_v30, %v1345_v36 }
 0x503   :  { %v1348_v62 = vsub.f32 %v1344_v16, %v1346_v3 }
 0x504   :  { %v1349_v51 = vadd.f32 1e-05, %v1347_v35  ;;  %v4885_v35 = vld [vmem:[#allocation29_spill] sm:$0xff] }
 0x505   :  { %v1350_v15 = vadd.f32 1e-05, %v1348_v62  ;;  %v1375_v62 = vsub.f32 %v4885_v35, %v4495_v22 }
 0x506   :  { %2479 = vrsqrt.f32 %v1349_v51  ;;  %vm1357_vm10 = vweird.f32 %v1349_v51 }
 0x507   :  { %2481 = vrsqrt.f32 %v1350_v15  ;;  %v1002_v42 = vpop.permute.xlu2 %1001  ;;  %vm1367_vm2 = vweird.f32 %v1350_v15 }
 0x508   :  { %v1016_v39 = vmul.f32 %v1002_v42, %v4879_v6  ;;  %v1017_v14 = vmul.f32 %v1002_v42, %v4880_v9  ;;  %v1018_v10 = vmul.f32 %v1002_v42, %v4881_v32  ;;  %v1019_v13 = vmul.f32 %v1002_v42, %v4882_v8  ;;  %v4886_v42 = vld [vmem:[#allocation13_spill] sm:$0xff] }
 0x50c   :  { %v2480_v17 = vpop.eup %2479 }
 0x50d   :  { %v2482_v23 = vpop.eup %2481  ;;  %v1352_v54 = vmul.f32 %v2480_v17, %v1349_v51  ;;  %vm1358_vm9 = vweird.f32 %v2480_v17 }
 0x50e   :  { %v1362_v59 = vmul.f32 %v2482_v23, %v1350_v15  ;;  %vm1359_vm13 = vmor %vm1357_vm10, %vm1358_vm9  ;;  %vm1368_vm5 = vweird.f32 %v2482_v23  ;;  %v1378_v15 = vsub.f32 %v3800_v52, %v4495_v22 }
 0x50f   :  { %v1353_v29 = vmul.f32 %v2480_v17, %v1352_v54  ;;  %v4501_v63 = vpop.permute.xlu2 %1394  ;;  %vm1369_vm11 = vmor %vm1367_vm2, %vm1368_vm5  ;;  %v1377_v54 = vsub.f32 %v3798_v45, %v4495_v22 }
 0x510   :  { %v1363_v49 = vmul.f32 %v2482_v23, %v1362_v59 }
 0x511   :  { %v1354_v27 = vmul.f32 0.5, %v1353_v29  ;;  %v1038_v48 = vpop.permute.xlu1 %1037 }
 0x512   :  { %v1052_v40 = vadd.f32 %v1038_v48, %v1016_v39  ;;  %v1053_v20 = vadd.f32 %v1038_v48, %v1017_v14  ;;  %v1054_v53 = vadd.f32 %v1038_v48, %v1018_v10  ;;  %v1364_v2 = vmul.f32 0.5, %v1363_v49 }
 0x513   :  { %v1355_v5 = vsub.f32 1.5, %v1354_v27  ;;  %v1055_v25 = vadd.f32 %v1038_v48, %v1019_v13 }
 0x514   :  { %v1068_v31 = vmax.f32 %v1052_v40, 0.0  ;;  %v1069_v60 = vmax.f32 %v1053_v20, 0.0  ;;  %v1070_v38 = vmax.f32 %v1054_v53, 0.0  ;;  %v1365_v61 = vsub.f32 1.5, %v1364_v2 }
 0x515   :  { %v1356_v28 = vmul.f32 %v2480_v17, %v1355_v5  ;;  %v1071_v34 = vmax.f32 %v1055_v25, 0.0 }
 0x516   :  { %2386 = vst [vmem:[%s4658_s16 + $0xa0] sm:$0xff] %v1068_v31  ;;  %v1366_v44 = vmul.f32 %v2482_v23, %v1365_v61 }
 0x517   :  { %v1360_v50 = vsel %vm1359_vm13, %v2480_v17, %v1356_v28  ;;  %2387 = vst [vmem:[%s4658_s16 + $0xa8] sm:$0xff] %v1069_v60  ;;  %v1408_v4 = vpop.permute.xlu2 %1407  ;;  %v1376_v17 = vsub.f32 %v4886_v42, %v4495_v22 }
 0x518   :  { %2388 = vst [vmem:[%s4658_s16 + $0xb0] sm:$0xff] %v1070_v38  ;;  %v1379_v37 = vmul.f32 %v1371_v21, %v1360_v50  ;;  %v1380_v7 = vmul.f32 %v1372_v57, %v1360_v50  ;;  %v1381_v56 = vmul.f32 %v1373_v24, %v1360_v50  ;;  %v1382_v33 = vmul.f32 %v1374_v46, %v1360_v50 }
 0x519   :  { %2389 = vst [vmem:[%s4658_s16 + $0xb8] sm:$0xff] %v1071_v34  ;;  %v1390_v55 = vpop.permute.xlu1 %1389  ;;  %v1370_v3 = vsel %vm1369_vm11, %v2482_v23, %v1366_v44 }
 0x51a   :  { %v1397_v18 = vmul.f32 %v1390_v55, %v1379_v37  ;;  %v1398_v26 = vmul.f32 %v1390_v55, %v1380_v7  ;;  %v1399_v43 = vmul.f32 %v1390_v55, %v1381_v56  ;;  %v1400_v1 = vmul.f32 %v1390_v55, %v1382_v33 }
 0x51b   :  { %v1383_v23 = vmul.f32 %v1375_v62, %v1370_v3  ;;  %v1384_v29 = vmul.f32 %v1376_v17, %v1370_v3  ;;  %v1385_v49 = vmul.f32 %v1377_v54, %v1370_v3  ;;  %v1386_v6 = vmul.f32 %v1378_v15, %v1370_v3 }
 0x51c   :  { %v1415_v0 = vadd.f32 %v1408_v4, %v1397_v18  ;;  %v1416_v36 = vadd.f32 %v1408_v4, %v1398_v26  ;;  %v1417_v30 = vadd.f32 %v1408_v4, %v1399_v43  ;;  %v1418_v41 = vadd.f32 %v1408_v4, %v1400_v1 }
 0x51d   :  { %v1401_v45 = vmul.f32 %v4501_v63, %v1383_v23  ;;  %v1402_v52 = vmul.f32 %v4501_v63, %v1384_v29  ;;  %v1403_v22 = vmul.f32 %v4501_v63, %v1385_v49  ;;  %v1404_v39 = vmul.f32 %v4501_v63, %v1386_v6  ;;  %v2246_v23 = vld [vmem:[%s4663_s15] sm:$0xff] }
 0x51e   :  { %v1423_v47 = vmax.f32 %v1415_v0, 0.0  ;;  %v1424_v11 = vmax.f32 %v1416_v36, 0.0  ;;  %v1425_v16 = vmax.f32 %v1417_v30, 0.0  ;;  %v1426_v59 = vmax.f32 %v1418_v41, 0.0 }
 0x51f   :  { %v4525_v51 = vpop.permute.xlu2 %2329 }
 0x520   :  { %2370 = vst [vmem:[%s4658_s16 + $0x20] sm:$0xff] %v1423_v47 }
 0x521   :  { %2371 = vst [vmem:[%s4658_s16 + $0x28] sm:$0xff] %v1424_v11 }
 0x522   :  { %2372 = vst [vmem:[%s4658_s16 + $0x30] sm:$0xff] %v1425_v16 }
 0x523   :  { %2373 = vst [vmem:[%s4658_s16 + $0x38] sm:$0xff] %v1426_v59  ;;  %v2244_v59 = vld [vmem:[%s4662_s14] sm:$0xff] }
 0x527   :  { %v1413_v9 = vpop.permute.xlu2 %1412 }
 0x528   :  { %v1419_v14 = vadd.f32 %v1413_v9, %v1401_v45  ;;  %v1420_v32 = vadd.f32 %v1413_v9, %v1402_v52  ;;  %v1421_v10 = vadd.f32 %v1413_v9, %v1403_v22  ;;  %v1422_v27 = vadd.f32 %v1413_v9, %v1404_v39 }
 0x52a   :  { %v1427_v8 = vmax.f32 %v1419_v14, 0.0  ;;  %v1428_v13 = vmax.f32 %v1420_v32, 0.0  ;;  %v1429_v48 = vmax.f32 %v1421_v10, 0.0  ;;  %v1430_v40 = vmax.f32 %v1422_v27, 0.0 }
 0x52c   :  { %2374 = vst [vmem:[%s4658_s16 + $0x40] sm:$0xff] %v1427_v8 }
 0x52d   :  { %2375 = vst [vmem:[%s4658_s16 + $0x48] sm:$0xff] %v1428_v13 }
 0x52e   :  { %2376 = vst [vmem:[%s4658_s16 + $0x50] sm:$0xff] %v1429_v48 }
 0x52f   :  { %2377 = vst [vmem:[%s4658_s16 + $0x58] sm:$0xff] %v1430_v40 }
 0x536   :  { %v2077_v53 = vpop.f32.mrf.mxu0 }
 0x538   :  { %v2146_v63 = vpop.f32.mrf.mxu3 }
 0x53c   :  { %v2100_v5 = vpop.f32.mrf.mxu1 }
 0x53d   :  { %v4561_v34 = vadd.f32 %v2100_v5, %v2077_v53 }
 0x53e   :  { %v2080_v31 = vpop.f32.mrf.mxu0 }
 0x53f   :  { %v2260_v61 = vmul.f32 %v4561_v34, %v4561_v34 }
 0x540   :  { %v2123_v20 = vpop.f32.mrf.mxu2 }
 0x541   :  { %v4563_v12 = vadd.f32 %v2146_v63, %v2123_v20 }
 0x542   :  { %v2149_v2 = vpop.f32.mrf.mxu3 }
 0x543   :  { %v2248_v57 = vadd.f32 %v4563_v12, %v4561_v34  ;;  %v2261_v4 = vmul.f32 %v4563_v12, %v4563_v12 }
 0x544   :  { %v2103_v60 = vpop.f32.mrf.mxu1 }
 0x545   :  { %v4575_v46 = vadd.f32 %v2103_v60, %v2080_v31  ;;  %v2268_v43 = vadd.f32 %v2261_v4, %v2260_v61 }
 0x547   :  { %v2264_v44 = vmul.f32 %v4575_v46, %v4575_v46 }
 0x548   :  { %v2126_v25 = vpop.f32.mrf.mxu2 }
 0x549   :  { %v4577_v37 = vadd.f32 %v2149_v2, %v2126_v25 }
 0x54b   :  { %v2265_v1 = vmul.f32 %v4577_v37, %v4577_v37  ;;  %v2253_v42 = vadd.f32 %v4577_v37, %v4575_v46 }
 0x54d   :  { %v2273_v11 = vadd.f32 %v2265_v1, %v2264_v44 }
 0x550   :  { %v2192_v28 = vpop.f32.mrf.mxu3 }
 0x552   :  { %v2238_v38 = vpop.f32.mrf.mxu2 }
 0x556   :  { %v2215_v21 = vpop.f32.mrf.mxu0 }
 0x557   :  { %v4569_v50 = vadd.f32 %v2238_v38, %v2215_v21 }
 0x558   :  { %v2195_v26 = vpop.f32.mrf.mxu3 }
 0x559   :  { %v2263_v30 = vmul.f32 %v4569_v50, %v4569_v50 }
 0x55a   :  { %v2169_v19 = vpop.f32.mrf.mxu1  ;;  %v2241_v56 = vpop.f32.mrf.mxu2 }
 0x55b   :  { %v4567_v24 = vadd.f32 %v2192_v28, %v2169_v19 }
 0x55d   :  { %v2249_v7 = vadd.f32 %v2248_v57, %v4567_v24  ;;  %v2262_v55 = vmul.f32 %v4567_v24, %v4567_v24 }
 0x55e   :  { %v2218_v18 = vpop.f32.mrf.mxu0 }
 0x55f   :  { %v2250_v33 = vadd.f32 %v2249_v7, %v4569_v50  ;;  %v4587_v0 = vadd.f32 %v2241_v56, %v2218_v18  ;;  %v2269_v47 = vadd.f32 %v2268_v43, %v2262_v55 }
 0x561   :  { %2251 = vadd.xlane.f32.xlu0 %v2250_v33  ;;  %v2267_v3 = vmul.f32 %v4587_v0, %v4587_v0  ;;  %v2270_v35 = vadd.f32 %v2269_v47, %v2263_v30 }
 0x562   :  { %v2172_v36 = vpop.f32.mrf.mxu1 }
 0x563   :  { %v4591_v41 = vadd.f32 %v2195_v26, %v2172_v36 }
 0x565   :  { %v2266_v16 = vmul.f32 %v4591_v41, %v4591_v41  ;;  %v2254_v54 = vadd.f32 %v2253_v42, %v4591_v41  ;;  %v2348_v42 = vpop.permute.xlu2 %2347 }
 0x567   :  { %v2274_v62 = vadd.f32 %v2273_v11, %v2266_v16  ;;  %v2255_v15 = vadd.f32 %v2254_v54, %v4587_v0 }
 0x569   :  { %2271 = vadd.xlane.f32.xlu0 %v2270_v35  ;;  %v2275_v17 = vadd.f32 %v2274_v62, %v2267_v3 }
 0x56b   :  { %2276 = vadd.xlane.f32.xlu1 %v2275_v17 }
 0x571   :  { %2256 = vadd.xlane.f32.xlu0 %v2255_v15 }
 0x585   :  { %2324 = vperm.xlu0 %2464, %v2244_v59  }
 0x58d   :  { %2342 = vperm.xlu0 %2464, %v2246_v23  }
 0x5d4   :  { %v2252_v29 = vpop.xlane.xlu0 %2251 }
 0x5d5   :  { %v2258_v49 = vmul.f32 %v2252_v29, %v4878_v58 }
 0x5d7   :  { %v2280_v45 = vmul.f32 %v2258_v49, %v2258_v49  ;;  %v2307_v21 = vsub.f32 %v4563_v12, %v2258_v49  ;;  %v2308_v19 = vsub.f32 %v4567_v24, %v2258_v49  ;;  %v2309_v57 = vsub.f32 %v4569_v50, %v2258_v49 }
 0x5dc   :  { %v2272_v6 = vpop.xlane.xlu0 %2271 }
 0x5dd   :  { %v2278_v52 = vmul.f32 %v2272_v6, %v4878_v58 }
 0x5de   :  { %v2277_v9 = vpop.xlane.xlu1 %2276 }
 0x5df   :  { %v2282_v22 = vsub.f32 %v2278_v52, %v2280_v45  ;;  %v2279_v10 = vmul.f32 %v2277_v9, %v4878_v58 }
 0x5e1   :  { %v2284_v39 = vadd.f32 1e-05, %v2282_v22 }
 0x5e3   :  { %2483 = vrsqrt.f32 %v2284_v39  ;;  %vm2292_vm12 = vweird.f32 %v2284_v39 }
 0x5e4   :  { %v2257_v14 = vpop.xlane.xlu0 %2256 }
 0x5e5   :  { %v2259_v32 = vmul.f32 %v2257_v14, %v4878_v58  ;;  %v2306_v58 = vsub.f32 %v4561_v34, %v2258_v49 }
 0x5e7   :  { %v2281_v27 = vmul.f32 %v2259_v32, %v2259_v32  ;;  %v2310_v18 = vsub.f32 %v4575_v46, %v2259_v32  ;;  %v2311_v26 = vsub.f32 %v4577_v37, %v2259_v32  ;;  %v2312_v34 = vsub.f32 %v4591_v41, %v2259_v32 }
 0x5e8   :  { %v2313_v12 = vsub.f32 %v4587_v0, %v2259_v32 }
 0x5e9   :  { %v2484_v8 = vpop.eup %2483  ;;  %v2283_v13 = vsub.f32 %v2279_v10, %v2281_v27 }
 0x5ea   :  { %v2287_v48 = vmul.f32 %v2484_v8, %v2284_v39  ;;  %vm2293_vm3 = vweird.f32 %v2484_v8 }
 0x5eb   :  { %v2285_v40 = vadd.f32 1e-05, %v2283_v13  ;;  %vm2294_vm6 = vmor %vm2292_vm12, %vm2293_vm3 }
 0x5ec   :  { %v2288_v63 = vmul.f32 %v2484_v8, %v2287_v48 }
 0x5ed   :  { %2485 = vrsqrt.f32 %v2285_v40  ;;  %vm2302_vm4 = vweird.f32 %v2285_v40 }
 0x5ee   :  { %v2289_v20 = vmul.f32 0.5, %v2288_v63 }
 0x5f0   :  { %v2290_v53 = vsub.f32 1.5, %v2289_v20 }
 0x5f2   :  { %v2291_v2 = vmul.f32 %v2484_v8, %v2290_v53 }
 0x5f3   :  { %v2486_v5 = vpop.eup %2485 }
 0x5f4   :  { %v2297_v25 = vmul.f32 %v2486_v5, %v2285_v40  ;;  %v2295_v60 = vsel %vm2294_vm6, %v2484_v8, %v2291_v2  ;;  %vm2303_vm14 = vweird.f32 %v2486_v5 }
 0x5f5   :  { %v2314_v4 = vmul.f32 %v2306_v58, %v2295_v60  ;;  %v2315_v7 = vmul.f32 %v2307_v21, %v2295_v60  ;;  %v2316_v56 = vmul.f32 %v2308_v19, %v2295_v60  ;;  %v2317_v33 = vmul.f32 %v2309_v57, %v2295_v60  ;;  %vm2304_vm7 = vmor %vm2302_vm4, %vm2303_vm14 }
 0x5f6   :  { %v2298_v31 = vmul.f32 %v2486_v5, %v2297_v25 }
 0x5f7   :  { %v2325_v38 = vpop.permute.xlu0 %2324 }
 0x5f8   :  { %v2299_v28 = vmul.f32 0.5, %v2298_v31  ;;  %v2332_v43 = vmul.f32 %v2325_v38, %v2314_v4  ;;  %v2333_v44 = vmul.f32 %v2325_v38, %v2315_v7  ;;  %v2334_v50 = vmul.f32 %v2325_v38, %v2316_v56 }
 0x5f9   :  { %v2335_v16 = vmul.f32 %v2325_v38, %v2317_v33 }
 0x5fa   :  { %v2300_v61 = vsub.f32 1.5, %v2299_v28 }
 0x5fc   :  { %v2301_v55 = vmul.f32 %v2486_v5, %v2300_v61 }
 0x5fe   :  { %v2305_v24 = vsel %vm2304_vm7, %v2486_v5, %v2301_v55 }
 0x5ff   :  { %v2318_v1 = vmul.f32 %v2310_v18, %v2305_v24  ;;  %v2319_v36 = vmul.f32 %v2311_v26, %v2305_v24  ;;  %v2320_v30 = vmul.f32 %v2312_v34, %v2305_v24  ;;  %v2321_v47 = vmul.f32 %v2313_v12, %v2305_v24  ;;  %v2343_v11 = vpop.permute.xlu0 %2342 }
 0x600   :  { %v2350_v3 = vadd.f32 %v2343_v11, %v2332_v43  ;;  %v2351_v35 = vadd.f32 %v2343_v11, %v2333_v44  ;;  %v2352_v62 = vadd.f32 %v2343_v11, %v2334_v50  ;;  %v2353_v17 = vadd.f32 %v2343_v11, %v2335_v16 }
 0x601   :  { %v2336_v46 = vmul.f32 %v4525_v51, %v2318_v1  ;;  %v2337_v37 = vmul.f32 %v4525_v51, %v2319_v36  ;;  %v2338_v41 = vmul.f32 %v4525_v51, %v2320_v30  ;;  %v2339_v0 = vmul.f32 %v4525_v51, %v2321_v47 }
 0x602   :  { %v2358_v54 = vmax.f32 %v2350_v3, 0.0  ;;  %v2359_v15 = vmax.f32 %v2351_v35, 0.0  ;;  %v2360_v59 = vmax.f32 %v2352_v62, 0.0  ;;  %v2361_v39 = vmax.f32 %v2353_v17, 0.0 }
 0x603   :  { %v2354_v23 = vadd.f32 %v2348_v42, %v2336_v46  ;;  %v2355_v29 = vadd.f32 %v2348_v42, %v2337_v37  ;;  %v2356_v49 = vadd.f32 %v2348_v42, %v2338_v41  ;;  %v2357_v6 = vadd.f32 %v2348_v42, %v2339_v0 }
 0x604   :  { %2378 = vst [vmem:[%s4658_s16 + $0x60] sm:$0xff] %v2358_v54 }
 0x605   :  { %v2362_v45 = vmax.f32 %v2354_v23, 0.0  ;;  %v2363_v52 = vmax.f32 %v2355_v29, 0.0  ;;  %v2364_v22 = vmax.f32 %v2356_v49, 0.0  ;;  %2379 = vst [vmem:[%s4658_s16 + $0x68] sm:$0xff] %v2359_v15  ;;  %v2365_v51 = vmax.f32 %v2357_v6, 0.0 }
 0x606   :  { %2380 = vst [vmem:[%s4658_s16 + $0x70] sm:$0xff] %v2360_v59 }
 0x607   :  { %2382 = vst [vmem:[%s4658_s16 + $0x80] sm:$0xff] %v2362_v45 }
 0x608   :  { %2383 = vst [vmem:[%s4658_s16 + $0x88] sm:$0xff] %v2363_v52 }
 0x609   :  { %2384 = vst [vmem:[%s4658_s16 + $0x90] sm:$0xff] %v2364_v22 }
 0x60a   :  { %2385 = vst [vmem:[%s4658_s16 + $0x98] sm:$0xff] %v2365_v51 }
 0x60b   :  { %2381 = vst [vmem:[%s4658_s16 + $0x78] sm:$0xff] %v2361_v39 }

</bundles_post_ra>
